<compile_context>
chip_gen: v7x
topology: tpu7x:2x2x1
jax: 0.10.0
libtpu: 0.0.40
codegen_flags: <defaults>
</compile_context>

<pallas_src>
import functools

import jax
import jax.numpy as jnp
import numpy as np
from jax.experimental import pallas as pl
from jax.experimental.pallas import tpu as pltpu

LEAKY_SLOPE = 0.2
BN_EPS = 0.8                       # nn.BatchNorm1d(out_feat, 0.8) -> eps = 0.8
HEAD_WEIGHT_DTYPE = jnp.bfloat16   # streamed head weight dtype (f32 accumulation)


def _leaky_relu(x):
    # slope < 1  =>  leaky_relu(x) == max(x, slope * x); saves a compare+select.
    return jnp.maximum(x, LEAKY_SLOPE * x)


def _bn_leaky(x, gamma, beta):
    """Training-mode BatchNorm1d folded into one scale/shift, then LeakyReLU.

    gamma/beta are (1, N) lane-dense rows -> one mul + one add per element.
    """
    mu = jnp.mean(x, axis=0, keepdims=True)
    var = jnp.mean((x - mu) ** 2, axis=0, keepdims=True)
    scale = jax.lax.rsqrt(var + BN_EPS) * gamma
    shift = beta - mu * scale
    return _leaky_relu(x * scale + shift)


# ---------------------------------------------------------------------------
# Kernel 1: backbone  z -> h4 (B, 1024).  BatchNorm is batch-global, so this
# runs once with no grid; all operands (~3 MiB of f32 weights) stay resident
# in VMEM with no pipelining / double-buffering.
# ---------------------------------------------------------------------------
def backbone_kernel(
    z_ref,
    w1_ref, b1_ref,
    w2_ref, b2_ref, g2_ref, be2_ref,
    w3_ref, b3_ref, g3_ref, be3_ref,
    w4_ref, b4_ref, g4_ref, be4_ref,
    h4_ref,
):
    z = z_ref[...]
    h = _leaky_relu(
        jnp.dot(z, w1_ref[...], preferred_element_type=jnp.float32) + b1_ref[...])
    h = _bn_leaky(
        jnp.dot(h, w2_ref[...], preferred_element_type=jnp.float32) + b2_ref[...],
        g2_ref[...], be2_ref[...])
    h = _bn_leaky(
        jnp.dot(h, w3_ref[...], preferred_element_type=jnp.float32) + b3_ref[...],
        g3_ref[...], be3_ref[...])
    h = _bn_leaky(
        jnp.dot(h, w4_ref[...], preferred_element_type=jnp.float32) + b4_ref[...],
        g4_ref[...], be4_ref[...])
    h4_ref[...] = h


# ---------------------------------------------------------------------------
# Kernel 2: head  tanh(h4 @ w5 + b5), tiled over output features.  Each grid
# step is independent (resident h4, streamed w5/b5/out tiles), so the grid
# axis is "parallel" and megacore-shards on v7x.
# ---------------------------------------------------------------------------
def head_kernel(h4_ref, w5_ref, b5_ref, out_ref):
    h4 = h4_ref[...].astype(w5_ref.dtype)        # bf16 x bf16 -> f32 on the MXU
    acc = jnp.dot(h4, w5_ref[...], preferred_element_type=jnp.float32)
    out_ref[...] = jnp.tanh(acc + b5_ref[...])


# ---------------------------------------------------------------------------
# Generation-aware sizing helpers.
# ---------------------------------------------------------------------------
def _vmem_capacity_bytes():
    try:
        return int(pltpu.get_tpu_info().vmem_capacity_bytes)
    except Exception:
        return 64 << 20                      # conservative (v7x-sized) fallback


def _head_tile_n(n_pad128, w5_bytes, vmem_cap):
    """Max lane-width of one head tile (multiple of 128), generation-aware."""
    if vmem_cap >= (100 << 20):              # v5e / v6e: 128 MiB physical VMEM
        tn_max = 8192 if w5_bytes <= 2 else 4096
    else:                                    # v7x: 64 MiB physical VMEM
        tn_max = 4096 if w5_bytes <= 2 else 2048
    return min(n_pad128, tn_max)


def _head_vmem_limit(B, tn, w5_bytes, vmem_cap):
    """Footprint-derived scoped-VMEM limit; every operand counted x2 (pipelined)."""
    f32 = 4
    resident = 2 * B * 1024 * f32                                      # h4
    streamed = 2 * (1024 * tn * w5_bytes + tn * f32 + B * tn * f32)    # w5, b5, out
    total = resident + streamed
    limit = int(1.25 * total) + (4 << 20)        # headroom + internal scratch
    return max(min(limit, int(0.75 * vmem_cap)), 16 << 20)


@functools.partial(jax.jit, static_argnames=("img_shape",))
def generator_forward(z, params, img_shape):
    """z: (B, latent_dim) float32.  Returns (B, C, H, W) float32 (NCHW)."""
    B, latent = z.shape
    C, H, W = img_shape
    out_dim = C * H * W

    # 1-D per-feature params -> (1, N) lane-dense rows, once, in the wrapper.
    def row(name):
        return params[name].reshape(1, -1)

    # ---- Backbone: single un-gridded pallas_call (default whole-array VMEM
    # blocks), so BatchNorm sees the full batch.
    h4 = pl.pallas_call(
        backbone_kernel,
        out_shape=jax.ShapeDtypeStruct((B, 1024), jnp.float32),
    )(
        z,
        params["w1"], row("b1"),
        params["w2"], row("b2"), row("g2"), row("be2"),
        params["w3"], row("b3"), row("g3"), row("be3"),
        params["w4"], row("b4"), row("g4"), row("be4"),
    )

    # ---- Head: pad N to a lane-dense multiple of the tile, stream bf16 w5.
    vmem_cap = _vmem_capacity_bytes()
    w5_bytes = jnp.dtype(HEAD_WEIGHT_DTYPE).itemsize
    n_pad128 = ((out_dim + 127) // 128) * 128
    tn = _head_tile_n(n_pad128, w5_bytes, vmem_cap)
    n_steps = (n_pad128 + tn - 1) // tn
    n_pad = n_steps * tn

    w5 = params["w5"]
    b5 = params["b5"].reshape(1, -1)
    if n_pad != out_dim:
        w5 = jnp.pad(w5, ((0, 0), (0, n_pad - out_dim)))
        b5 = jnp.pad(b5, ((0, 0), (0, n_pad - out_dim)))
    w5 = w5.astype(HEAD_WEIGHT_DTYPE)   # halve the dominant HBM stream / VMEM

    flat = pl.pallas_call(
        head_kernel,
        out_shape=jax.ShapeDtypeStruct((B, n_pad), jnp.float32),
        grid_spec=pltpu.PrefetchScalarGridSpec(
            num_scalar_prefetch=0,
            grid=(n_steps,),
            in_specs=[
                pl.BlockSpec((B, 1024), lambda j: (0, 0)),    # resident activations
                pl.BlockSpec((1024, tn), lambda j: (0, j)),   # streamed weight tile
                pl.BlockSpec((1, tn), lambda j: (0, j)),      # streamed bias tile
            ],
            out_specs=pl.BlockSpec((B, tn), lambda j: (0, j)),
        ),
        compiler_params=pltpu.CompilerParams(
            # Head tiles are fully independent -> safe to megacore-shard (v7x).
            dimension_semantics=("parallel",),
            vmem_limit_bytes=_head_vmem_limit(B, tn, w5_bytes, vmem_cap),
        ),
    )(h4, w5, b5)

    if n_pad != out_dim:
        flat = flat[:, :out_dim]
    # Glue: img.view(-1, C, H, W)
    return flat.reshape(B, C, H, W)


def init_params(key, latent_dim, img_shape):
    """Deterministic init mirroring nn.Linear default (U(-1/sqrt(fan_in), +...))."""
    C, H, W = img_shape
    out_dim = C * H * W
    dims = [(latent_dim, 128), (128, 256), (256, 512), (512, 1024), (1024, out_dim)]
    params = {}
    keys = jax.random.split(key, 2 * len(dims))
    for i, (fan_in, fan_out) in enumerate(dims):
        bound = 1.0 / np.sqrt(fan_in)
        # weights stored as (in, out) so the kernels compute x @ W + b
        params[f"w{i+1}"] = jax.random.uniform(
            keys[2 * i], (fan_in, fan_out), jnp.float32, -bound, bound)
        params[f"b{i+1}"] = jax.random.uniform(
            keys[2 * i + 1], (fan_out,), jnp.float32, -bound, bound)
    # BatchNorm affine params (default init: gamma=1, beta=0) for blocks 2..4
    for i, (_, fan_out) in zip((2, 3, 4), dims[1:4]):
        params[f"g{i}"] = jnp.ones((fan_out,), jnp.float32)
        params[f"be{i}"] = jnp.zeros((fan_out,), jnp.float32)
    return params


def reference_forward(z, params, img_shape):
    """Pure-JAX f32 reference (unfolded BN), matching the PyTorch forward."""
    def bn(x, gamma, beta):
        mu = jnp.mean(x, axis=0, keepdims=True)
        var = jnp.mean((x - mu) ** 2, axis=0, keepdims=True)
        return (x - mu) * jax.lax.rsqrt(var + BN_EPS) * gamma[None, :] + beta[None, :]

    h = _leaky_relu(z @ params["w1"] + params["b1"])
    for i in (2, 3, 4):
        h = h @ params[f"w{i}"] + params[f"b{i}"]
        h = _leaky_relu(bn(h, params[f"g{i}"], params[f"be{i}"]))
    h = jnp.tanh(h @ params["w5"] + params["b5"])
    C, H, W = img_shape
    return h.reshape(-1, C, H, W)


if __name__ == "__main__":
    latent_dim = 32
    img_shape = (1, 16, 16)   # (C, H, W) -> output dim 256
    batch = 8                 # >= 8 keeps f32 blocks sublane-dense (perf only)

    key = jax.random.PRNGKey(0)
    k_z, k_p = jax.random.split(key)
    z = jax.random.normal(k_z, (batch, latent_dim), jnp.float32)
    params = init_params(k_p, latent_dim, img_shape)

    img = generator_forward(z, params, img_shape)
    img = jax.block_until_ready(img)

    ref = reference_forward(z, params, img_shape)
    assert img.shape == (batch, *img_shape), img.shape
    # Head weights/activations are quantized to bf16 for the final matmul
    # (f32 accumulation); observed error vs the f32 reference is ~1e-3 on the
    # bounded tanh output, so 1e-2 tolerances leave ample margin.
    np.testing.assert_allclose(np.asarray(img), np.asarray(ref), rtol=1e-2, atol=1e-2)

    print("KERNEL_OK")
</pallas_src>

<mosaic_0001>
module attributes {stable_mosaic.version = 11 : i64} {
  func.func @backbone_kernel(%arg0: memref<8x32xf32, #tpu.memory_space<vmem>>, %arg1: memref<32x128xf32, #tpu.memory_space<vmem>>, %arg2: memref<1x128xf32, #tpu.memory_space<vmem>>, %arg3: memref<128x256xf32, #tpu.memory_space<vmem>>, %arg4: memref<1x256xf32, #tpu.memory_space<vmem>>, %arg5: memref<1x256xf32, #tpu.memory_space<vmem>>, %arg6: memref<1x256xf32, #tpu.memory_space<vmem>>, %arg7: memref<256x512xf32, #tpu.memory_space<vmem>>, %arg8: memref<1x512xf32, #tpu.memory_space<vmem>>, %arg9: memref<1x512xf32, #tpu.memory_space<vmem>>, %arg10: memref<1x512xf32, #tpu.memory_space<vmem>>, %arg11: memref<512x1024xf32, #tpu.memory_space<vmem>>, %arg12: memref<1x1024xf32, #tpu.memory_space<vmem>>, %arg13: memref<1x1024xf32, #tpu.memory_space<vmem>>, %arg14: memref<1x1024xf32, #tpu.memory_space<vmem>>, %arg15: memref<8x1024xf32, #tpu.memory_space<vmem>>) attributes {dimension_semantics = [], scalar_prefetch = 0 : i64, scratch_operands = 0 : i64, tpu.core_type = #tpu.core_type<tc>} {
    %c0 = arith.constant 0 : index
    %c0_0 = arith.constant 0 : index
    %0 = vector.load %arg0[%c0, %c0_0] : memref<8x32xf32, #tpu.memory_space<vmem>>, vector<8x32xf32>
    %c0_1 = arith.constant 0 : index
    %c0_2 = arith.constant 0 : index
    %1 = vector.load %arg1[%c0_1, %c0_2] : memref<32x128xf32, #tpu.memory_space<vmem>>, vector<32x128xf32>
    %cst = arith.constant dense<0.000000e+00> : vector<8x128xf32>
    %2 = tpu.matmul %0, %1, %cst {dimension_numbers = #tpu.dot_dimension_numbers<[1], [0], [0], [1], [0, 0, 1, 1], [], []>} : vector<8x32xf32>, vector<32x128xf32>, vector<8x128xf32> -> vector<8x128xf32>
    %c0_3 = arith.constant 0 : index
    %c0_4 = arith.constant 0 : index
    %3 = vector.load %arg2[%c0_3, %c0_4] : memref<1x128xf32, #tpu.memory_space<vmem>>, vector<1x128xf32>
    %4 = vector.broadcast %3 : vector<1x128xf32> to vector<8x128xf32>
    %5 = arith.addf %2, %4 : vector<8x128xf32>
    %cst_5 = arith.constant 2.000000e-01 : f32
    %6 = vector.broadcast %cst_5 : f32 to vector<8x128xf32>
    %7 = arith.mulf %6, %5 : vector<8x128xf32>
    %8 = arith.maximumf %5, %7 : vector<8x128xf32>
    %c0_6 = arith.constant 0 : index
    %c0_7 = arith.constant 0 : index
    %9 = vector.load %arg3[%c0_6, %c0_7] : memref<128x256xf32, #tpu.memory_space<vmem>>, vector<128x256xf32>
    %cst_8 = arith.constant dense<0.000000e+00> : vector<8x256xf32>
    %10 = tpu.matmul %8, %9, %cst_8 {dimension_numbers = #tpu.dot_dimension_numbers<[1], [0], [0], [1], [0, 0, 1, 1], [], []>} : vector<8x128xf32>, vector<128x256xf32>, vector<8x256xf32> -> vector<8x256xf32>
    %c0_9 = arith.constant 0 : index
    %c0_10 = arith.constant 0 : index
    %11 = vector.load %arg4[%c0_9, %c0_10] : memref<1x256xf32, #tpu.memory_space<vmem>>, vector<1x256xf32>
    %12 = vector.broadcast %11 : vector<1x256xf32> to vector<8x256xf32>
    %13 = arith.addf %10, %12 : vector<8x256xf32>
    %c0_11 = arith.constant 0 : index
    %c0_12 = arith.constant 0 : index
    %14 = vector.load %arg5[%c0_11, %c0_12] : memref<1x256xf32, #tpu.memory_space<vmem>>, vector<1x256xf32>
    %c0_13 = arith.constant 0 : index
    %c0_14 = arith.constant 0 : index
    %15 = vector.load %arg6[%c0_13, %c0_14] : memref<1x256xf32, #tpu.memory_space<vmem>>, vector<1x256xf32>
    %cst_15 = arith.constant dense<0.000000e+00> : vector<256xf32>
    %16 = vector.multi_reduction <add>, %13, %cst_15 [0] : vector<8x256xf32> to vector<256xf32>
    %17 = vector.shape_cast %16 : vector<256xf32> to vector<1x256xf32>
    %cst_16 = arith.constant 8.000000e+00 : f32
    %18 = vector.broadcast %cst_16 : f32 to vector<1x256xf32>
    %19 = arith.divf %17, %18 : vector<1x256xf32>
    %20 = vector.broadcast %19 : vector<1x256xf32> to vector<8x256xf32>
    %21 = arith.subf %13, %20 : vector<8x256xf32>
    %22 = arith.mulf %21, %21 : vector<8x256xf32>
    %cst_17 = arith.constant dense<0.000000e+00> : vector<256xf32>
    %23 = vector.multi_reduction <add>, %22, %cst_17 [0] : vector<8x256xf32> to vector<256xf32>
    %24 = vector.shape_cast %23 : vector<256xf32> to vector<1x256xf32>
    %cst_18 = arith.constant 8.000000e+00 : f32
    %25 = vector.broadcast %cst_18 : f32 to vector<1x256xf32>
    %26 = arith.divf %24, %25 : vector<1x256xf32>
    %cst_19 = arith.constant 8.000000e-01 : f32
    %27 = vector.broadcast %cst_19 : f32 to vector<1x256xf32>
    %28 = arith.addf %26, %27 : vector<1x256xf32>
    %29 = math.rsqrt %28 : vector<1x256xf32>
    %30 = arith.mulf %29, %14 : vector<1x256xf32>
    %31 = arith.mulf %19, %30 : vector<1x256xf32>
    %32 = arith.subf %15, %31 : vector<1x256xf32>
    %33 = vector.broadcast %30 : vector<1x256xf32> to vector<8x256xf32>
    %34 = arith.mulf %13, %33 : vector<8x256xf32>
    %35 = vector.broadcast %32 : vector<1x256xf32> to vector<8x256xf32>
    %36 = arith.addf %34, %35 : vector<8x256xf32>
    %cst_20 = arith.constant 2.000000e-01 : f32
    %37 = vector.broadcast %cst_20 : f32 to vector<8x256xf32>
    %38 = arith.mulf %37, %36 : vector<8x256xf32>
    %39 = arith.maximumf %36, %38 : vector<8x256xf32>
    %c0_21 = arith.constant 0 : index
    %c0_22 = arith.constant 0 : index
    %40 = vector.load %arg7[%c0_21, %c0_22] : memref<256x512xf32, #tpu.memory_space<vmem>>, vector<256x512xf32>
    %cst_23 = arith.constant dense<0.000000e+00> : vector<8x512xf32>
    %41 = tpu.matmul %39, %40, %cst_23 {dimension_numbers = #tpu.dot_dimension_numbers<[1], [0], [0], [1], [0, 0, 1, 1], [], []>} : vector<8x256xf32>, vector<256x512xf32>, vector<8x512xf32> -> vector<8x512xf32>
    %c0_24 = arith.constant 0 : index
    %c0_25 = arith.constant 0 : index
    %42 = vector.load %arg8[%c0_24, %c0_25] : memref<1x512xf32, #tpu.memory_space<vmem>>, vector<1x512xf32>
    %43 = vector.broadcast %42 : vector<1x512xf32> to vector<8x512xf32>
    %44 = arith.addf %41, %43 : vector<8x512xf32>
    %c0_26 = arith.constant 0 : index
    %c0_27 = arith.constant 0 : index
    %45 = vector.load %arg9[%c0_26, %c0_27] : memref<1x512xf32, #tpu.memory_space<vmem>>, vector<1x512xf32>
    %c0_28 = arith.constant 0 : index
    %c0_29 = arith.constant 0 : index
    %46 = vector.load %arg10[%c0_28, %c0_29] : memref<1x512xf32, #tpu.memory_space<vmem>>, vector<1x512xf32>
    %cst_30 = arith.constant dense<0.000000e+00> : vector<512xf32>
    %47 = vector.multi_reduction <add>, %44, %cst_30 [0] : vector<8x512xf32> to vector<512xf32>
    %48 = vector.shape_cast %47 : vector<512xf32> to vector<1x512xf32>
    %cst_31 = arith.constant 8.000000e+00 : f32
    %49 = vector.broadcast %cst_31 : f32 to vector<1x512xf32>
    %50 = arith.divf %48, %49 : vector<1x512xf32>
    %51 = vector.broadcast %50 : vector<1x512xf32> to vector<8x512xf32>
    %52 = arith.subf %44, %51 : vector<8x512xf32>
    %53 = arith.mulf %52, %52 : vector<8x512xf32>
    %cst_32 = arith.constant dense<0.000000e+00> : vector<512xf32>
    %54 = vector.multi_reduction <add>, %53, %cst_32 [0] : vector<8x512xf32> to vector<512xf32>
    %55 = vector.shape_cast %54 : vector<512xf32> to vector<1x512xf32>
    %cst_33 = arith.constant 8.000000e+00 : f32
    %56 = vector.broadcast %cst_33 : f32 to vector<1x512xf32>
    %57 = arith.divf %55, %56 : vector<1x512xf32>
    %cst_34 = arith.constant 8.000000e-01 : f32
    %58 = vector.broadcast %cst_34 : f32 to vector<1x512xf32>
    %59 = arith.addf %57, %58 : vector<1x512xf32>
    %60 = math.rsqrt %59 : vector<1x512xf32>
    %61 = arith.mulf %60, %45 : vector<1x512xf32>
    %62 = arith.mulf %50, %61 : vector<1x512xf32>
    %63 = arith.subf %46, %62 : vector<1x512xf32>
    %64 = vector.broadcast %61 : vector<1x512xf32> to vector<8x512xf32>
    %65 = arith.mulf %44, %64 : vector<8x512xf32>
    %66 = vector.broadcast %63 : vector<1x512xf32> to vector<8x512xf32>
    %67 = arith.addf %65, %66 : vector<8x512xf32>
    %cst_35 = arith.constant 2.000000e-01 : f32
    %68 = vector.broadcast %cst_35 : f32 to vector<8x512xf32>
    %69 = arith.mulf %68, %67 : vector<8x512xf32>
    %70 = arith.maximumf %67, %69 : vector<8x512xf32>
    %c0_36 = arith.constant 0 : index
    %c0_37 = arith.constant 0 : index
    %71 = vector.load %arg11[%c0_36, %c0_37] : memref<512x1024xf32, #tpu.memory_space<vmem>>, vector<512x1024xf32>
    %cst_38 = arith.constant dense<0.000000e+00> : vector<8x1024xf32>
    %72 = tpu.matmul %70, %71, %cst_38 {dimension_numbers = #tpu.dot_dimension_numbers<[1], [0], [0], [1], [0, 0, 1, 1], [], []>} : vector<8x512xf32>, vector<512x1024xf32>, vector<8x1024xf32> -> vector<8x1024xf32>
    %c0_39 = arith.constant 0 : index
    %c0_40 = arith.constant 0 : index
    %73 = vector.load %arg12[%c0_39, %c0_40] : memref<1x1024xf32, #tpu.memory_space<vmem>>, vector<1x1024xf32>
    %74 = vector.broadcast %73 : vector<1x1024xf32> to vector<8x1024xf32>
    %75 = arith.addf %72, %74 : vector<8x1024xf32>
    %c0_41 = arith.constant 0 : index
    %c0_42 = arith.constant 0 : index
    %76 = vector.load %arg13[%c0_41, %c0_42] : memref<1x1024xf32, #tpu.memory_space<vmem>>, vector<1x1024xf32>
    %c0_43 = arith.constant 0 : index
    %c0_44 = arith.constant 0 : index
    %77 = vector.load %arg14[%c0_43, %c0_44] : memref<1x1024xf32, #tpu.memory_space<vmem>>, vector<1x1024xf32>
    %cst_45 = arith.constant dense<0.000000e+00> : vector<1024xf32>
    %78 = vector.multi_reduction <add>, %75, %cst_45 [0] : vector<8x1024xf32> to vector<1024xf32>
    %79 = vector.shape_cast %78 : vector<1024xf32> to vector<1x1024xf32>
    %cst_46 = arith.constant 8.000000e+00 : f32
    %80 = vector.broadcast %cst_46 : f32 to vector<1x1024xf32>
    %81 = arith.divf %79, %80 : vector<1x1024xf32>
    %82 = vector.broadcast %81 : vector<1x1024xf32> to vector<8x1024xf32>
    %83 = arith.subf %75, %82 : vector<8x1024xf32>
    %84 = arith.mulf %83, %83 : vector<8x1024xf32>
    %cst_47 = arith.constant dense<0.000000e+00> : vector<1024xf32>
    %85 = vector.multi_reduction <add>, %84, %cst_47 [0] : vector<8x1024xf32> to vector<1024xf32>
    %86 = vector.shape_cast %85 : vector<1024xf32> to vector<1x1024xf32>
    %cst_48 = arith.constant 8.000000e+00 : f32
    %87 = vector.broadcast %cst_48 : f32 to vector<1x1024xf32>
    %88 = arith.divf %86, %87 : vector<1x1024xf32>
    %cst_49 = arith.constant 8.000000e-01 : f32
    %89 = vector.broadcast %cst_49 : f32 to vector<1x1024xf32>
    %90 = arith.addf %88, %89 : vector<1x1024xf32>
    %91 = math.rsqrt %90 : vector<1x1024xf32>
    %92 = arith.mulf %91, %76 : vector<1x1024xf32>
    %93 = arith.mulf %81, %92 : vector<1x1024xf32>
    %94 = arith.subf %77, %93 : vector<1x1024xf32>
    %95 = vector.broadcast %92 : vector<1x1024xf32> to vector<8x1024xf32>
    %96 = arith.mulf %75, %95 : vector<8x1024xf32>
    %97 = vector.broadcast %94 : vector<1x1024xf32> to vector<8x1024xf32>
    %98 = arith.addf %96, %97 : vector<8x1024xf32>
    %cst_50 = arith.constant 2.000000e-01 : f32
    %99 = vector.broadcast %cst_50 : f32 to vector<8x1024xf32>
    %100 = arith.mulf %99, %98 : vector<8x1024xf32>
    %101 = arith.maximumf %98, %100 : vector<8x1024xf32>
    %c0_51 = arith.constant 0 : index
    %c0_52 = arith.constant 0 : index
    %102 = vector.load %arg15[%c0_51, %c0_52] : memref<8x1024xf32, #tpu.memory_space<vmem>>, vector<8x1024xf32>
    tpu.vector_store %arg15[%c0_51, %c0_52], %101 {strides = array<i32>} : memref<8x1024xf32, #tpu.memory_space<vmem>>, vector<8x1024xf32>,
    return
  }
}

module attributes {stable_mosaic.version = 11 : i64} {
  func.func @head_kernel(%arg0: i32, %arg1: memref<8x1024xf32, #tpu.memory_space<vmem>>, %arg2: memref<1024x256xbf16, #tpu.memory_space<vmem>>, %arg3: memref<1x256xf32, #tpu.memory_space<vmem>>, %arg4: memref<8x256xf32, #tpu.memory_space<vmem>>) attributes {dimension_semantics = [#tpu.dimension_semantics<parallel>], iteration_bounds = array<i64: 1>, scalar_prefetch = 0 : i64, scratch_operands = 0 : i64, tpu.core_type = #tpu.core_type<tc>, window_params = [{pipeline_mode = #tpu.pipeline_mode<synchronous>, transform_indices = @transform_0, window_bounds = array<i64: 8, 1024>}, {transform_indices = @transform_1, window_bounds = array<i64: 1024, 256>}, {transform_indices = @transform_2, window_bounds = array<i64: 1, 256>}, {transform_indices = @transform_3, window_bounds = array<i64: 8, 256>}]} {
    %c0 = arith.constant 0 : index
    %c0_0 = arith.constant 0 : index
    %0 = vector.load %arg1[%c0, %c0_0] : memref<8x1024xf32, #tpu.memory_space<vmem>>, vector<8x1024xf32>
    %1 = arith.truncf %0 : vector<8x1024xf32> to vector<8x1024xbf16>
    %c0_1 = arith.constant 0 : index
    %c0_2 = arith.constant 0 : index
    %2 = vector.load %arg2[%c0_1, %c0_2] : memref<1024x256xbf16, #tpu.memory_space<vmem>>, vector<1024x256xbf16>
    %cst = arith.constant dense<0.000000e+00> : vector<8x256xf32>
    %3 = tpu.matmul %1, %2, %cst {dimension_numbers = #tpu.dot_dimension_numbers<[1], [0], [0], [1], [0, 0, 1, 1], [], []>} : vector<8x1024xbf16>, vector<1024x256xbf16>, vector<8x256xf32> -> vector<8x256xf32>
    %c0_3 = arith.constant 0 : index
    %c0_4 = arith.constant 0 : index
    %4 = vector.load %arg3[%c0_3, %c0_4] : memref<1x256xf32, #tpu.memory_space<vmem>>, vector<1x256xf32>
    %5 = vector.broadcast %4 : vector<1x256xf32> to vector<8x256xf32>
    %6 = arith.addf %3, %5 : vector<8x256xf32>
    %7 = math.tanh %6 : vector<8x256xf32>
    %c0_5 = arith.constant 0 : index
    %c0_6 = arith.constant 0 : index
    %8 = vector.load %arg4[%c0_5, %c0_6] : memref<8x256xf32, #tpu.memory_space<vmem>>, vector<8x256xf32>
    tpu.vector_store %arg4[%c0_5, %c0_6], %7 {strides = array<i32>} : memref<8x256xf32, #tpu.memory_space<vmem>>, vector<8x256xf32>,
    return
  }
  func.func @transform_0(%arg0: i32) -> (i32, i32) {
    %c0_i32 = arith.constant 0 : i32
    %c0_i32_0 = arith.constant 0 : i32
    %c0_i32_1 = arith.constant 0 : i32
    return %c0_i32, %c0_i32_0 : i32, i32
  }
  func.func @transform_1(%arg0: i32) -> (i32, i32) {
    %c0_i32 = arith.constant 0 : i32
    %c0_i32_0 = arith.constant 0 : i32
    return %c0_i32, %arg0 : i32, i32
  }
  func.func @transform_2(%arg0: i32) -> (i32, i32) {
    %c0_i32 = arith.constant 0 : i32
    %c0_i32_0 = arith.constant 0 : i32
    return %c0_i32, %arg0 : i32, i32
  }
  func.func @transform_3(%arg0: i32) -> (i32, i32) {
    %c0_i32 = arith.constant 0 : i32
    %c0_i32_0 = arith.constant 0 : i32
    return %c0_i32, %arg0 : i32, i32
  }
}

</mosaic_0001>

<bundles_post_ra>
// kernel: generator_forward.3
= control target key start
LH: loop header
LB: loop body
LE: loop exit
PB: predicated region body
PF: predicated region fallthrough
CT: control target
= control target key end

     0   :  { %s1755_s1 = inlined_call_operand.vmem [shape: bf16[1024,256], index: 1, kind: input, shape index: {}]   ;;  %s1756_s0 = inlined_call_operand.vmem [shape: f32[8,1024], index: 0, kind: input, shape index: {}]   ;;  %s1757_s2 = inlined_call_operand.vmem [shape: f32[1,256], index: 2, kind: input, shape index: {}]   ;;  %s1758_s3 = inlined_call_operand.vmem [shape: f32[8,256], index: 3, kind: output, shape index: {}]  }
   0x1   :  { %v1122_v0 = vld [vmem:[%s1755_s1 + $0x4] ss:$8 sps:$4 sm:$0xff]   ;;  %v1126_v2 = vld [vmem:[%s1755_s1] ss:$8 sps:$4 sm:$0xff]   ;;  %v1128_v4 = vld [vmem:[%s1755_s1 + $0x14] ss:$8 sps:$4 sm:$0xff]  }
   0x2   :  { %v1124_v1 = vld [vmem:[%s1755_s1 + $0x204] ss:$8 sps:$4 sm:$0xff]   ;;  %810 = vmatprep.subr.bf16.mxu1 %v1122_v0  ;;  %v1127_v3 = vld [vmem:[%s1755_s1 + $0x200] ss:$8 sps:$4 sm:$0xff]   ;;  %v1130_v5 = vld [vmem:[%s1755_s1 + $0x214] ss:$8 sps:$4 sm:$0xff]  }
   0x3   :  { %892 = vmatprep.subr.bf16.mxu0 %v1124_v1  ;;  %811 = vmatpush1.bf16.msra.mxu1 %v1126_v2  ;;  %v1132_v6 = vld [vmem:[%s1755_s1 + $0x10] ss:$8 sps:$4 sm:$0xff]   ;;  %v1134_v8 = vld [vmem:[%s1755_s1 + $0x24] ss:$8 sps:$4 sm:$0xff]   ;;  %v1138_v10 = vld [vmem:[%s1755_s1 + $0x20] ss:$8 sps:$4 sm:$0xff]  }
   0x4   :  { %893 = vmatpush1.bf16.msra.mxu0 %v1127_v3  ;;  %812 = vmatprep.subr.bf16.mxu1 %v1128_v4  ;;  %v1133_v7 = vld [vmem:[%s1755_s1 + $0x210] ss:$8 sps:$4 sm:$0xff]   ;;  %v1136_v9 = vld [vmem:[%s1755_s1 + $0x224] ss:$8 sps:$4 sm:$0xff]   ;;  %v1139_v11 = vld [vmem:[%s1755_s1 + $0x220] ss:$8 sps:$4 sm:$0xff]  }
   0x5   :  { %894 = vmatprep.subr.bf16.mxu0 %v1130_v5  ;;  %v1140_v12 = vld [vmem:[%s1755_s1 + $0x34] ss:$8 sps:$4 sm:$0xff]   ;;  %v1144_v14 = vld [vmem:[%s1755_s1 + $0x30] ss:$8 sps:$4 sm:$0xff]   ;;  %v1146_v16 = vld [vmem:[%s1755_s1 + $0x44] ss:$8 sps:$4 sm:$0xff]  }
   0x6   :  { %v1142_v13 = vld [vmem:[%s1755_s1 + $0x234] ss:$8 sps:$4 sm:$0xff]   ;;  %v1145_v15 = vld [vmem:[%s1755_s1 + $0x230] ss:$8 sps:$4 sm:$0xff]   ;;  %v1148_v17 = vld [vmem:[%s1755_s1 + $0x244] ss:$8 sps:$4 sm:$0xff]  }
   0x7   :  { %813 = vmatpush1.bf16.msra.mxu1 %v1132_v6  ;;  %v1150_v18 = vld [vmem:[%s1755_s1 + $0x40] ss:$8 sps:$4 sm:$0xff]   ;;  %v1152_v20 = vld [vmem:[%s1755_s1 + $0x54] ss:$8 sps:$4 sm:$0xff]   ;;  %v1156_v22 = vld [vmem:[%s1755_s1 + $0x50] ss:$8 sps:$4 sm:$0xff]  }
   0x8   :  { %895 = vmatpush1.bf16.msra.mxu0 %v1133_v7  ;;  %814 = vmatprep.subr.bf16.mxu1 %v1134_v8  ;;  %v1151_v19 = vld [vmem:[%s1755_s1 + $0x240] ss:$8 sps:$4 sm:$0xff]   ;;  %v1154_v21 = vld [vmem:[%s1755_s1 + $0x254] ss:$8 sps:$4 sm:$0xff]   ;;  %v1157_v23 = vld [vmem:[%s1755_s1 + $0x250] ss:$8 sps:$4 sm:$0xff]  }
   0x9   :  { %896 = vmatprep.subr.bf16.mxu0 %v1136_v9  ;;  %v1158_v24 = vld [vmem:[%s1755_s1 + $0x64] ss:$8 sps:$4 sm:$0xff]   ;;  %v1162_v26 = vld [vmem:[%s1755_s1 + $0x60] ss:$8 sps:$4 sm:$0xff]   ;;  %v1164_v28 = vld [vmem:[%s1755_s1 + $0x74] ss:$8 sps:$4 sm:$0xff]  }
   0xa   :  { %v1160_v25 = vld [vmem:[%s1755_s1 + $0x264] ss:$8 sps:$4 sm:$0xff]   ;;  %v1163_v27 = vld [vmem:[%s1755_s1 + $0x260] ss:$8 sps:$4 sm:$0xff]   ;;  %v1166_v29 = vld [vmem:[%s1755_s1 + $0x274] ss:$8 sps:$4 sm:$0xff]  }
   0xb   :  { %815 = vmatpush1.bf16.msra.mxu1 %v1138_v10  ;;  %v1168_v30 = vld [vmem:[%s1755_s1 + $0x70] ss:$8 sps:$4 sm:$0xff]   ;;  %v1170_v32 = vld [vmem:[%s1755_s1 + $0x84] ss:$8 sps:$4 sm:$0xff]   ;;  %v1174_v34 = vld [vmem:[%s1755_s1 + $0x80] ss:$8 sps:$4 sm:$0xff]  }
   0xc   :  { %897 = vmatpush1.bf16.msra.mxu0 %v1139_v11  ;;  %816 = vmatprep.subr.bf16.mxu1 %v1140_v12  ;;  %v1169_v31 = vld [vmem:[%s1755_s1 + $0x270] ss:$8 sps:$4 sm:$0xff]   ;;  %v1172_v33 = vld [vmem:[%s1755_s1 + $0x284] ss:$8 sps:$4 sm:$0xff]   ;;  %v1175_v35 = vld [vmem:[%s1755_s1 + $0x280] ss:$8 sps:$4 sm:$0xff]  }
   0xd   :  { %898 = vmatprep.subr.bf16.mxu0 %v1142_v13  ;;  %v1176_v36 = vld [vmem:[%s1755_s1 + $0x94] ss:$8 sps:$4 sm:$0xff]   ;;  %v1180_v38 = vld [vmem:[%s1755_s1 + $0x90] ss:$8 sps:$4 sm:$0xff]   ;;  %v1182_v40 = vld [vmem:[%s1755_s1 + $0xa4] ss:$8 sps:$4 sm:$0xff]  }
   0xe   :  { %v1178_v37 = vld [vmem:[%s1755_s1 + $0x294] ss:$8 sps:$4 sm:$0xff]   ;;  %v1181_v39 = vld [vmem:[%s1755_s1 + $0x290] ss:$8 sps:$4 sm:$0xff]   ;;  %v1184_v41 = vld [vmem:[%s1755_s1 + $0x2a4] ss:$8 sps:$4 sm:$0xff]  }
   0xf   :  { %817 = vmatpush1.bf16.msra.mxu1 %v1144_v14  ;;  %v1186_v42 = vld [vmem:[%s1755_s1 + $0xa0] ss:$8 sps:$4 sm:$0xff]   ;;  %v1188_v44 = vld [vmem:[%s1755_s1 + $0xb4] ss:$8 sps:$4 sm:$0xff]   ;;  %v1192_v47 = vld [vmem:[%s1755_s1 + $0xb0] ss:$8 sps:$4 sm:$0xff]  }
  0x10   :  { %899 = vmatpush1.bf16.msra.mxu0 %v1145_v15  ;;  %818 = vmatprep.subr.bf16.mxu1 %v1146_v16  ;;  %v1187_v43 = vld [vmem:[%s1755_s1 + $0x2a0] ss:$8 sps:$4 sm:$0xff]   ;;  %v1190_v45 = vld [vmem:[%s1755_s1 + $0x2b4] ss:$8 sps:$4 sm:$0xff]   ;;  %v1193_v49 = vld [vmem:[%s1755_s1 + $0x2b0] ss:$8 sps:$4 sm:$0xff]  }
  0x11   :  { %900 = vmatprep.subr.bf16.mxu0 %v1148_v17  ;;  %v15_v46 = vld [vmem:[%s1756_s0 + $0x8] sm:$0xff]  ;;  %v1200_v56 = vld [vmem:[%s1755_s1 + $0xd4] ss:$8 sps:$4 sm:$0xff]   ;;  %v1204_v58 = vld [vmem:[%s1755_s1 + $0xd0] ss:$8 sps:$4 sm:$0xff]  }
  0x12   :  { %v23_v48 = vpack.c.bf16 %v15_v46, %v15_v46  ;;  %v19_v50 = vld [vmem:[%s1756_s0 + $0x28] sm:$0xff]  ;;  %v1202_v57 = vld [vmem:[%s1755_s1 + $0x2d4] ss:$8 sps:$4 sm:$0xff]   ;;  %v1205_v59 = vld [vmem:[%s1755_s1 + $0x2d0] ss:$8 sps:$4 sm:$0xff]  }
  0x13   :  { %819 = vmatpush1.bf16.msra.mxu1 %v1150_v18  ;;  %v1194_v51 = vld [vmem:[%s1755_s1 + $0xc4] ss:$8 sps:$4 sm:$0xff]   ;;  %v27_v53 = vpack.c.bf16 %v19_v50, %v19_v50  ;;  %v1198_v54 = vld [vmem:[%s1755_s1 + $0xc0] ss:$8 sps:$4 sm:$0xff]   ;;  %v1212_v0 = vld [vmem:[%s1755_s1 + $0xf4] ss:$8 sps:$4 sm:$0xff]  }
  0x14   :  { %901 = vmatpush1.bf16.msra.mxu0 %v1151_v19  ;;  %820 = vmatprep.subr.bf16.mxu1 %v1152_v20  ;;  %v1196_v52 = vld [vmem:[%s1755_s1 + $0x2c4] ss:$8 sps:$4 sm:$0xff]   ;;  %v1199_v55 = vld [vmem:[%s1755_s1 + $0x2c0] ss:$8 sps:$4 sm:$0xff]   ;;  %v1214_v1 = vld [vmem:[%s1755_s1 + $0x2f4] ss:$8 sps:$4 sm:$0xff]  }
  0x15   :  { %902 = vmatprep.subr.bf16.mxu0 %v1154_v21  ;;  %842 = vmatprep.mubr.bf16.mxu1 %v23_v48  ;;  %v1206_v60 = vld [vmem:[%s1755_s1 + $0xe4] ss:$8 sps:$4 sm:$0xff]   ;;  %v1210_v62 = vld [vmem:[%s1755_s1 + $0xe0] ss:$8 sps:$4 sm:$0xff]   ;;  %v1216_v2 = vld [vmem:[%s1755_s1 + $0xf0] ss:$8 sps:$4 sm:$0xff]  }
  0x16   :  { %924 = vmatprep.mubr.bf16.mxu0 %v27_v53  ;;  %v1208_v61 = vld [vmem:[%s1755_s1 + $0x2e4] ss:$8 sps:$4 sm:$0xff]   ;;  %v1211_v63 = vld [vmem:[%s1755_s1 + $0x2e0] ss:$8 sps:$4 sm:$0xff]   ;;  %v1217_v3 = vld [vmem:[%s1755_s1 + $0x2f0] ss:$8 sps:$4 sm:$0xff]  }
  0x17   :  { %821 = vmatpush1.bf16.msra.mxu1 %v1156_v22  ;;  %v1220_v4 = vld [vmem:[%s1755_s1 + $0x104] ss:$8 sps:$4 sm:$0xff]   ;;  %v1218_v8 = vld [vmem:[%s1755_s1 + $0x100] ss:$8 sps:$4 sm:$0xff]   ;;  %v1226_v12 = vld [vmem:[%s1755_s1 + $0x114] ss:$8 sps:$4 sm:$0xff]  }
  0x18   :  { %903 = vmatpush1.bf16.msra.mxu0 %v1157_v23  ;;  %822 = vmatprep.subr.bf16.mxu1 %v1158_v24  ;;  %v14_v5 = vld [vmem:[%s1756_s0] sm:$0xff]  ;;  %v1229_v13 = vld [vmem:[%s1755_s1 + $0x314] ss:$8 sps:$4 sm:$0xff]   ;;  %v1224_v14 = vld [vmem:[%s1755_s1 + $0x110] ss:$8 sps:$4 sm:$0xff]  }
  0x19   :  { %904 = vmatprep.subr.bf16.mxu0 %v1160_v25  ;;  %v18_v6 = vld [vmem:[%s1756_s0 + $0x20] sm:$0xff]  ;;  %v22_v10 = vpack.c.bf16 %v14_v5, %v14_v5  ;;  %v1227_v15 = vld [vmem:[%s1755_s1 + $0x310] ss:$8 sps:$4 sm:$0xff]   ;;  %v1238_v20 = vld [vmem:[%s1755_s1 + $0x134] ss:$8 sps:$4 sm:$0xff]  }
  0x1a   :  { %v1223_v7 = vld [vmem:[%s1755_s1 + $0x304] ss:$8 sps:$4 sm:$0xff]   ;;  %v1221_v9 = vld [vmem:[%s1755_s1 + $0x300] ss:$8 sps:$4 sm:$0xff]   ;;  %v26_v11 = vpack.c.bf16 %v18_v6, %v18_v6  ;;  %v1241_v21 = vld [vmem:[%s1755_s1 + $0x334] ss:$8 sps:$4 sm:$0xff]  }
  0x1b   :  { %823 = vmatpush1.bf16.msra.mxu1 %v1162_v26  ;;  %v1232_v16 = vld [vmem:[%s1755_s1 + $0x124] ss:$8 sps:$4 sm:$0xff]   ;;  %v1230_v18 = vld [vmem:[%s1755_s1 + $0x120] ss:$8 sps:$4 sm:$0xff]   ;;  %v1236_v22 = vld [vmem:[%s1755_s1 + $0x130] ss:$8 sps:$4 sm:$0xff]  }
  0x1c   :  { %905 = vmatpush1.bf16.msra.mxu0 %v1163_v27  ;;  %824 = vmatprep.subr.bf16.mxu1 %v1164_v28  ;;  %v1235_v17 = vld [vmem:[%s1755_s1 + $0x324] ss:$8 sps:$4 sm:$0xff]   ;;  %v1233_v19 = vld [vmem:[%s1755_s1 + $0x320] ss:$8 sps:$4 sm:$0xff]   ;;  %v1239_v23 = vld [vmem:[%s1755_s1 + $0x330] ss:$8 sps:$4 sm:$0xff]  }
  0x1d   :  { %906 = vmatprep.subr.bf16.mxu0 %v1166_v29  ;;  %v1244_v24 = vld [vmem:[%s1755_s1 + $0x144] ss:$8 sps:$4 sm:$0xff]   ;;  %v1242_v26 = vld [vmem:[%s1755_s1 + $0x140] ss:$8 sps:$4 sm:$0xff]   ;;  %v1250_v28 = vld [vmem:[%s1755_s1 + $0x154] ss:$8 sps:$4 sm:$0xff]  }
  0x1e   :  { %v1247_v25 = vld [vmem:[%s1755_s1 + $0x344] ss:$8 sps:$4 sm:$0xff]   ;;  %v1245_v27 = vld [vmem:[%s1755_s1 + $0x340] ss:$8 sps:$4 sm:$0xff]   ;;  %v1253_v29 = vld [vmem:[%s1755_s1 + $0x354] ss:$8 sps:$4 sm:$0xff]  }
  0x1f   :  { %825 = vmatpush1.bf16.msra.mxu1 %v1168_v30  ;;  %v1248_v30 = vld [vmem:[%s1755_s1 + $0x150] ss:$8 sps:$4 sm:$0xff]   ;;  %v1266_v46 = vld [vmem:[%s1755_s1 + $0x180] ss:$8 sps:$4 sm:$0xff]   ;;  %v1274_v48 = vld [vmem:[%s1755_s1 + $0x194] ss:$8 sps:$4 sm:$0xff]  }
  0x20   :  { %907 = vmatpush1.bf16.msra.mxu0 %v1169_v31  ;;  %826 = vmatprep.subr.bf16.mxu1 %v1170_v32  ;;  %v1251_v31 = vld [vmem:[%s1755_s1 + $0x350] ss:$8 sps:$4 sm:$0xff]   ;;  %v1256_v32 = vld [vmem:[%s1755_s1 + $0x164] ss:$8 sps:$4 sm:$0xff]   ;;  %v1302_v6 = vld [vmem:[%s1755_s1 + $0x1e0] ss:$8 sps:$4 sm:$0xff]  }
  0x21   :  { %908 = vmatprep.subr.bf16.mxu0 %v1172_v33  ;;  %v1259_v33 = vld [vmem:[%s1755_s1 + $0x364] ss:$8 sps:$4 sm:$0xff]   ;;  %v1272_v50 = vld [vmem:[%s1755_s1 + $0x190] ss:$8 sps:$4 sm:$0xff]  }
  0x22   :  { %v1283_v53 = vld [vmem:[%s1755_s1 + $0x3a4] ss:$8 sps:$4 sm:$0xff]  }
  0x23   :  { %827 = vmatpush1.bf16.msra.mxu1 %v1174_v34  ;;  %v17_v34 = vld [vmem:[%s1756_s0 + $0x18] sm:$0xff]  ;;  %v1307_v5 = vld [vmem:[%s1755_s1 + $0x3e4] ss:$8 sps:$4 sm:$0xff]  }
  0x24   :  { %909 = vmatpush1.bf16.msra.mxu0 %v1175_v35  ;;  %828 = vmatprep.subr.bf16.mxu1 %v1176_v36  ;;  %v25_v35 = vpack.c.bf16 %v17_v34, %v17_v34  ;;  %v21_v36 = vld [vmem:[%s1756_s0 + $0x38] sm:$0xff] }
  0x25   :  { %910 = vmatprep.subr.bf16.mxu0 %v1178_v37  ;;  %v1254_v37 = vld [vmem:[%s1755_s1 + $0x160] ss:$8 sps:$4 sm:$0xff]  }
  0x27   :  { %829 = vmatpush1.bf16.msra.mxu1 %v1180_v38  ;;  %v1257_v38 = vld [vmem:[%s1755_s1 + $0x360] ss:$8 sps:$4 sm:$0xff]  }
  0x28   :  { %911 = vmatpush1.bf16.msra.mxu0 %v1181_v39  ;;  %830 = vmatprep.subr.bf16.mxu1 %v1182_v40  ;;  %v29_v39 = vpack.c.bf16 %v21_v36, %v21_v36  ;;  %v1262_v40 = vld [vmem:[%s1755_s1 + $0x174] ss:$8 sps:$4 sm:$0xff]  }
  0x29   :  { %912 = vmatprep.subr.bf16.mxu0 %v1184_v41  ;;  %v1265_v41 = vld [vmem:[%s1755_s1 + $0x374] ss:$8 sps:$4 sm:$0xff]  }
  0x2b   :  { %831 = vmatpush1.bf16.msra.mxu1 %v1186_v42  ;;  %v1260_v42 = vld [vmem:[%s1755_s1 + $0x170] ss:$8 sps:$4 sm:$0xff]  }
  0x2c   :  { %913 = vmatpush1.bf16.msra.mxu0 %v1187_v43  ;;  %832 = vmatprep.subr.bf16.mxu1 %v1188_v44  ;;  %v1263_v43 = vld [vmem:[%s1755_s1 + $0x370] ss:$8 sps:$4 sm:$0xff]   ;;  %v1268_v44 = vld [vmem:[%s1755_s1 + $0x184] ss:$8 sps:$4 sm:$0xff]  }
  0x2d   :  { %914 = vmatprep.subr.bf16.mxu0 %v1190_v45  ;;  %v1271_v45 = vld [vmem:[%s1755_s1 + $0x384] ss:$8 sps:$4 sm:$0xff]  }
  0x2f   :  { %833 = vmatpush1.bf16.msra.mxu1 %v1192_v47  ;;  %v1269_v47 = vld [vmem:[%s1755_s1 + $0x380] ss:$8 sps:$4 sm:$0xff]  }
  0x30   :  { %915 = vmatpush1.bf16.msra.mxu0 %v1193_v49  ;;  %834 = vmatprep.subr.bf16.mxu1 %v1194_v51  ;;  %v1277_v49 = vld [vmem:[%s1755_s1 + $0x394] ss:$8 sps:$4 sm:$0xff]   ;;  %v1275_v51 = vld [vmem:[%s1755_s1 + $0x390] ss:$8 sps:$4 sm:$0xff]  }
  0x31   :  { %916 = vmatprep.subr.bf16.mxu0 %v1196_v52  ;;  %v1280_v52 = vld [vmem:[%s1755_s1 + $0x1a4] ss:$8 sps:$4 sm:$0xff]  }
  0x33   :  { %835 = vmatpush1.bf16.msra.mxu1 %v1198_v54  ;;  %v1278_v54 = vld [vmem:[%s1755_s1 + $0x1a0] ss:$8 sps:$4 sm:$0xff]  }
  0x34   :  { %917 = vmatpush1.bf16.msra.mxu0 %v1199_v55  ;;  %836 = vmatprep.subr.bf16.mxu1 %v1200_v56  ;;  %v1281_v55 = vld [vmem:[%s1755_s1 + $0x3a0] ss:$8 sps:$4 sm:$0xff]   ;;  %v1286_v56 = vld [vmem:[%s1755_s1 + $0x1b4] ss:$8 sps:$4 sm:$0xff]  }
  0x35   :  { %918 = vmatprep.subr.bf16.mxu0 %v1202_v57  ;;  %v1289_v57 = vld [vmem:[%s1755_s1 + $0x3b4] ss:$8 sps:$4 sm:$0xff]  }
  0x37   :  { %837 = vmatpush1.bf16.msra.mxu1 %v1204_v58  ;;  %v1284_v58 = vld [vmem:[%s1755_s1 + $0x1b0] ss:$8 sps:$4 sm:$0xff]  }
  0x38   :  { %919 = vmatpush1.bf16.msra.mxu0 %v1205_v59  ;;  %838 = vmatprep.subr.bf16.mxu1 %v1206_v60  ;;  %v1287_v59 = vld [vmem:[%s1755_s1 + $0x3b0] ss:$8 sps:$4 sm:$0xff]   ;;  %v1292_v60 = vld [vmem:[%s1755_s1 + $0x1c4] ss:$8 sps:$4 sm:$0xff]  }
  0x39   :  { %920 = vmatprep.subr.bf16.mxu0 %v1208_v61  ;;  %v1295_v61 = vld [vmem:[%s1755_s1 + $0x3c4] ss:$8 sps:$4 sm:$0xff]  }
  0x3b   :  { %839 = vmatpush1.bf16.msra.mxu1 %v1210_v62  ;;  %v1290_v62 = vld [vmem:[%s1755_s1 + $0x1c0] ss:$8 sps:$4 sm:$0xff]  }
  0x3c   :  { %921 = vmatpush1.bf16.msra.mxu0 %v1211_v63  ;;  %840 = vmatprep.subr.bf16.mxu1 %v1212_v0  ;;  %v1293_v63 = vld [vmem:[%s1755_s1 + $0x3c0] ss:$8 sps:$4 sm:$0xff]   ;;  %v1298_v0 = vld [vmem:[%s1755_s1 + $0x1d4] ss:$8 sps:$4 sm:$0xff]  }
  0x3d   :  { %922 = vmatprep.subr.bf16.mxu0 %v1214_v1  ;;  %v1301_v1 = vld [vmem:[%s1755_s1 + $0x3d4] ss:$8 sps:$4 sm:$0xff]  }
  0x3f   :  { %841 = vmatpush1.bf16.msra.mxu1 %v1216_v2  ;;  %v1296_v2 = vld [vmem:[%s1755_s1 + $0x1d0] ss:$8 sps:$4 sm:$0xff]  }
  0x40   :  { %923 = vmatpush1.bf16.msra.mxu0 %v1217_v3  ;;  %851 = vmatprep.subr.bf16.mxu1 %v1220_v4  ;;  %v1299_v3 = vld [vmem:[%s1755_s1 + $0x3d0] ss:$8 sps:$4 sm:$0xff]   ;;  %v1304_v4 = vld [vmem:[%s1755_s1 + $0x1e4] ss:$8 sps:$4 sm:$0xff]  }
  0x41   :  { %933 = vmatprep.subr.bf16.mxu0 %v1223_v7  ;;  %v1305_v7 = vld [vmem:[%s1755_s1 + $0x3e0] ss:$8 sps:$4 sm:$0xff]  }
  0x42   :  { %843 = vmatmul.mubr.bf16.vlgmr.msra.gmra.mrb[0].mxu1 %v22_v10  ;;  %v1308_v10 = vld [vmem:[%s1755_s1 + $0x1f0] ss:$8 sps:$4 sm:$0xff]  }
  0x43   :  { %925 = vmatmul.mubr.bf16.vlgmr.msra.gmra.mrb[0].mxu0 %v26_v11  ;;  %852 = vmatpush1.bf16.msra.mxu1 %v1218_v8  ;;  %v1310_v8 = vld [vmem:[%s1755_s1 + $0x1f4] ss:$8 sps:$4 sm:$0xff]   ;;  %v1311_v11 = vld [vmem:[%s1755_s1 + $0x3f0] ss:$8 sps:$4 sm:$0xff]  }
  0x44   :  { %934 = vmatpush1.bf16.msra.mxu0 %v1221_v9  ;;  %853 = vmatprep.subr.bf16.mxu1 %v1226_v12  ;;  %v1313_v9 = vld [vmem:[%s1755_s1 + $0x3f4] ss:$8 sps:$4 sm:$0xff]  }
  0x45   :  { %935 = vmatprep.subr.bf16.mxu0 %v1229_v13  ;;  %883 = vmatprep.mubr.bf16.mxu1 %v25_v35  ;;  %v16_v12 = vld [vmem:[%s1756_s0 + $0x10] sm:$0xff] }
  0x46   :  { %965 = vmatprep.mubr.bf16.mxu0 %v29_v39  ;;  %v20_v13 = vld [vmem:[%s1756_s0 + $0x30] sm:$0xff] }
  0x47   :  { %854 = vmatpush1.bf16.msra.mxu1 %v1224_v14  ;;  %v24_v14 = vpack.c.bf16 %v16_v12, %v16_v12 }
  0x48   :  { %936 = vmatpush1.bf16.msra.mxu0 %v1227_v15  ;;  %855 = vmatprep.subr.bf16.mxu1 %v1232_v16  ;;  %v28_v15 = vpack.c.bf16 %v20_v13, %v20_v13  ;;  %v160_v16 = vlaneseq }
  0x49   :  { %937 = vmatprep.subr.bf16.mxu0 %v1235_v17 }
  0x4a   :  { %v161_v17 = vshrl.u32 %v160_v16, 7 }
  0x4b   :  { %856 = vmatpush1.bf16.msra.mxu1 %v1230_v18 }
  0x4c   :  { %938 = vmatpush1.bf16.msra.mxu0 %v1233_v19  ;;  %857 = vmatprep.subr.bf16.mxu1 %v1238_v20  ;;  %v162_v18 = vsub.s32 0, %v161_v17  ;;  %v158_v19 = vld [vmem:[%s1757_s2] sm:$0x3]  ;;  %v166_v20 = vsub.s32 1, %v161_v17 }
  0x4d   :  { %939 = vmatprep.subr.bf16.mxu0 %v1241_v21 }
  0x4e   :  { %v163_v21 = vrot.slane %v158_v19, %v162_v18 }
  0x4f   :  { %858 = vmatpush1.bf16.msra.mxu1 %v1236_v22  ;;  %v167_v22 = vrot.slane %v158_v19, %v166_v20 }
  0x50   :  { %940 = vmatpush1.bf16.msra.mxu0 %v1239_v23  ;;  %859 = vmatprep.subr.bf16.mxu1 %v1244_v24 }
  0x51   :  { %941 = vmatprep.subr.bf16.mxu0 %v1247_v25 }
  0x53   :  { %860 = vmatpush1.bf16.msra.mxu1 %v1242_v26 }
  0x54   :  { %942 = vmatpush1.bf16.msra.mxu0 %v1245_v27  ;;  %861 = vmatprep.subr.bf16.mxu1 %v1250_v28 }
  0x55   :  { %943 = vmatprep.subr.bf16.mxu0 %v1253_v29 }
  0x57   :  { %862 = vmatpush1.bf16.msra.mxu1 %v1248_v30 }
  0x58   :  { %944 = vmatpush1.bf16.msra.mxu0 %v1251_v31  ;;  %863 = vmatprep.subr.bf16.mxu1 %v1256_v32 }
  0x59   :  { %945 = vmatprep.subr.bf16.mxu0 %v1259_v33 }
  0x5b   :  { %864 = vmatpush1.bf16.msra.mxu1 %v1254_v37 }
  0x5c   :  { %946 = vmatpush1.bf16.msra.mxu0 %v1257_v38  ;;  %865 = vmatprep.subr.bf16.mxu1 %v1262_v40 }
  0x5d   :  { %947 = vmatprep.subr.bf16.mxu0 %v1265_v41 }
  0x5f   :  { %866 = vmatpush1.bf16.msra.mxu1 %v1260_v42 }
  0x60   :  { %948 = vmatpush1.bf16.msra.mxu0 %v1263_v43  ;;  %867 = vmatprep.subr.bf16.mxu1 %v1268_v44 }
  0x61   :  { %949 = vmatprep.subr.bf16.mxu0 %v1271_v45 }
  0x63   :  { %868 = vmatpush1.bf16.msra.mxu1 %v1266_v46 }
  0x64   :  { %950 = vmatpush1.bf16.msra.mxu0 %v1269_v47  ;;  %869 = vmatprep.subr.bf16.mxu1 %v1274_v48 }
  0x65   :  { %951 = vmatprep.subr.bf16.mxu0 %v1277_v49 }
  0x67   :  { %870 = vmatpush1.bf16.msra.mxu1 %v1272_v50 }
  0x68   :  { %952 = vmatpush1.bf16.msra.mxu0 %v1275_v51  ;;  %871 = vmatprep.subr.bf16.mxu1 %v1280_v52 }
  0x69   :  { %953 = vmatprep.subr.bf16.mxu0 %v1283_v53 }
  0x6b   :  { %872 = vmatpush1.bf16.msra.mxu1 %v1278_v54 }
  0x6c   :  { %954 = vmatpush1.bf16.msra.mxu0 %v1281_v55  ;;  %873 = vmatprep.subr.bf16.mxu1 %v1286_v56 }
  0x6d   :  { %955 = vmatprep.subr.bf16.mxu0 %v1289_v57 }
  0x6f   :  { %874 = vmatpush1.bf16.msra.mxu1 %v1284_v58 }
  0x70   :  { %956 = vmatpush1.bf16.msra.mxu0 %v1287_v59  ;;  %875 = vmatprep.subr.bf16.mxu1 %v1292_v60 }
  0x71   :  { %957 = vmatprep.subr.bf16.mxu0 %v1295_v61 }
  0x73   :  { %876 = vmatpush1.bf16.msra.mxu1 %v1290_v62 }
  0x74   :  { %958 = vmatpush1.bf16.msra.mxu0 %v1293_v63  ;;  %877 = vmatprep.subr.bf16.mxu1 %v1298_v0 }
  0x75   :  { %959 = vmatprep.subr.bf16.mxu0 %v1301_v1 }
  0x77   :  { %878 = vmatpush1.bf16.msra.mxu1 %v1296_v2 }
  0x78   :  { %960 = vmatpush1.bf16.msra.mxu0 %v1299_v3  ;;  %879 = vmatprep.subr.bf16.mxu1 %v1304_v4 }
  0x79   :  { %961 = vmatprep.subr.bf16.mxu0 %v1307_v5 }
  0x7b   :  { %880 = vmatpush1.bf16.msra.mxu1 %v1302_v6 }
  0x7c   :  { %962 = vmatpush1.bf16.msra.mxu0 %v1305_v7  ;;  %881 = vmatprep.subr.bf16.mxu1 %v1310_v8 }
  0x7d   :  { %963 = vmatprep.subr.bf16.mxu0 %v1313_v9 }
  0x7f   :  { %882 = vmatpush1.bf16.msra.mxu1 %v1308_v10 }
  0x80   :  { %964 = vmatpush1.bf16.msra.mxu0 %v1311_v11 }
  0x82   :  { %884 = vmatmul.mubr.bf16.vlgmr.msra.gmra.mrb[0].mxu1 %v24_v14 }
  0x83   :  { %966 = vmatmul.mubr.bf16.vlgmr.msra.gmra.mrb[0].mxu0 %v28_v15 }
 0x155   :  { %v885_v23 = vpop.f32.mrb[0].mxu1 }
 0x156   :  { %v967_v24 = vpop.f32.mrb[0].mxu0  ;;  %v1110_v25 = vadd.f32 %v885_v23, %v163_v21  ;;  %v887_v26 = vpop.f32.mrb[1].mxu1 }
 0x157   :  { %v969_v27 = vpop.f32.mrb[1].mxu0  ;;  %v1112_v28 = vadd.f32 %v887_v26, %v167_v22  ;;  %v889_v29 = vpop.f32.mrb[2].mxu1 }
 0x158   :  { %v971_v30 = vpop.f32.mrb[2].mxu0  ;;  %v1111_v31 = vadd.f32 %v1110_v25, %v967_v24  ;;  %v890_v32 = vpop.f32.mrb[3].mxu1 }
 0x159   :  { %v972_v33 = vpop.f32.mrb[3].mxu0  ;;  %v1113_v34 = vadd.f32 %v1112_v28, %v969_v27 }
 0x15a   :  { %1314 = vtanh.f32 %v1111_v31 }
 0x15b   :  { %1316 = vtanh.f32 %v1113_v34 }
 0x164   :  { %v1315_v35 = vpop.eup %1314 }
 0x165   :  { %v1317_v36 = vpop.eup %1316  ;;  %976 = vst [vmem:[%s1758_s3] sm:$0xff] %v1315_v35 }
 0x166   :  { %977 = vst [vmem:[%s1758_s3 + $0x8] sm:$0xff] %v1317_v36 }

// kernel: generator_forward.2
= control target key start
LH: loop header
LB: loop body
LE: loop exit
PB: predicated region body
PF: predicated region fallthrough
CT: control target
= control target key end

     0   :  { %20 = vsyncpa [#allocation3], 0  ;;  %s4204_s0 = inlined_call_operand.hbm [shape: f32[8,32], index: 0, kind: input, shape index: {}]   ;;  %s4205_s1 = inlined_call_operand.hbm [shape: f32[32,128], index: 1, kind: input, shape index: {}]   ;;  %s4206_s2 = inlined_call_operand.hbm [shape: f32[1,128], index: 2, kind: input, shape index: {}]   ;;  %s4207_s3 = inlined_call_operand.hbm [shape: f32[128,256], index: 3, kind: input, shape index: {}]   ;;  %s4208_s4 = inlined_call_operand.hbm [shape: f32[1,256], index: 4, kind: input, shape index: {}]   ;;  %s4209_s5 = inlined_call_operand.hbm [shape: f32[1,256], index: 5, kind: input, shape index: {}]   ;;  %s4210_s6 = inlined_call_operand.hbm [shape: f32[1,256], index: 6, kind: input, shape index: {}]   ;;  %s4211_s7 = inlined_call_operand.hbm [shape: f32[256,512], index: 7, kind: input, shape index: {}]   ;;  %s4212_s8 = inlined_call_operand.hbm [shape: f32[1,512], index: 8, kind: input, shape index: {}]   ;;  %s4213_s9 = inlined_call_operand.hbm [shape: f32[1,512], index: 9, kind: input, shape index: {}]   ;;  %s4214_s10 = inlined_call_operand.hbm [shape: f32[1,512], index: 10, kind: input, shape index: {}]   ;;  %s4215_s11 = inlined_call_operand.hbm [shape: f32[512,1024], index: 11, kind: input, shape index: {}]   ;;  %s4216_s12 = inlined_call_operand.hbm [shape: f32[1,1024], index: 12, kind: input, shape index: {}]   ;;  %s4217_s13 = inlined_call_operand.hbm [shape: f32[1,1024], index: 13, kind: input, shape index: {}]   ;;  %s4218_s14 = inlined_call_operand.hbm [shape: f32[1,1024], index: 14, kind: input, shape index: {}]   ;;  %s4219_s15 = inlined_call_operand.vmem [shape: f32[8,1024], index: 15, kind: output, shape index: {}]  }
   0x1   :  { %21 = vsyncpa [#allocation5], 0 }
   0x2   :  { %22 = vsyncpa [#allocation8], 0 }
   0x3   :  { %23 = vsyncpa [#allocation11], 0 }
   0x4   :  { %24 = vsyncpa [#allocation14], 0 }
   0x5   :  { %25 = vsyncpa [#allocation17], 0 }
   0x6   :  { %26 = vsyncpa [#allocation20], 0 }
   0x7   :  { %27 = vsyncpa [#allocation23], 0  ;;  %s3634_s18 = smov [#allocation4]   ;;  %s3288_s22 = scalar_lea.hbm %s4205_s1, 512 }
   0x8   :  { %s43_s19 = sshll.u32 %s3634_s18, 4  ;;  %p3289_p0 = scmp.ne.s32.totalorder %s4205_s1, %s3288_s22  ;;  %s44_s19 = int_to_ptr.vmem [resolvable:$true] %s43_s19 }
   0x9   :  { %p3292_p1 = scmp.lt.u32.totalorder %s3288_s22, %s4205_s1 }
   0xb   :  { %p3294_p2 = pnand %p3292_p1, %p3289_p0 }
   0xd   :  { %3297 = shalt.err (!%p3294_p2)
}
   0xe   :  { %s3298_s27 = scalar_lea.vmem %s44_s19, 512  ;;  %p3303_p4 = scmp.lt.s32.totalorder %s44_s19, %s44_s19 }
   0xf   :  { %p3299_p3 = scmp.ne.s32.totalorder %s44_s19, %s3298_s27  ;;  %p3304_p5 = scmp.lt.s32.totalorder %s3298_s27, %s3298_s27 }
  0x11   :  { %p3305_p6 = por %p3304_p5, %p3303_p4 }
  0x13   :  { %p3306_p7 = pnand %p3305_p6, %p3299_p3 }
  0x15   :  { %3309 = shalt.err (!%p3306_p7)
}
  0x16   :  { %s3635_s28 = smov 128   ;;  %s3636_s29 = smov 8  }
  0x17   :  { %49 = dma.hbm_to_vmem [thread:$0]  %s4205_s1, 512, %s44_s19, [#allocation5], %s3635_s28, %s3635_s28, %s3636_s29  }
  0x18   :  { %s3637_s17 = smov [#allocation7]   ;;  %s3310_s22 = scalar_lea.hbm %s4207_s3, 4096 }
  0x19   :  { %s65_s18 = sshll.u32 %s3637_s17, 4  ;;  %p3311_p8 = scmp.ne.s32.totalorder %s4207_s3, %s3310_s22  ;;  %s66_s18 = int_to_ptr.vmem [resolvable:$true] %s65_s18 }
  0x1a   :  { %p3314_p9 = scmp.lt.u32.totalorder %s3310_s22, %s4207_s3 }
  0x1c   :  { %p3316_p10 = pnand %p3314_p9, %p3311_p8 }
  0x1e   :  { %3319 = shalt.err (!%p3316_p10)
}
  0x1f   :  { %s3320_s27 = scalar_lea.vmem %s66_s18, 4096  ;;  %p3325_p12 = scmp.lt.s32.totalorder %s66_s18, %s66_s18 }
  0x20   :  { %p3321_p11 = scmp.ne.s32.totalorder %s66_s18, %s3320_s27  ;;  %p3326_p13 = scmp.lt.s32.totalorder %s3320_s27, %s3320_s27 }
  0x22   :  { %p3327_p0 = por %p3326_p13, %p3325_p12 }
  0x24   :  { %p3328_p1 = pnand %p3327_p0, %p3321_p11 }
  0x26   :  { %3331 = shalt.err (!%p3328_p1)
}
  0x27   :  { %s3638_s1 = smov 256   ;;  %s3639_s19 = smov 16  }
  0x28   :  { %71 = dma.hbm_to_vmem [thread:$0]  %s4207_s3, 4096, %s66_s18, [#allocation8], %s3638_s1, %s3638_s1, %s3639_s19  }
  0x29   :  { %s3640_s30 = smov [#allocation10]   ;;  %s3641_s17 = smov [#allocation13]  }
  0x2a   :  { %s88_s16 = sshll.u32 %s3640_s30, 4  ;;  %s107_s20 = sshll.u32 %s3641_s17, 4  ;;  %s89_s16 = int_to_ptr.vmem [resolvable:$true] %s88_s16  ;;  %s3765_s20 = int_to_ptr.vmem [resolvable:$true] %s107_s20 }
  0x2b   :  { %s3332_s23 = scalar_lea.hbm %s4209_s5, 32 }
  0x2c   :  { %p3333_p2 = scmp.ne.s32.totalorder %s4209_s5, %s3332_s23  ;;  %p3336_p3 = scmp.lt.u32.totalorder %s3332_s23, %s4209_s5 }
  0x2e   :  { %p3338_p4 = pnand %p3336_p3, %p3333_p2 }
  0x30   :  { %3341 = shalt.err (!%p3338_p4)
}
  0x31   :  { %s3342_s3 = scalar_lea.vmem %s89_s16, 32  ;;  %p3347_p6 = scmp.lt.s32.totalorder %s89_s16, %s89_s16 }
  0x32   :  { %p3343_p5 = scmp.ne.s32.totalorder %s89_s16, %s3342_s3  ;;  %p3348_p7 = scmp.lt.s32.totalorder %s3342_s3, %s3342_s3 }
  0x34   :  { %p3349_p8 = por %p3348_p7, %p3347_p6 }
  0x36   :  { %p3350_p9 = pnand %p3349_p8, %p3343_p5 }
  0x38   :  { %3353 = shalt.err (!%p3350_p9)
}
  0x39   :  { %91 = dma.hbm_to_vmem [thread:$0]  %s4209_s5, 32, %s89_s16, [#allocation11]  }
  0x3a   :  { %s3354_s29 = scalar_lea.hbm %s4211_s7, 16384 }
  0x3b   :  { %p3355_p10 = scmp.ne.s32.totalorder %s4211_s7, %s3354_s29  ;;  %p3358_p11 = scmp.lt.u32.totalorder %s3354_s29, %s4211_s7 }
  0x3d   :  { %p3360_p12 = pnand %p3358_p11, %p3355_p10 }
  0x3f   :  { %3363 = shalt.err (!%p3360_p12)
}
  0x40   :  { %s3364_s23 = scalar_lea.vmem %s3765_s20, 16384  ;;  %p3369_p0 = scmp.lt.s32.totalorder %s3765_s20, %s3765_s20 }
  0x41   :  { %p3365_p13 = scmp.ne.s32.totalorder %s3765_s20, %s3364_s23  ;;  %p3370_p1 = scmp.lt.s32.totalorder %s3364_s23, %s3364_s23 }
  0x43   :  { %p3371_p2 = por %p3370_p1, %p3369_p0 }
  0x45   :  { %p3372_p3 = pnand %p3371_p2, %p3365_p13 }
  0x47   :  { %3375 = shalt.err (!%p3372_p3)
}
  0x48   :  { %s3642_s5 = smov 512   ;;  %s3643_s16 = smov 32  }
  0x49   :  { %113 = dma.hbm_to_vmem [thread:$0]  %s4211_s7, 16384, %s3765_s20, [#allocation14], %s3642_s5, %s3642_s5, %s3643_s16  }
  0x4a   :  { %s3644_s26 = smov [#allocation16]   ;;  %s3645_s3 = smov [#allocation19]  }
  0x4b   :  { %s130_s27 = sshll.u32 %s3644_s26, 4  ;;  %s149_s18 = sshll.u32 %s3645_s3, 4  ;;  %s131_s27 = int_to_ptr.vmem [resolvable:$true] %s130_s27  ;;  %s3796_s18 = int_to_ptr.vmem [resolvable:$true] %s149_s18 }
  0x4c   :  { %s3376_s28 = scalar_lea.hbm %s4213_s9, 64 }
  0x4d   :  { %p3377_p4 = scmp.ne.s32.totalorder %s4213_s9, %s3376_s28  ;;  %p3380_p5 = scmp.lt.u32.totalorder %s3376_s28, %s4213_s9 }
  0x4f   :  { %p3382_p6 = pnand %p3380_p5, %p3377_p4 }
  0x51   :  { %3385 = shalt.err (!%p3382_p6)
}
  0x52   :  { %s3386_s7 = scalar_lea.vmem %s131_s27, 64  ;;  %p3391_p8 = scmp.lt.s32.totalorder %s131_s27, %s131_s27 }
  0x53   :  { %p3387_p7 = scmp.ne.s32.totalorder %s131_s27, %s3386_s7  ;;  %p3392_p9 = scmp.lt.s32.totalorder %s3386_s7, %s3386_s7 }
  0x55   :  { %p3393_p10 = por %p3392_p9, %p3391_p8 }
  0x57   :  { %p3394_p11 = pnand %p3393_p10, %p3387_p7 }
  0x59   :  { %3397 = shalt.err (!%p3394_p11)
}
  0x5a   :  { %133 = dma.hbm_to_vmem [thread:$0]  %s4213_s9, 64, %s131_s27, [#allocation17]  }
  0x5b   :  { %s3398_s16 = scalar_lea.hbm %s4215_s11, 65536 }
  0x5c   :  { %p3399_p12 = scmp.ne.s32.totalorder %s4215_s11, %s3398_s16  ;;  %p3402_p13 = scmp.lt.u32.totalorder %s3398_s16, %s4215_s11 }
  0x5e   :  { %p3404_p0 = pnand %p3402_p13, %p3399_p12 }
  0x60   :  { %3407 = shalt.err (!%p3404_p0)
}
  0x61   :  { %s3408_s1 = scalar_lea.vmem %s3796_s18, 65536  ;;  %p3413_p2 = scmp.lt.s32.totalorder %s3796_s18, %s3796_s18 }
  0x62   :  { %p3409_p1 = scmp.ne.s32.totalorder %s3796_s18, %s3408_s1  ;;  %p3414_p3 = scmp.lt.s32.totalorder %s3408_s1, %s3408_s1 }
  0x64   :  { %p3415_p4 = por %p3414_p3, %p3413_p2 }
  0x66   :  { %p3416_p5 = pnand %p3415_p4, %p3409_p1 }
  0x68   :  { %3419 = shalt.err (!%p3416_p5)
}
  0x69   :  { %s3646_s9 = smov 1024   ;;  %s3647_s27 = smov 64  }
  0x6a   :  { %155 = dma.hbm_to_vmem [thread:$0]  %s4215_s11, 65536, %s3796_s18, [#allocation20], %s3646_s9, %s3646_s9, %s3647_s27  }
  0x6b   :  { %s3648_s29 = smov [#allocation22]   ;;  %s3649_s17 = smov [#allocation2]  }
  0x6c   :  { %s172_s30 = sshll.u32 %s3648_s29, 4  ;;  %s34_s21 = sshll.u32 %s3649_s17, 4  ;;  %s173_s30 = int_to_ptr.vmem [resolvable:$true] %s172_s30  ;;  %s35_s21 = int_to_ptr.vmem [resolvable:$true] %s34_s21 }
  0x6d   :  { %s3420_s22 = scalar_lea.hbm %s4217_s13, 128 }
  0x6e   :  { %p3421_p6 = scmp.ne.s32.totalorder %s4217_s13, %s3420_s22  ;;  %p3424_p7 = scmp.lt.u32.totalorder %s3420_s22, %s4217_s13 }
  0x70   :  { %p3426_p8 = pnand %p3424_p7, %p3421_p6 }
  0x72   :  { %3429 = shalt.err (!%p3426_p8)
}
  0x73   :  { %s3430_s11 = scalar_lea.vmem %s173_s30, 128  ;;  %p3435_p10 = scmp.lt.s32.totalorder %s173_s30, %s173_s30 }
  0x74   :  { %p3431_p9 = scmp.ne.s32.totalorder %s173_s30, %s3430_s11  ;;  %p3436_p11 = scmp.lt.s32.totalorder %s3430_s11, %s3430_s11 }
  0x76   :  { %p3437_p12 = por %p3436_p11, %p3435_p10 }
  0x78   :  { %p3438_p13 = pnand %p3437_p12, %p3431_p9 }
  0x7a   :  { %3441 = shalt.err (!%p3438_p13)
}
  0x7b   :  { %175 = dma.hbm_to_vmem [thread:$0]  %s4217_s13, 128, %s173_s30, [#allocation23]  }
  0x7c   :  { %s3442_s1 = scalar_lea.hbm %s4204_s0, 128 }
  0x7d   :  { %p3443_p0 = scmp.ne.s32.totalorder %s4204_s0, %s3442_s1  ;;  %p3446_p1 = scmp.lt.u32.totalorder %s3442_s1, %s4204_s0 }
  0x7f   :  { %p3448_p2 = pnand %p3446_p1, %p3443_p0 }
  0x81   :  { %3451 = shalt.err (!%p3448_p2)
}
  0x82   :  { %s3452_s29 = scalar_lea.vmem %s35_s21, 128  ;;  %p3457_p4 = scmp.lt.s32.totalorder %s35_s21, %s35_s21 }
  0x83   :  { %p3453_p3 = scmp.ne.s32.totalorder %s35_s21, %s3452_s29  ;;  %p3458_p5 = scmp.lt.s32.totalorder %s3452_s29, %s3452_s29 }
  0x85   :  { %p3459_p6 = por %p3458_p5, %p3457_p4 }
  0x87   :  { %p3460_p7 = pnand %p3459_p6, %p3453_p3 }
  0x89   :  { %3463 = shalt.err (!%p3460_p7)
}
  0x8a   :  { %37 = dma.hbm_to_vmem [thread:$0]  %s4204_s0, 128, %s35_s21, [#allocation3]  }
  0x8b   :  { %s3650_s17 = smov [#allocation6]   ;;  %s3651_s20 = smov [#allocation9]  }
  0x8c   :  { %s56_s7 = sshll.u32 %s3650_s17, 4  ;;  %s78_s22 = sshll.u32 %s3651_s20, 4  ;;  %s57_s7 = int_to_ptr.vmem [resolvable:$true] %s56_s7  ;;  %s79_s22 = int_to_ptr.vmem [resolvable:$true] %s78_s22 }
  0x8d   :  { %s3464_s16 = scalar_lea.hbm %s4206_s2, 16 }
  0x8e   :  { %p3465_p8 = scmp.ne.s32.totalorder %s4206_s2, %s3464_s16  ;;  %p3468_p9 = scmp.lt.u32.totalorder %s3464_s16, %s4206_s2 }
  0x90   :  { %p3470_p10 = pnand %p3468_p9, %p3465_p8 }
  0x92   :  { %3473 = shalt.err (!%p3470_p10)
}
  0x93   :  { %s3474_s0 = scalar_lea.vmem %s57_s7, 16  ;;  %s3478_s21 = scalar_lea.vmem %s57_s7, 32 }
  0x94   :  { %p3475_p11 = scmp.ne.s32.totalorder %s57_s7, %s3474_s0  ;;  %p3479_p12 = scmp.lt.s32.totalorder %s57_s7, %s57_s7 }
  0x95   :  { %p3480_p13 = scmp.lt.s32.totalorder %s3478_s21, %s3474_s0 }
  0x97   :  { %p3481_p0 = por %p3480_p13, %p3479_p12 }
  0x99   :  { %p3482_p1 = pnand %p3481_p0, %p3475_p11 }
  0x9b   :  { %3485 = shalt.err (!%p3482_p1)
}
  0x9c   :  { %59 = dma.hbm_to_vmem [thread:$0]  %s4206_s2, 16, %s57_s7, [#allocation5]  }
  0x9d   :  { %s3486_s27 = scalar_lea.hbm %s4208_s4, 32 }
  0x9e   :  { %p3487_p2 = scmp.ne.s32.totalorder %s4208_s4, %s3486_s27  ;;  %p3490_p3 = scmp.lt.u32.totalorder %s3486_s27, %s4208_s4 }
  0xa0   :  { %p3492_p4 = pnand %p3490_p3, %p3487_p2 }
  0xa2   :  { %3495 = shalt.err (!%p3492_p4)
}
  0xa3   :  { %s3496_s30 = scalar_lea.vmem %s79_s22, 32  ;;  %p3501_p6 = scmp.lt.s32.totalorder %s79_s22, %s79_s22 }
  0xa4   :  { %p3497_p5 = scmp.ne.s32.totalorder %s79_s22, %s3496_s30  ;;  %p3502_p7 = scmp.lt.s32.totalorder %s3496_s30, %s3496_s30 }
  0xa6   :  { %p3503_p8 = por %p3502_p7, %p3501_p6 }
  0xa8   :  { %p3504_p9 = pnand %p3503_p8, %p3497_p5 }
  0xaa   :  { %3507 = shalt.err (!%p3504_p9)
}
  0xab   :  { %81 = dma.hbm_to_vmem [thread:$0]  %s4208_s4, 32, %s79_s22, [#allocation8]  }
  0xac   :  { %s3652_s7 = smov [#allocation12]   ;;  %s3653_s23 = smov [#allocation15]  }
  0xad   :  { %s98_s20 = sshll.u32 %s3652_s7, 4  ;;  %s120_s5 = sshll.u32 %s3653_s23, 4  ;;  %s99_s20 = int_to_ptr.vmem [resolvable:$true] %s98_s20  ;;  %s121_s5 = int_to_ptr.vmem [resolvable:$true] %s120_s5 }
  0xae   :  { %s3508_s11 = scalar_lea.hbm %s4210_s6, 32 }
  0xaf   :  { %p3509_p10 = scmp.ne.s32.totalorder %s4210_s6, %s3508_s11  ;;  %p3512_p11 = scmp.lt.u32.totalorder %s3508_s11, %s4210_s6 }
  0xb1   :  { %p3514_p12 = pnand %p3512_p11, %p3509_p10 }
  0xb3   :  { %3517 = shalt.err (!%p3514_p12)
}
  0xb4   :  { %s3518_s4 = scalar_lea.vmem %s99_s20, 32  ;;  %p3523_p0 = scmp.lt.s32.totalorder %s99_s20, %s99_s20 }
  0xb5   :  { %p3519_p13 = scmp.ne.s32.totalorder %s99_s20, %s3518_s4  ;;  %p3524_p1 = scmp.lt.s32.totalorder %s3518_s4, %s3518_s4 }
  0xb7   :  { %p3525_p2 = por %p3524_p1, %p3523_p0 }
  0xb9   :  { %p3526_p3 = pnand %p3525_p2, %p3519_p13 }
  0xbb   :  { %3529 = shalt.err (!%p3526_p3)
}
  0xbc   :  { %101 = dma.hbm_to_vmem [thread:$0]  %s4210_s6, 32, %s99_s20, [#allocation11]  }
  0xbd   :  { %s3530_s9 = scalar_lea.hbm %s4212_s8, 64 }
  0xbe   :  { %p3531_p4 = scmp.ne.s32.totalorder %s4212_s8, %s3530_s9  ;;  %p3534_p5 = scmp.lt.u32.totalorder %s3530_s9, %s4212_s8 }
  0xc0   :  { %p3536_p6 = pnand %p3534_p5, %p3531_p4 }
  0xc2   :  { %3539 = shalt.err (!%p3536_p6)
}
  0xc3   :  { %s3540_s13 = scalar_lea.vmem %s121_s5, 64  ;;  %p3545_p8 = scmp.lt.s32.totalorder %s121_s5, %s121_s5 }
  0xc4   :  { %p3541_p7 = scmp.ne.s32.totalorder %s121_s5, %s3540_s13  ;;  %p3546_p9 = scmp.lt.s32.totalorder %s3540_s13, %s3540_s13 }
  0xc6   :  { %p3547_p10 = por %p3546_p9, %p3545_p8 }
  0xc8   :  { %p3548_p11 = pnand %p3547_p10, %p3541_p7 }
  0xca   :  { %3551 = shalt.err (!%p3548_p11)
}
  0xcb   :  { %123 = dma.hbm_to_vmem [thread:$0]  %s4212_s8, 64, %s121_s5, [#allocation14]  }
  0xcc   :  { %s3654_s2 = smov [#allocation18]   ;;  %s3655_s7 = smov [#allocation21]  }
  0xcd   :  { %s140_s17 = sshll.u32 %s3654_s2, 4  ;;  %s162_s20 = sshll.u32 %s3655_s7, 4  ;;  %s141_s17 = int_to_ptr.vmem [resolvable:$true] %s140_s17  ;;  %s163_s20 = int_to_ptr.vmem [resolvable:$true] %s162_s20 }
  0xce   :  { %s3552_s24 = scalar_lea.hbm %s4214_s10, 64 }
  0xcf   :  { %p3553_p12 = scmp.ne.s32.totalorder %s4214_s10, %s3552_s24  ;;  %p3556_p13 = scmp.lt.u32.totalorder %s3552_s24, %s4214_s10 }
  0xd1   :  { %p3558_p0 = pnand %p3556_p13, %p3553_p12 }
  0xd3   :  { %3561 = shalt.err (!%p3558_p0)
}
  0xd4   :  { %s3562_s8 = scalar_lea.vmem %s141_s17, 64  ;;  %p3567_p2 = scmp.lt.s32.totalorder %s141_s17, %s141_s17 }
  0xd5   :  { %p3563_p1 = scmp.ne.s32.totalorder %s141_s17, %s3562_s8  ;;  %p3568_p3 = scmp.lt.s32.totalorder %s3562_s8, %s3562_s8 }
  0xd7   :  { %p3569_p4 = por %p3568_p3, %p3567_p2 }
  0xd9   :  { %p3570_p5 = pnand %p3569_p4, %p3563_p1 }
  0xdb   :  { %3573 = shalt.err (!%p3570_p5)
}
  0xdc   :  { %143 = dma.hbm_to_vmem [thread:$0]  %s4214_s10, 64, %s141_s17, [#allocation17]  }
  0xdd   :  { %s3574_s26 = scalar_lea.hbm %s4216_s12, 128 }
  0xde   :  { %p3575_p6 = scmp.ne.s32.totalorder %s4216_s12, %s3574_s26  ;;  %p3578_p7 = scmp.lt.u32.totalorder %s3574_s26, %s4216_s12 }
  0xe0   :  { %p3580_p8 = pnand %p3578_p7, %p3575_p6 }
  0xe2   :  { %3583 = shalt.err (!%p3580_p8)
}
  0xe3   :  { %s3584_s19 = scalar_lea.vmem %s163_s20, 128  ;;  %p3589_p10 = scmp.lt.s32.totalorder %s163_s20, %s163_s20 }
  0xe4   :  { %p3585_p9 = scmp.ne.s32.totalorder %s163_s20, %s3584_s19  ;;  %p3590_p11 = scmp.lt.s32.totalorder %s3584_s19, %s3584_s19 }
  0xe6   :  { %p3591_p12 = por %p3590_p11, %p3589_p10 }
  0xe8   :  { %p3592_p13 = pnand %p3591_p12, %p3585_p9 }
  0xea   :  { %3595 = shalt.err (!%p3592_p13)
}
  0xeb   :  { %165 = dma.hbm_to_vmem [thread:$0]  %s4216_s12, 128, %s163_s20, [#allocation20]  }
  0xec   :  { %s3656_s29 = smov [#allocation24]   ;;  %s3596_s2 = scalar_lea.hbm %s4218_s14, 128 }
  0xed   :  { %s182_s13 = sshll.u32 %s3656_s29, 4  ;;  %p3597_p0 = scmp.ne.s32.totalorder %s4218_s14, %s3596_s2  ;;  %s183_s13 = int_to_ptr.vmem [resolvable:$true] %s182_s13 }
  0xee   :  { %p3600_p1 = scmp.lt.u32.totalorder %s3596_s2, %s4218_s14 }
  0xf0   :  { %p3602_p2 = pnand %p3600_p1, %p3597_p0 }
  0xf2   :  { %3605 = shalt.err (!%p3602_p2)
}
  0xf3   :  { %s3606_s24 = scalar_lea.vmem %s183_s13, 128  ;;  %p3611_p4 = scmp.lt.s32.totalorder %s183_s13, %s183_s13 }
  0xf4   :  { %p3607_p3 = scmp.ne.s32.totalorder %s183_s13, %s3606_s24  ;;  %p3612_p5 = scmp.lt.s32.totalorder %s3606_s24, %s3606_s24 }
  0xf6   :  { %p3613_p6 = por %p3612_p5, %p3611_p4 }
  0xf8   :  { %p3614_p7 = pnand %p3613_p6, %p3607_p3 }
  0xfa   :  { %3617 = shalt.err (!%p3614_p7)
}
  0xfb   :  { %185 = dma.hbm_to_vmem [thread:$0]  %s4218_s14, 128, %s183_s13, [#allocation23]  }
  0xfc   :  { %3618 = dma.done.wait [#allocation3], 128  }
  0xfd   :  { %3619 = vsyncadd [#allocation3], 4294967168 }
  0xfe   :  { %3620 = dma.done.wait [#allocation5], 528  }
  0xff   :  { %3621 = vsyncadd [#allocation5], 4294966768 }
 0x100   :  { %3622 = dma.done.wait [#allocation8], 4128  }
 0x101   :  { %3623 = vsyncadd [#allocation8], 4294963168 }
 0x102   :  { %3624 = dma.done.wait [#allocation11], 64  }
 0x103   :  { %3625 = vsyncadd [#allocation11], 4294967232 }
 0x104   :  { %3626 = dma.done.wait [#allocation14], 16448  }
 0x105   :  { %3627 = vsyncadd [#allocation14], 4294950848 }
 0x106   :  { %3628 = dma.done.wait [#allocation17], 128  }
 0x107   :  { %3629 = vsyncadd [#allocation17], 4294967168 }
 0x108   :  { %3630 = dma.done.wait [#allocation20], 65664  }
 0x109   :  { %3631 = vsyncadd [#allocation20], 4294901632 }
 0x10a   :  { %3632 = dma.done.wait [#allocation23], 256  }
 0x10b   :  { %3633 = vsyncadd [#allocation23], 4294967040  ;;  %v3657_v0 = vmov 0.0|0.0   ;;  %vm3658_vm0 = vmmov 0   ;;  %v3659_v1 = vmov 0.0   ;;  %v232_v2 = vld [vmem:[#allocation4] sm:$0xff] }
 0x10c   :  { %2539 = vmatprep.subr.bf16.mxu0 %v3657_v0  ;;  %2536 = vmatprep.mubr.msk.f32.mxu0 %vm3658_vm0, %v3659_v1  ;;  %v233_v3 = vld [vmem:[#allocation4 + $0x8] sm:$0xff]  ;;  %v234_v4 = vld [vmem:[#allocation4 + $0x10] sm:$0xff]  ;;  %v235_v6 = vld [vmem:[#allocation4 + $0x18] sm:$0xff]  ;;  %vm243_vm1 = vcmask 261120  }
 0x10d   :  { %427 = vmatprep.mubr.f32.mxu1 %v3659_v1  ;;  %v2540_v5 = vpack.c.bf16 %v233_v3, %v232_v2  ;;  %v320_v7 = vld [vmem:[#allocation7 + $0x8] sm:$0xff]  ;;  %v322_v8 = vld [vmem:[#allocation7 + $0x18] sm:$0xff]  ;;  %v319_v9 = vld [vmem:[#allocation7] sm:$0xff]  ;;  %v2543_v11 = vpack.c.bf16 %v235_v6, %v234_v4 }
 0x10e   :  { %v321_v10 = vld [vmem:[#allocation7 + $0x10] sm:$0xff]  ;;  %v2545_v12 = vpack.c.bf16 %v322_v8, %v320_v7  ;;  %v324_v14 = vld [vmem:[#allocation7 + $0x28] sm:$0xff]  ;;  %v326_v15 = vld [vmem:[#allocation7 + $0x38] sm:$0xff] }
 0x10f   :  { %2541 = vmatpush3.bf16.msra.mxu0 %v2540_v5  ;;  %v2547_v13 = vpack.c.bf16 %v321_v10, %v319_v9  ;;  %v323_v16 = vld [vmem:[#allocation7 + $0x20] sm:$0xff]  ;;  %v2549_v17 = vpack.c.bf16 %v326_v15, %v324_v14  ;;  %v325_v18 = vld [vmem:[#allocation7 + $0x30] sm:$0xff]  ;;  %v328_v19 = vld [vmem:[#allocation7 + $0x48] sm:$0xff] }
 0x110   :  { %2542 = vmatprep.subr.bf16.mxu0 %v3657_v0  ;;  %v330_v20 = vld [vmem:[#allocation7 + $0x58] sm:$0xff]  ;;  %2546 = vmatprep.subr.bf16.mxu1 %v2545_v12  ;;  %v2551_v21 = vpack.c.bf16 %v325_v18, %v323_v16  ;;  %v327_v24 = vld [vmem:[#allocation7 + $0x40] sm:$0xff]  ;;  %v329_v25 = vld [vmem:[#allocation7 + $0x50] sm:$0xff] }
 0x111   :  { %2548 = vmatpush1.bf16.msra.mxu1 %v2547_v13  ;;  %v231_v22 = vld [vmem:[#allocation2] sm:$0xff]  ;;  %v2553_v23 = vpack.c.bf16 %v330_v20, %v328_v19  ;;  %v332_v26 = vld [vmem:[#allocation7 + $0x68] sm:$0xff]  ;;  %v2555_v28 = vpack.c.bf16 %v329_v25, %v327_v24  ;;  %v331_v30 = vld [vmem:[#allocation7 + $0x60] sm:$0xff] }
 0x112   :  { %2550 = vmatprep.subr.bf16.mxu1 %v2549_v17  ;;  %v334_v27 = vld [vmem:[#allocation7 + $0x78] sm:$0xff]  ;;  %v333_v31 = vld [vmem:[#allocation7 + $0x70] sm:$0xff]  ;;  %v336_v32 = vld [vmem:[#allocation7 + $0x88] sm:$0xff] }
 0x113   :  { %2544 = vmatpush3.bf16.msra.mxu0 %v2543_v11  ;;  %v2557_v29 = vpack.c.bf16 %v334_v27, %v332_v26  ;;  %v338_v33 = vld [vmem:[#allocation7 + $0x98] sm:$0xff]  ;;  %v2559_v34 = vpack.c.bf16 %v333_v31, %v331_v30  ;;  %v335_v36 = vld [vmem:[#allocation7 + $0x80] sm:$0xff]  ;;  %v337_v37 = vld [vmem:[#allocation7 + $0x90] sm:$0xff] }
 0x114   :  { %v2561_v35 = vpack.c.bf16 %v338_v33, %v336_v32  ;;  %v340_v38 = vld [vmem:[#allocation7 + $0xa8] sm:$0xff]  ;;  %v342_v39 = vld [vmem:[#allocation7 + $0xb8] sm:$0xff]  ;;  %v2563_v40 = vpack.c.bf16 %v337_v37, %v335_v36  ;;  %v339_v42 = vld [vmem:[#allocation7 + $0xa0] sm:$0xff] }
 0x115   :  { %2552 = vmatpush1.bf16.msra.mxu1 %v2551_v21  ;;  %v2565_v41 = vpack.c.bf16 %v342_v39, %v340_v38  ;;  %v341_v43 = vld [vmem:[#allocation7 + $0xb0] sm:$0xff]  ;;  %v344_v44 = vld [vmem:[#allocation7 + $0xc8] sm:$0xff]  ;;  %v346_v45 = vld [vmem:[#allocation7 + $0xd8] sm:$0xff] }
 0x116   :  { %2537 = vmatmul.mubr.msk.f32.vlgmr.msra.gmra.mrb[0].mxu0 %vm243_vm1, %v231_v22  ;;  %2554 = vmatprep.subr.bf16.mxu1 %v2553_v23  ;;  %v2567_v46 = vpack.c.bf16 %v341_v43, %v339_v42  ;;  %v2569_v47 = vpack.c.bf16 %v346_v45, %v344_v44  ;;  %v343_v48 = vld [vmem:[#allocation7 + $0xc0] sm:$0xff]  ;;  %v345_v49 = vld [vmem:[#allocation7 + $0xd0] sm:$0xff]  ;;  %v348_v51 = vld [vmem:[#allocation7 + $0xe8] sm:$0xff] }
 0x117   :  { %v2571_v50 = vpack.c.bf16 %v345_v49, %v343_v48  ;;  %v350_v52 = vld [vmem:[#allocation7 + $0xf8] sm:$0xff]  ;;  %v347_v54 = vld [vmem:[#allocation7 + $0xe0] sm:$0xff]  ;;  %v349_v55 = vld [vmem:[#allocation7 + $0xf0] sm:$0xff] }
 0x118   :  { %v2573_v53 = vpack.c.bf16 %v350_v52, %v348_v51  ;;  %v2575_v56 = vpack.c.bf16 %v349_v55, %v347_v54  ;;  %v2521_v57 = vld [vmem:[#allocation6] ss:$0 sm:$0xff]  ;;  %v535_v63 = vld [vmem:[#allocation13 + $0x8] sm:$0xff]  ;;  %v534_v4 = vld [vmem:[#allocation13] sm:$0xff] }
 0x119   :  { %2556 = vmatpush1.bf16.msra.mxu1 %v2555_v28  ;;  %v539_v0 = vld [vmem:[#allocation13 + $0x28] sm:$0xff]  ;;  %v537_v1 = vld [vmem:[#allocation13 + $0x18] sm:$0xff]  ;;  %v538_v5 = vld [vmem:[#allocation13 + $0x20] sm:$0xff] }
 0x11a   :  { %2558 = vmatprep.subr.bf16.mxu1 %v2557_v29  ;;  %v2577_v2 = vpack.c.bf16 %v539_v0, %v535_v63  ;;  %v541_v3 = vld [vmem:[#allocation13 + $0x38] sm:$0xff]  ;;  %v2579_v7 = vpack.c.bf16 %v538_v5, %v534_v4  ;;  %v536_v8 = vld [vmem:[#allocation13 + $0x10] sm:$0xff]  ;;  %v543_v11 = vld [vmem:[#allocation13 + $0x48] sm:$0xff] }
 0x11b   :  { %v2641_v6 = vpack.c.bf16 %v541_v3, %v537_v1  ;;  %v540_v9 = vld [vmem:[#allocation13 + $0x30] sm:$0xff]  ;;  %v547_v12 = vld [vmem:[#allocation13 + $0x68] sm:$0xff]  ;;  %v545_v13 = vld [vmem:[#allocation13 + $0x58] sm:$0xff] }
 0x11c   :  { %2578 = vmatprep.subr.bf16.mxu0 %v2577_v2  ;;  %v2643_v10 = vpack.c.bf16 %v540_v9, %v536_v8  ;;  %v2581_v14 = vpack.c.bf16 %v547_v12, %v543_v11  ;;  %v549_v15 = vld [vmem:[#allocation13 + $0x78] sm:$0xff]  ;;  %v542_v16 = vld [vmem:[#allocation13 + $0x40] sm:$0xff]  ;;  %v544_v20 = vld [vmem:[#allocation13 + $0x50] sm:$0xff] }
 0x11d   :  { %2560 = vmatpush1.bf16.msra.mxu1 %v2559_v34  ;;  %2580 = vmatpush1.bf16.msra.mxu0 %v2579_v7  ;;  %v546_v17 = vld [vmem:[#allocation13 + $0x60] sm:$0xff]  ;;  %v2645_v18 = vpack.c.bf16 %v549_v15, %v545_v13  ;;  %v548_v21 = vld [vmem:[#allocation13 + $0x70] sm:$0xff]  ;;  %v551_v23 = vld [vmem:[#allocation13 + $0x88] sm:$0xff] }
 0x11e   :  { %2562 = vmatprep.subr.bf16.mxu1 %v2561_v35  ;;  %v2583_v19 = vpack.c.bf16 %v546_v17, %v542_v16  ;;  %2582 = vmatprep.subr.bf16.mxu0 %v2581_v14  ;;  %v2647_v22 = vpack.c.bf16 %v548_v21, %v544_v20  ;;  %v555_v24 = vld [vmem:[#allocation13 + $0xa8] sm:$0xff]  ;;  %v553_v25 = vld [vmem:[#allocation13 + $0x98] sm:$0xff]  ;;  %v550_v28 = vld [vmem:[#allocation13 + $0x80] sm:$0xff] }
 0x11f   :  { %v2585_v26 = vpack.c.bf16 %v555_v24, %v551_v23  ;;  %v557_v27 = vld [vmem:[#allocation13 + $0xb8] sm:$0xff]  ;;  %v554_v29 = vld [vmem:[#allocation13 + $0xa0] sm:$0xff]  ;;  %v552_v32 = vld [vmem:[#allocation13 + $0x90] sm:$0xff] }
 0x120   :  { %v2649_v30 = vpack.c.bf16 %v557_v27, %v553_v25  ;;  %v2587_v31 = vpack.c.bf16 %v554_v29, %v550_v28  ;;  %v556_v33 = vld [vmem:[#allocation13 + $0xb0] sm:$0xff]  ;;  %v559_v35 = vld [vmem:[#allocation13 + $0xc8] sm:$0xff]  ;;  %v561_v37 = vld [vmem:[#allocation13 + $0xd8] sm:$0xff] }
 0x121   :  { %2564 = vmatpush1.bf16.msra.mxu1 %v2563_v40  ;;  %2584 = vmatpush1.bf16.msra.mxu0 %v2583_v19  ;;  %v2651_v34 = vpack.c.bf16 %v556_v33, %v552_v32  ;;  %v563_v36 = vld [vmem:[#allocation13 + $0xe8] sm:$0xff]  ;;  %v565_v39 = vld [vmem:[#allocation13 + $0xf8] sm:$0xff]  ;;  %v558_v40 = vld [vmem:[#allocation13 + $0xc0] sm:$0xff] }
 0x122   :  { %2566 = vmatprep.subr.bf16.mxu1 %v2565_v41  ;;  %2586 = vmatprep.subr.bf16.mxu0 %v2585_v26  ;;  %v2589_v38 = vpack.c.bf16 %v563_v36, %v559_v35  ;;  %v562_v41 = vld [vmem:[#allocation13 + $0xe0] sm:$0xff]  ;;  %v2653_v42 = vpack.c.bf16 %v565_v39, %v561_v37  ;;  %v560_v44 = vld [vmem:[#allocation13 + $0xd0] sm:$0xff]  ;;  %v571_v48 = vld [vmem:[#allocation13 + $0x128] sm:$0xff] }
 0x123   :  { %v2591_v43 = vpack.c.bf16 %v562_v41, %v558_v40  ;;  %v564_v45 = vld [vmem:[#allocation13 + $0xf0] sm:$0xff]  ;;  %v569_v49 = vld [vmem:[#allocation13 + $0x118] sm:$0xff]  ;;  %v566_v52 = vld [vmem:[#allocation13 + $0x100] sm:$0xff] }
 0x124   :  { %v573_v51 = vld [vmem:[#allocation13 + $0x138] sm:$0xff]  ;;  %v574_v0 = vld [vmem:[#allocation13 + $0x140] sm:$0xff]  ;;  %v576_v4 = vld [vmem:[#allocation13 + $0x150] sm:$0xff] }
 0x125   :  { %2568 = vmatpush1.bf16.msra.mxu1 %v2567_v46  ;;  %2588 = vmatpush1.bf16.msra.mxu0 %v2587_v31  ;;  %v2655_v46 = vpack.c.bf16 %v564_v45, %v560_v44  ;;  %v2657_v54 = vpack.c.bf16 %v573_v51, %v569_v49  ;;  %v581_v63 = vld [vmem:[#allocation13 + $0x178] sm:$0xff]  ;;  %v578_v1 = vld [vmem:[#allocation13 + $0x160] sm:$0xff]  ;;  %v580_v5 = vld [vmem:[#allocation13 + $0x170] sm:$0xff] }
 0x126   :  { %2570 = vmatprep.subr.bf16.mxu1 %v2569_v47  ;;  %2590 = vmatprep.subr.bf16.mxu0 %v2589_v38  ;;  %v567_v47 = vld [vmem:[#allocation13 + $0x108] sm:$0xff]  ;;  %v2599_v3 = vpack.c.bf16 %v578_v1, %v574_v0  ;;  %v585_v9 = vld [vmem:[#allocation13 + $0x198] sm:$0xff]  ;;  %v582_v12 = vld [vmem:[#allocation13 + $0x180] sm:$0xff] }
 0x127   :  { %v583_v7 = vld [vmem:[#allocation13 + $0x188] sm:$0xff]  ;;  %v589_v11 = vld [vmem:[#allocation13 + $0x1b8] sm:$0xff]  ;;  %v586_v13 = vld [vmem:[#allocation13 + $0x1a0] sm:$0xff] }
 0x128   :  { %v587_v8 = vld [vmem:[#allocation13 + $0x1a8] sm:$0xff]  ;;  %v2665_v14 = vpack.c.bf16 %v589_v11, %v585_v9  ;;  %v2603_v15 = vpack.c.bf16 %v586_v13, %v582_v12  ;;  %v584_v16 = vld [vmem:[#allocation13 + $0x190] sm:$0xff]  ;;  %v593_v21 = vld [vmem:[#allocation13 + $0x1d8] sm:$0xff] }
 0x129   :  { %2572 = vmatpush1.bf16.msra.mxu1 %v2571_v50  ;;  %2592 = vmatpush1.bf16.msra.mxu0 %v2591_v43  ;;  %v2593_v50 = vpack.c.bf16 %v571_v48, %v567_v47  ;;  %v588_v17 = vld [vmem:[#allocation13 + $0x1b0] sm:$0xff]  ;;  %v591_v19 = vld [vmem:[#allocation13 + $0x1c8] sm:$0xff]  ;;  %v597_v23 = vld [vmem:[#allocation13 + $0x1f8] sm:$0xff] }
 0x12a   :  { %2574 = vmatprep.subr.bf16.mxu1 %v2573_v53  ;;  %v570_v53 = vld [vmem:[#allocation13 + $0x120] sm:$0xff]  ;;  %v595_v20 = vld [vmem:[#allocation13 + $0x1e8] sm:$0xff]  ;;  %v2669_v26 = vpack.c.bf16 %v597_v23, %v593_v21  ;;  %v592_v28 = vld [vmem:[#allocation13 + $0x1d0] sm:$0xff] }
 0x12b   :  { %v2595_v55 = vpack.c.bf16 %v570_v53, %v566_v52  ;;  %2594 = vmatprep.subr.bf16.mxu0 %v2593_v50  ;;  %v590_v24 = vld [vmem:[#allocation13 + $0x1c0] sm:$0xff]  ;;  %v596_v29 = vld [vmem:[#allocation13 + $0x1f0] sm:$0xff]  ;;  %v599_v31 = vld [vmem:[#allocation13 + $0x208] sm:$0xff] }
 0x12c   :  { %v594_v25 = vld [vmem:[#allocation13 + $0x1e0] sm:$0xff]  ;;  %v603_v32 = vld [vmem:[#allocation13 + $0x228] sm:$0xff]  ;;  %v601_v33 = vld [vmem:[#allocation13 + $0x218] sm:$0xff] }
 0x12d   :  { %2576 = vmatpush1.bf16.msra.mxu1 %v2575_v56  ;;  %v568_v56 = vld [vmem:[#allocation13 + $0x110] sm:$0xff]  ;;  %2596 = vmatpush1.bf16.msra.mxu0 %v2595_v55  ;;  %v2607_v27 = vpack.c.bf16 %v594_v25, %v590_v24  ;;  %v605_v35 = vld [vmem:[#allocation13 + $0x238] sm:$0xff]  ;;  %v598_v36 = vld [vmem:[#allocation13 + $0x200] sm:$0xff] }
 0x12e   :  { %2642 = vmatprep.subr.bf16.mxu1 %v2641_v6  ;;  %v2663_v6 = vpack.c.bf16 %v580_v5, %v576_v4  ;;  %v602_v37 = vld [vmem:[#allocation13 + $0x220] sm:$0xff]  ;;  %v2673_v38 = vpack.c.bf16 %v605_v35, %v601_v33  ;;  %v600_v40 = vld [vmem:[#allocation13 + $0x210] sm:$0xff]  ;;  %v607_v43 = vld [vmem:[#allocation13 + $0x248] sm:$0xff] }
 0x12f   :  { %v2611_v39 = vpack.c.bf16 %v602_v37, %v598_v36  ;;  %v604_v41 = vld [vmem:[#allocation13 + $0x230] sm:$0xff]  ;;  %v611_v44 = vld [vmem:[#allocation13 + $0x268] sm:$0xff]  ;;  %v609_v45 = vld [vmem:[#allocation13 + $0x258] sm:$0xff] }
 0x130   :  { %v613_v47 = vld [vmem:[#allocation13 + $0x278] sm:$0xff]  ;;  %v606_v48 = vld [vmem:[#allocation13 + $0x240] sm:$0xff]  ;;  %v608_v52 = vld [vmem:[#allocation13 + $0x250] sm:$0xff] }
 0x131   :  { %v610_v49 = vld [vmem:[#allocation13 + $0x260] sm:$0xff]  ;;  %v2677_v50 = vpack.c.bf16 %v613_v47, %v609_v45  ;;  %v612_v53 = vld [vmem:[#allocation13 + $0x270] sm:$0xff]  ;;  %v615_v55 = vld [vmem:[#allocation13 + $0x288] sm:$0xff] }
 0x132   :  { %v2615_v51 = vpack.c.bf16 %v610_v49, %v606_v48  ;;  %v616_v0 = vld [vmem:[#allocation13 + $0x290] sm:$0xff]  ;;  %v627_v4 = vld [vmem:[#allocation13 + $0x2e8] sm:$0xff]  ;;  %v625_v5 = vld [vmem:[#allocation13 + $0x2d8] sm:$0xff] }
 0x133   :  { %v620_v1 = vld [vmem:[#allocation13 + $0x2b0] sm:$0xff]  ;;  %v626_v9 = vld [vmem:[#allocation13 + $0x2e0] sm:$0xff] }
 0x134   :  { %v624_v12 = vld [vmem:[#allocation13 + $0x2d0] sm:$0xff]  ;;  %v634_v21 = vld [vmem:[#allocation13 + $0x320] sm:$0xff] }
 0x135   :  { %v628_v13 = vld [vmem:[#allocation13 + $0x2f0] sm:$0xff]  ;;  %v638_v33 = vld [vmem:[#allocation13 + $0x340] sm:$0xff] }
 0x136   :  { %v632_v24 = vld [vmem:[#allocation13 + $0x310] sm:$0xff] }
 0x137   :  { %v636_v25 = vld [vmem:[#allocation13 + $0x330] sm:$0xff] }
 0x138   :  { %v640_v35 = vld [vmem:[#allocation13 + $0x350] sm:$0xff] }
 0x139   :  { %v644_v37 = vld [vmem:[#allocation13 + $0x370] sm:$0xff] }
 0x13a   :  { %v648_v47 = vld [vmem:[#allocation13 + $0x390] sm:$0xff] }
 0x13b   :  { %v652_v48 = vld [vmem:[#allocation13 + $0x3b0] sm:$0xff] }
 0x1e9   :  { %v313_v58 = vpop.f32.mrb[0].mxu0 }
 0x1ea   :  { %v314_v59 = vadd.f32 %v2521_v57, %v313_v58  ;;  %v2538_v60 = vpop.f32.mrb[1].mxu0  ;;  %v572_v57 = vld [vmem:[#allocation13 + $0x130] sm:$0xff] }
 0x1eb   :  { %v2659_v58 = vpack.c.bf16 %v572_v57, %v568_v56  ;;  %v579_v60 = vld [vmem:[#allocation13 + $0x168] sm:$0xff]  ;;  %v617_v57 = vld [vmem:[#allocation13 + $0x298] sm:$0xff] }
 0x1ec   :  { %v317_v61 = vmul.f32 0.2, %v314_v59  ;;  %v619_v56 = vld [vmem:[#allocation13 + $0x2a8] sm:$0xff] }
 0x1ee   :  { %v318_v62 = vmax.f32 %v314_v59, %v317_v61  ;;  %v575_v59 = vld [vmem:[#allocation13 + $0x148] sm:$0xff]  ;;  %v577_v61 = vld [vmem:[#allocation13 + $0x158] sm:$0xff] }
 0x1ef   :  { %v2661_v2 = vpack.c.bf16 %v581_v63, %v577_v61  ;;  %v618_v61 = vld [vmem:[#allocation13 + $0x2a0] sm:$0xff] }
 0x1f0   :  { %428 = vmatmul.mubr.f32.vlgmr.msra.gmra.mrb[0].mxu1 %v318_v62  ;;  %v2597_v62 = vpack.c.bf16 %v579_v60, %v575_v59  ;;  %v621_v59 = vld [vmem:[#allocation13 + $0x2b8] sm:$0xff]  ;;  %v614_v60 = vld [vmem:[#allocation13 + $0x280] sm:$0xff] }
 0x1f1   :  { %2644 = vmatpush1.bf16.msra.mxu1 %v2643_v10  ;;  %v2601_v10 = vpack.c.bf16 %v587_v8, %v583_v7  ;;  %v2619_v63 = vpack.c.bf16 %v618_v61, %v614_v60  ;;  %v629_v7 = vld [vmem:[#allocation13 + $0x2f8] sm:$0xff]  ;;  %v622_v8 = vld [vmem:[#allocation13 + $0x2c0] sm:$0xff]  ;;  %v660_v60 = vld [vmem:[#allocation13 + $0x3f0] sm:$0xff] }
 0x1f2   :  { %2646 = vmatprep.subr.bf16.mxu1 %v2645_v18  ;;  %2598 = vmatprep.subr.bf16.mxu0 %v2597_v62  ;;  %v2667_v18 = vpack.c.bf16 %v588_v17, %v584_v16  ;;  %v2681_v62 = vpack.c.bf16 %v621_v59, %v617_v57  ;;  %v2623_v11 = vpack.c.bf16 %v626_v9, %v622_v8  ;;  %v635_v16 = vld [vmem:[#allocation13 + $0x328] sm:$0xff]  ;;  %v633_v17 = vld [vmem:[#allocation13 + $0x318] sm:$0xff]  ;;  %v658_v57 = vld [vmem:[#allocation13 + $0x3e0] sm:$0xff] }
 0x1f3   :  { %2600 = vmatpush1.bf16.msra.mxu0 %v2599_v3  ;;  %v623_v3 = vld [vmem:[#allocation13 + $0x2c8] sm:$0xff]  ;;  %v656_v59 = vld [vmem:[#allocation13 + $0x3d0] sm:$0xff] }
 0x1f4   :  { %2602 = vmatprep.subr.bf16.mxu0 %v2601_v10  ;;  %v2685_v10 = vpack.c.bf16 %v629_v7, %v625_v5 }
 0x1f5   :  { %2648 = vmatpush1.bf16.msra.mxu1 %v2647_v22  ;;  %v2605_v22 = vpack.c.bf16 %v595_v20, %v591_v19  ;;  %v637_v19 = vld [vmem:[#allocation13 + $0x338] sm:$0xff]  ;;  %v630_v20 = vld [vmem:[#allocation13 + $0x300] sm:$0xff] }
 0x1f6   :  { %2650 = vmatprep.subr.bf16.mxu1 %v2649_v30  ;;  %v2671_v30 = vpack.c.bf16 %v596_v29, %v592_v28  ;;  %v2627_v23 = vpack.c.bf16 %v634_v21, %v630_v20  ;;  %v643_v28 = vld [vmem:[#allocation13 + $0x368] sm:$0xff]  ;;  %v641_v29 = vld [vmem:[#allocation13 + $0x358] sm:$0xff] }
 0x1f7   :  { %2604 = vmatpush1.bf16.msra.mxu0 %v2603_v15  ;;  %v631_v15 = vld [vmem:[#allocation13 + $0x308] sm:$0xff] }
 0x1f8   :  { %2606 = vmatprep.subr.bf16.mxu0 %v2605_v22  ;;  %v2689_v22 = vpack.c.bf16 %v637_v19, %v633_v17 }
 0x1f9   :  { %2652 = vmatpush1.bf16.msra.mxu1 %v2651_v34  ;;  %v2609_v34 = vpack.c.bf16 %v603_v32, %v599_v31 }
 0x1fa   :  { %2654 = vmatprep.subr.bf16.mxu1 %v2653_v42  ;;  %v2675_v42 = vpack.c.bf16 %v604_v41, %v600_v40  ;;  %v2695_v40 = vpack.c.bf16 %v644_v37, %v640_v35 }
 0x1fb   :  { %2608 = vmatpush1.bf16.msra.mxu0 %v2607_v27  ;;  %v2691_v27 = vpack.c.bf16 %v636_v25, %v632_v24 }
 0x1fc   :  { %2610 = vmatprep.subr.bf16.mxu0 %v2609_v34  ;;  %v642_v34 = vld [vmem:[#allocation13 + $0x360] sm:$0xff] }
 0x1fd   :  { %2656 = vmatpush1.bf16.msra.mxu1 %v2655_v46  ;;  %v2613_v46 = vpack.c.bf16 %v611_v44, %v607_v43  ;;  %v2631_v36 = vpack.c.bf16 %v642_v34, %v638_v33  ;;  %v653_v43 = vld [vmem:[#allocation13 + $0x3b8] sm:$0xff]  ;;  %v646_v44 = vld [vmem:[#allocation13 + $0x380] sm:$0xff] }
 0x1fe   :  { %2658 = vmatprep.subr.bf16.mxu1 %v2657_v54  ;;  %v2679_v54 = vpack.c.bf16 %v612_v53, %v608_v52  ;;  %v657_v52 = vld [vmem:[#allocation13 + $0x3d8] sm:$0xff]  ;;  %v2699_v53 = vpack.c.bf16 %v652_v48, %v648_v47 }
 0x1ff   :  { %2612 = vmatpush1.bf16.msra.mxu0 %v2611_v39  ;;  %v651_v39 = vld [vmem:[#allocation13 + $0x3a8] sm:$0xff] }
 0x200   :  { %2614 = vmatprep.subr.bf16.mxu0 %v2613_v46  ;;  %v650_v46 = vld [vmem:[#allocation13 + $0x3a0] sm:$0xff] }
 0x201   :  { %2660 = vmatpush1.bf16.msra.mxu1 %v2659_v58  ;;  %v2617_v58 = vpack.c.bf16 %v619_v56, %v615_v55  ;;  %v2635_v49 = vpack.c.bf16 %v650_v46, %v646_v44  ;;  %v661_v55 = vld [vmem:[#allocation13 + $0x3f8] sm:$0xff]  ;;  %v654_v56 = vld [vmem:[#allocation13 + $0x3c0] sm:$0xff] }
 0x202   :  { %2662 = vmatprep.subr.bf16.mxu1 %v2661_v2  ;;  %v2683_v2 = vpack.c.bf16 %v620_v1, %v616_v0  ;;  %v2639_v61 = vpack.c.bf16 %v658_v57, %v654_v56  ;;  %v434_v44 = vld [vmem:[#allocation10] sm:$0x3] }
 0x203   :  { %2616 = vmatpush1.bf16.msra.mxu0 %v2615_v51  ;;  %v659_v51 = vld [vmem:[#allocation13 + $0x3e8] sm:$0xff] }
 0x204   :  { %2618 = vmatprep.subr.bf16.mxu0 %v2617_v58  ;;  %v2701_v58 = vpack.c.bf16 %v661_v55, %v657_v52 }
 0x205   :  { %2664 = vmatpush1.bf16.msra.mxu1 %v2663_v6  ;;  %v2621_v6 = vpack.c.bf16 %v627_v4, %v623_v3 }
 0x206   :  { %2666 = vmatprep.subr.bf16.mxu1 %v2665_v14  ;;  %v2687_v14 = vpack.c.bf16 %v628_v13, %v624_v12 }
 0x207   :  { %2620 = vmatpush1.bf16.msra.mxu0 %v2619_v63  ;;  %v353_v63 = vlaneseq }
 0x208   :  { %2622 = vmatprep.subr.bf16.mxu0 %v2621_v6 }
 0x209   :  { %2668 = vmatpush1.bf16.msra.mxu1 %v2667_v18  ;;  %v2625_v18 = vpack.c.bf16 %v635_v16, %v631_v15  ;;  %v3935_v0 = vshrl.u32 %v353_v63, 7 }
 0x20a   :  { %2670 = vmatprep.subr.bf16.mxu1 %v2669_v26  ;;  %v639_v26 = vld [vmem:[#allocation13 + $0x348] sm:$0xff] }
 0x20b   :  { %2624 = vmatpush1.bf16.msra.mxu0 %v2623_v11  ;;  %v2629_v31 = vpack.c.bf16 %v643_v28, %v639_v26  ;;  %v3938_v1 = vsub.s32 0, %v3935_v0  ;;  %v3941_v3 = vsub.s32 1, %v3935_v0 }
 0x20c   :  { %2626 = vmatprep.subr.bf16.mxu0 %v2625_v18 }
 0x20d   :  { %2672 = vmatpush1.bf16.msra.mxu1 %v2671_v30  ;;  %v645_v30 = vld [vmem:[#allocation13 + $0x378] sm:$0xff]  ;;  %v477_v47 = vrot.slane %v434_v44, %v3938_v1  ;;  %v481_v48 = vrot.slane %v434_v44, %v3941_v3 }
 0x20e   :  { %2674 = vmatprep.subr.bf16.mxu1 %v2673_v38  ;;  %v2693_v32 = vpack.c.bf16 %v645_v30, %v641_v29  ;;  %v647_v38 = vld [vmem:[#allocation13 + $0x388] sm:$0xff] }
 0x20f   :  { %2628 = vmatpush1.bf16.msra.mxu0 %v2627_v23  ;;  %v2633_v41 = vpack.c.bf16 %v651_v39, %v647_v38 }
 0x210   :  { %2630 = vmatprep.subr.bf16.mxu0 %v2629_v31 }
 0x211   :  { %2676 = vmatpush1.bf16.msra.mxu1 %v2675_v42  ;;  %v649_v42 = vld [vmem:[#allocation13 + $0x398] sm:$0xff] }
 0x212   :  { %2678 = vmatprep.subr.bf16.mxu1 %v2677_v50  ;;  %v2697_v45 = vpack.c.bf16 %v653_v43, %v649_v42  ;;  %v655_v50 = vld [vmem:[#allocation13 + $0x3c8] sm:$0xff] }
 0x213   :  { %2632 = vmatpush1.bf16.msra.mxu0 %v2631_v36 }
 0x214   :  { %2634 = vmatprep.subr.bf16.mxu0 %v2633_v41 }
 0x215   :  { %2680 = vmatpush1.bf16.msra.mxu1 %v2679_v54  ;;  %v2637_v54 = vpack.c.bf16 %v659_v51, %v655_v50 }
 0x216   :  { %2682 = vmatprep.subr.bf16.mxu1 %v2681_v62  ;;  %v2703_v62 = vpack.c.bf16 %v660_v60, %v656_v59  ;;  %v435_v59 = vld [vmem:[#allocation12] sm:$0x3] }
 0x217   :  { %2636 = vmatpush1.bf16.msra.mxu0 %v2635_v49 }
 0x218   :  { %2638 = vmatprep.subr.bf16.mxu0 %v2637_v54 }
 0x219   :  { %2684 = vmatpush1.bf16.msra.mxu1 %v2683_v2  ;;  %v351_v2 = vld [vmem:[#allocation9] sm:$0x3] }
 0x21a   :  { %2686 = vmatprep.subr.bf16.mxu1 %v2685_v10  ;;  %v356_v4 = vrot.slane %v351_v2, %v3938_v1  ;;  %v360_v5 = vrot.slane %v351_v2, %v3941_v3 }
 0x21b   :  { %2640 = vmatpush1.bf16.msra.mxu0 %v2639_v61 }
 0x21d   :  { %2688 = vmatpush1.bf16.msra.mxu1 %v2687_v14 }
 0x21e   :  { %2690 = vmatprep.subr.bf16.mxu1 %v2689_v22 }
 0x221   :  { %2692 = vmatpush1.bf16.msra.mxu1 %v2691_v27 }
 0x222   :  { %2694 = vmatprep.subr.bf16.mxu1 %v2693_v32 }
 0x225   :  { %2696 = vmatpush1.bf16.msra.mxu1 %v2695_v40 }
 0x226   :  { %2698 = vmatprep.subr.bf16.mxu1 %v2697_v45  ;;  %v3660_v45 = vmov 1966171168  }
 0x227   :  { %v492_v46 = vunpack.c.l.s4 %v3660_v45 }
 0x229   :  { %2700 = vmatpush1.bf16.msra.mxu1 %v2699_v53  ;;  %v493_v50 = vunpack.c.0.s8 %v492_v46  ;;  %v1046_v46 = vld [vmem:[#allocation19 + $0x110] sm:$0xff] }
 0x22a   :  { %2702 = vmatprep.subr.bf16.mxu1 %v2701_v58 }
 0x22b   :  { %v3948_v56 = vsub.s32 %v493_v50, %v3935_v0  ;;  %v1069_v50 = vld [vmem:[#allocation19 + $0x1c8] sm:$0xff] }
 0x22d   :  { %2704 = vmatpush1.bf16.msra.mxu1 %v2703_v62 }
 0x2c3   :  { %v429_v6 = vpop.f32.mrb[0].mxu1 }
 0x2c4   :  { %v430_v7 = vadd.f32 %v429_v6, %v356_v4  ;;  %v431_v8 = vpop.f32.mrb[1].mxu1 }
 0x2c5   :  { %v432_v9 = vadd.f32 %v431_v8, %v360_v5 }
 0x2c6   :  { %v436_v10 = vrot.slane %v430_v7, 4 }
 0x2c7   :  { %v442_v11 = vrot.slane %v432_v9, 4 }
 0x2c8   :  { %v437_v12 = vadd.f32 %v436_v10, %v430_v7 }
 0x2c9   :  { %v443_v13 = vadd.f32 %v442_v11, %v432_v9 }
 0x2ca   :  { %v438_v14 = vrot.slane %v437_v12, 2 }
 0x2cb   :  { %v444_v15 = vrot.slane %v443_v13, 2 }
 0x2cc   :  { %v439_v16 = vadd.f32 %v438_v14, %v437_v12 }
 0x2cd   :  { %v445_v17 = vadd.f32 %v444_v15, %v443_v13  ;;  %v1013_v15 = vld [vmem:[#allocation19 + $0x8] sm:$0xff] }
 0x2ce   :  { %v440_v18 = vrot.slane %v439_v16, 1 }
 0x2cf   :  { %v446_v19 = vrot.slane %v445_v17, 1 }
 0x2d0   :  { %v441_v20 = vadd.f32 %v440_v18, %v439_v16  ;;  %v1021_v16 = vld [vmem:[#allocation19 + $0x48] sm:$0xff] }
 0x2d1   :  { %v447_v21 = vadd.f32 %v446_v19, %v445_v17  ;;  %v1015_v17 = vld [vmem:[#allocation19 + $0x18] sm:$0xff]  ;;  %v2705_v18 = vpack.c.bf16 %v1021_v16, %v1013_v15  ;;  %v1020_v19 = vld [vmem:[#allocation19 + $0x40] sm:$0xff]  ;;  %v1093_v15 = vld [vmem:[#allocation19 + $0x288] sm:$0xff] }
 0x2d2   :  { %v449_v22 = vmul.f32 0.125, %v441_v20  ;;  %v1101_v16 = vld [vmem:[#allocation19 + $0x2c8] sm:$0xff] }
 0x2d3   :  { %v450_v23 = vmul.f32 0.125, %v447_v21  ;;  %2706 = vmatprep.subr.bf16.mxu0 %v2705_v18  ;;  %v2725_v18 = vpack.c.bf16 %v1101_v16, %v1093_v15  ;;  %v1173_v15 = vld [vmem:[#allocation19 + $0x508] sm:$0xff] }
 0x2d4   :  { %v451_v24 = vsub.f32 %v430_v7, %v449_v22  ;;  %v1181_v16 = vld [vmem:[#allocation19 + $0x548] sm:$0xff] }
 0x2d5   :  { %v452_v25 = vsub.f32 %v432_v9, %v450_v23 }
 0x2d6   :  { %v453_v26 = vmul.f32 %v451_v24, %v451_v24 }
 0x2d7   :  { %v454_v27 = vmul.f32 %v452_v25, %v452_v25  ;;  %v1029_v25 = vld [vmem:[#allocation19 + $0x88] sm:$0xff] }
 0x2d8   :  { %v455_v28 = vrot.slane %v453_v26, 4 }
 0x2d9   :  { %v461_v29 = vrot.slane %v454_v27, 4 }
 0x2da   :  { %v456_v30 = vadd.f32 %v455_v28, %v453_v26  ;;  %v1037_v26 = vld [vmem:[#allocation19 + $0xc8] sm:$0xff] }
 0x2db   :  { %v462_v31 = vadd.f32 %v461_v29, %v454_v27  ;;  %v1031_v27 = vld [vmem:[#allocation19 + $0x98] sm:$0xff]  ;;  %v2709_v28 = vpack.c.bf16 %v1037_v26, %v1029_v25  ;;  %v1109_v25 = vld [vmem:[#allocation19 + $0x308] sm:$0xff] }
 0x2dc   :  { %v457_v32 = vrot.slane %v456_v30, 2  ;;  %v1039_v29 = vld [vmem:[#allocation19 + $0xd8] sm:$0xff]  ;;  %v1117_v26 = vld [vmem:[#allocation19 + $0x348] sm:$0xff] }
 0x2dd   :  { %v463_v33 = vrot.slane %v462_v31, 2 }
 0x2de   :  { %v458_v34 = vadd.f32 %v457_v32, %v456_v30  ;;  %v1028_v30 = vld [vmem:[#allocation19 + $0x80] sm:$0xff]  ;;  %v2837_v32 = vpack.c.bf16 %v1039_v29, %v1031_v27  ;;  %v1111_v27 = vld [vmem:[#allocation19 + $0x318] sm:$0xff] }
 0x2df   :  { %v464_v35 = vadd.f32 %v463_v33, %v462_v31  ;;  %v1036_v31 = vld [vmem:[#allocation19 + $0xc0] sm:$0xff]  ;;  %v1119_v29 = vld [vmem:[#allocation19 + $0x358] sm:$0xff] }
 0x2e0   :  { %v459_v36 = vrot.slane %v458_v34, 1  ;;  %v2711_v33 = vpack.c.bf16 %v1036_v31, %v1028_v30  ;;  %v1108_v30 = vld [vmem:[#allocation19 + $0x300] sm:$0xff] }
 0x2e1   :  { %v465_v37 = vrot.slane %v464_v35, 1  ;;  %v1116_v31 = vld [vmem:[#allocation19 + $0x340] sm:$0xff] }
 0x2e2   :  { %v460_v38 = vadd.f32 %v459_v36, %v458_v34  ;;  %v1030_v34 = vld [vmem:[#allocation19 + $0x90] sm:$0xff] }
 0x2e3   :  { %v466_v39 = vadd.f32 %v465_v37, %v464_v35  ;;  %v1038_v35 = vld [vmem:[#allocation19 + $0xd0] sm:$0xff]  ;;  %v1045_v37 = vld [vmem:[#allocation19 + $0x108] sm:$0xff] }
 0x2e4   :  { %v467_v40 = vmul.f32 0.125, %v460_v38  ;;  %v2839_v36 = vpack.c.bf16 %v1038_v35, %v1030_v34  ;;  %v1053_v38 = vld [vmem:[#allocation19 + $0x148] sm:$0xff]  ;;  %v1110_v34 = vld [vmem:[#allocation19 + $0x310] sm:$0xff] }
 0x2e5   :  { %v468_v41 = vmul.f32 0.125, %v466_v39  ;;  %v1047_v39 = vld [vmem:[#allocation19 + $0x118] sm:$0xff]  ;;  %v1118_v35 = vld [vmem:[#allocation19 + $0x350] sm:$0xff] }
 0x2e6   :  { %v469_v42 = vadd.f32 0.8, %v467_v40  ;;  %v2713_v40 = vpack.c.bf16 %v1053_v38, %v1045_v37  ;;  %v1125_v37 = vld [vmem:[#allocation19 + $0x388] sm:$0xff] }
 0x2e7   :  { %v470_v43 = vadd.f32 0.8, %v468_v41  ;;  %v1055_v41 = vld [vmem:[#allocation19 + $0x158] sm:$0xff]  ;;  %v1133_v38 = vld [vmem:[#allocation19 + $0x3c8] sm:$0xff] }
 0x2e8   :  { %3260 = vrsqrt.f32 %v469_v42  ;;  %v1044_v42 = vld [vmem:[#allocation19 + $0x100] sm:$0xff]  ;;  %v2841_v44 = vpack.c.bf16 %v1055_v41, %v1047_v39  ;;  %v1127_v39 = vld [vmem:[#allocation19 + $0x398] sm:$0xff] }
 0x2e9   :  { %3262 = vrsqrt.f32 %v470_v43  ;;  %v1052_v43 = vld [vmem:[#allocation19 + $0x140] sm:$0xff]  ;;  %v1135_v41 = vld [vmem:[#allocation19 + $0x3d8] sm:$0xff] }
 0x2ea   :  { %v2715_v45 = vpack.c.bf16 %v1052_v43, %v1044_v42  ;;  %v1124_v42 = vld [vmem:[#allocation19 + $0x380] sm:$0xff] }
 0x2eb   :  { %v1132_v43 = vld [vmem:[#allocation19 + $0x3c0] sm:$0xff] }
 0x2f2   :  { %v3261_v49 = vpop.eup %3260 }
 0x2f3   :  { %v3263_v51 = vpop.eup %3262  ;;  %v484_v52 = vmul.f32 %v3261_v49, %v477_v47  ;;  %v1054_v47 = vld [vmem:[#allocation19 + $0x150] sm:$0xff]  ;;  %v1061_v49 = vld [vmem:[#allocation19 + $0x188] sm:$0xff] }
 0x2f4   :  { %v485_v53 = vmul.f32 %v3263_v51, %v481_v48  ;;  %v2843_v48 = vpack.c.bf16 %v1054_v47, %v1046_v46  ;;  %v1063_v51 = vld [vmem:[#allocation19 + $0x198] sm:$0xff]  ;;  %v1126_v46 = vld [vmem:[#allocation19 + $0x390] sm:$0xff] }
 0x2f5   :  { %v486_v54 = vmul.f32 %v484_v52, %v449_v22  ;;  %v510_v60 = vrot.slane %v484_v52, %v3938_v1  ;;  %v1014_v22 = vld [vmem:[#allocation19 + $0x10] sm:$0xff]  ;;  %v2717_v52 = vpack.c.bf16 %v1069_v50, %v1061_v49  ;;  %v1141_v49 = vld [vmem:[#allocation19 + $0x408] sm:$0xff] }
 0x2f6   :  { %v487_v55 = vmul.f32 %v485_v53, %v450_v23  ;;  %v514_v62 = vrot.slane %v485_v53, %v3938_v1  ;;  %v1022_v23 = vld [vmem:[#allocation19 + $0x50] sm:$0xff]  ;;  %v1071_v53 = vld [vmem:[#allocation19 + $0x1d8] sm:$0xff]  ;;  %v1149_v50 = vld [vmem:[#allocation19 + $0x448] sm:$0xff] }
 0x2f7   :  { %v515_v2 = vmul.f32 %v510_v60, %v430_v7  ;;  %v1023_v7 = vld [vmem:[#allocation19 + $0x58] sm:$0xff]  ;;  %v2835_v24 = vpack.c.bf16 %v1022_v23, %v1014_v22  ;;  %v1070_v60 = vld [vmem:[#allocation19 + $0x1d0] sm:$0xff] }
 0x2f8   :  { %v490_v57 = vcombine.low %v486_v54, %v487_v55  ;;  %v516_v4 = vmul.f32 %v514_v62, %v432_v9  ;;  %v1012_v9 = vld [vmem:[#allocation19] sm:$0xff]  ;;  %v2833_v20 = vpack.c.bf16 %v1023_v7, %v1015_v17  ;;  %v1077_v62 = vld [vmem:[#allocation19 + $0x208] sm:$0xff]  ;;  %v1095_v17 = vld [vmem:[#allocation19 + $0x298] sm:$0xff] }
 0x2f9   :  { %v2707_v21 = vpack.c.bf16 %v1020_v19, %v1012_v9  ;;  %v1060_v54 = vld [vmem:[#allocation19 + $0x180] sm:$0xff]  ;;  %v1103_v7 = vld [vmem:[#allocation19 + $0x2d8] sm:$0xff]  ;;  %v1094_v22 = vld [vmem:[#allocation19 + $0x290] sm:$0xff] }
 0x2fa   :  { %v497_v58 = vrot.slane %v490_v57, %v3948_v56  ;;  %2834 = vmatprep.subr.bf16.mxu1 %v2833_v20  ;;  %v1068_v55 = vld [vmem:[#allocation19 + $0x1c0] sm:$0xff]  ;;  %v2845_v57 = vpack.c.bf16 %v1071_v53, %v1063_v51  ;;  %v2853_v20 = vpack.c.bf16 %v1103_v7, %v1095_v17  ;;  %v1102_v23 = vld [vmem:[#allocation19 + $0x2d0] sm:$0xff]  ;;  %v1143_v51 = vld [vmem:[#allocation19 + $0x418] sm:$0xff] }
 0x2fb   :  { %v1092_v9 = vld [vmem:[#allocation19 + $0x280] sm:$0xff]  ;;  %v1134_v47 = vld [vmem:[#allocation19 + $0x3d0] sm:$0xff]  ;;  %v1151_v53 = vld [vmem:[#allocation19 + $0x458] sm:$0xff] }
 0x2fc   :  { %v504_v61 = vrot.slane %v497_v58, %v3948_v56  ;;  %v2719_v58 = vpack.c.bf16 %v1068_v55, %v1060_v54  ;;  %v1100_v19 = vld [vmem:[#allocation19 + $0x2c0] sm:$0xff]  ;;  %v1175_v17 = vld [vmem:[#allocation19 + $0x518] sm:$0xff] }
 0x2fd   :  { %v1140_v54 = vld [vmem:[#allocation19 + $0x400] sm:$0xff]  ;;  %v1183_v7 = vld [vmem:[#allocation19 + $0x558] sm:$0xff] }
 0x2fe   :  { %v506_v63 = vsub.f32 %v435_v59, %v504_v61  ;;  %v1062_v59 = vld [vmem:[#allocation19 + $0x190] sm:$0xff]  ;;  %v1148_v55 = vld [vmem:[#allocation19 + $0x440] sm:$0xff] }
 0x2ff   :  { %v2847_v61 = vpack.c.bf16 %v1070_v60, %v1062_v59  ;;  %v1142_v59 = vld [vmem:[#allocation19 + $0x410] sm:$0xff] }
 0x300   :  { %v525_v5 = vrot.slane %v506_v63, %v3941_v3  ;;  %v521_v6 = vrot.slane %v506_v63, %v3938_v1  ;;  %v1085_v63 = vld [vmem:[#allocation19 + $0x248] sm:$0xff]  ;;  %v1150_v60 = vld [vmem:[#allocation19 + $0x450] sm:$0xff] }
 0x302   :  { %v529_v8 = vadd.f32 %v525_v5, %v516_v4  ;;  %v528_v10 = vadd.f32 %v521_v6, %v515_v2  ;;  %v1079_v2 = vld [vmem:[#allocation19 + $0x218] sm:$0xff]  ;;  %v2721_v4 = vpack.c.bf16 %v1085_v63, %v1077_v62  ;;  %v1076_v6 = vld [vmem:[#allocation19 + $0x200] sm:$0xff]  ;;  %v1157_v62 = vld [vmem:[#allocation19 + $0x488] sm:$0xff] }
 0x303   :  { %v1087_v5 = vld [vmem:[#allocation19 + $0x258] sm:$0xff]  ;;  %v1165_v63 = vld [vmem:[#allocation19 + $0x4c8] sm:$0xff] }
 0x304   :  { %v531_v11 = vmul.f32 0.2, %v529_v8  ;;  %v530_v12 = vmul.f32 0.2, %v528_v10 }
 0x306   :  { %v533_v13 = vmax.f32 %v529_v8, %v531_v11  ;;  %v532_v14 = vmax.f32 %v528_v10, %v530_v12  ;;  %v1084_v8 = vld [vmem:[#allocation19 + $0x240] sm:$0xff]  ;;  %v2849_v10 = vpack.c.bf16 %v1087_v5, %v1079_v2  ;;  %v1078_v12 = vld [vmem:[#allocation19 + $0x210] sm:$0xff]  ;;  %v1159_v2 = vld [vmem:[#allocation19 + $0x498] sm:$0xff] }
 0x307   :  { %v2723_v11 = vpack.c.bf16 %v1084_v8, %v1076_v6  ;;  %v1167_v5 = vld [vmem:[#allocation19 + $0x4d8] sm:$0xff]  ;;  %v1156_v6 = vld [vmem:[#allocation19 + $0x480] sm:$0xff] }
 0x308   :  { %748 = vmatprep.mubr.f32.mxu0 %v533_v13  ;;  %819 = vmatprep.mubr.f32.mxu1 %v533_v13  ;;  %v1086_v13 = vld [vmem:[#allocation19 + $0x250] sm:$0xff]  ;;  %v1164_v8 = vld [vmem:[#allocation19 + $0x4c0] sm:$0xff] }
 0x309   :  { %749 = vmatmul.mubr.f32.vlgmr.msra.gmra.mrb[2].mxu0 %v532_v14  ;;  %820 = vmatmul.mubr.f32.vlgmr.msra.gmra.mrb[2].mxu1 %v532_v14  ;;  %v2851_v14 = vpack.c.bf16 %v1086_v13, %v1078_v12  ;;  %v1158_v12 = vld [vmem:[#allocation19 + $0x490] sm:$0xff] }
 0x30a   :  { %2708 = vmatpush1.bf16.msra.mxu0 %v2707_v21  ;;  %2836 = vmatpush1.bf16.msra.mxu1 %v2835_v24  ;;  %v2727_v21 = vpack.c.bf16 %v1100_v19, %v1092_v9  ;;  %v2855_v24 = vpack.c.bf16 %v1102_v23, %v1094_v22  ;;  %v1166_v13 = vld [vmem:[#allocation19 + $0x4d0] sm:$0xff]  ;;  %v1172_v9 = vld [vmem:[#allocation19 + $0x500] sm:$0xff] }
 0x30b   :  { %2710 = vmatprep.subr.bf16.mxu0 %v2709_v28  ;;  %2838 = vmatprep.subr.bf16.mxu1 %v2837_v32  ;;  %v2729_v28 = vpack.c.bf16 %v1117_v26, %v1109_v25  ;;  %v2857_v32 = vpack.c.bf16 %v1119_v29, %v1111_v27  ;;  %v1180_v19 = vld [vmem:[#allocation19 + $0x540] sm:$0xff]  ;;  %v1174_v22 = vld [vmem:[#allocation19 + $0x510] sm:$0xff]  ;;  %v1189_v25 = vld [vmem:[#allocation19 + $0x588] sm:$0xff] }
 0x30c   :  { %v1182_v23 = vld [vmem:[#allocation19 + $0x550] sm:$0xff]  ;;  %v1197_v26 = vld [vmem:[#allocation19 + $0x5c8] sm:$0xff]  ;;  %v1191_v27 = vld [vmem:[#allocation19 + $0x598] sm:$0xff] }
 0x30d   :  { %v1199_v29 = vld [vmem:[#allocation19 + $0x5d8] sm:$0xff] }
 0x30e   :  { %2712 = vmatpush1.bf16.msra.mxu0 %v2711_v33  ;;  %2840 = vmatpush1.bf16.msra.mxu1 %v2839_v36  ;;  %v2731_v33 = vpack.c.bf16 %v1116_v31, %v1108_v30  ;;  %v2859_v36 = vpack.c.bf16 %v1118_v35, %v1110_v34  ;;  %v1188_v30 = vld [vmem:[#allocation19 + $0x580] sm:$0xff]  ;;  %v1190_v34 = vld [vmem:[#allocation19 + $0x590] sm:$0xff] }
 0x30f   :  { %2714 = vmatprep.subr.bf16.mxu0 %v2713_v40  ;;  %2842 = vmatprep.subr.bf16.mxu1 %v2841_v44  ;;  %v2733_v40 = vpack.c.bf16 %v1133_v38, %v1125_v37  ;;  %v2861_v44 = vpack.c.bf16 %v1135_v41, %v1127_v39  ;;  %v1196_v31 = vld [vmem:[#allocation19 + $0x5c0] sm:$0xff]  ;;  %v1198_v35 = vld [vmem:[#allocation19 + $0x5d0] sm:$0xff]  ;;  %v1205_v37 = vld [vmem:[#allocation19 + $0x608] sm:$0xff] }
 0x310   :  { %v1213_v38 = vld [vmem:[#allocation19 + $0x648] sm:$0xff]  ;;  %v1207_v39 = vld [vmem:[#allocation19 + $0x618] sm:$0xff] }
 0x311   :  { %v1215_v41 = vld [vmem:[#allocation19 + $0x658] sm:$0xff] }
 0x312   :  { %2716 = vmatpush1.bf16.msra.mxu0 %v2715_v45  ;;  %2844 = vmatpush1.bf16.msra.mxu1 %v2843_v48  ;;  %v2735_v45 = vpack.c.bf16 %v1132_v43, %v1124_v42  ;;  %v2863_v48 = vpack.c.bf16 %v1134_v47, %v1126_v46  ;;  %v1204_v42 = vld [vmem:[#allocation19 + $0x600] sm:$0xff]  ;;  %v1206_v46 = vld [vmem:[#allocation19 + $0x610] sm:$0xff] }
 0x313   :  { %2718 = vmatprep.subr.bf16.mxu0 %v2717_v52  ;;  %2846 = vmatprep.subr.bf16.mxu1 %v2845_v57  ;;  %v2737_v52 = vpack.c.bf16 %v1149_v50, %v1141_v49  ;;  %v2865_v57 = vpack.c.bf16 %v1151_v53, %v1143_v51  ;;  %v1212_v43 = vld [vmem:[#allocation19 + $0x640] sm:$0xff]  ;;  %v1214_v47 = vld [vmem:[#allocation19 + $0x650] sm:$0xff]  ;;  %v1221_v49 = vld [vmem:[#allocation19 + $0x688] sm:$0xff] }
 0x314   :  { %v1229_v50 = vld [vmem:[#allocation19 + $0x6c8] sm:$0xff]  ;;  %v1223_v51 = vld [vmem:[#allocation19 + $0x698] sm:$0xff] }
 0x315   :  { %v1231_v53 = vld [vmem:[#allocation19 + $0x6d8] sm:$0xff] }
 0x316   :  { %2720 = vmatpush1.bf16.msra.mxu0 %v2719_v58  ;;  %2848 = vmatpush1.bf16.msra.mxu1 %v2847_v61  ;;  %v2739_v58 = vpack.c.bf16 %v1148_v55, %v1140_v54  ;;  %v2867_v61 = vpack.c.bf16 %v1150_v60, %v1142_v59  ;;  %v1220_v54 = vld [vmem:[#allocation19 + $0x680] sm:$0xff]  ;;  %v1222_v59 = vld [vmem:[#allocation19 + $0x690] sm:$0xff] }
 0x317   :  { %2722 = vmatprep.subr.bf16.mxu0 %v2721_v4  ;;  %2850 = vmatprep.subr.bf16.mxu1 %v2849_v10  ;;  %v2741_v4 = vpack.c.bf16 %v1165_v63, %v1157_v62  ;;  %v2869_v10 = vpack.c.bf16 %v1167_v5, %v1159_v2  ;;  %v1228_v55 = vld [vmem:[#allocation19 + $0x6c0] sm:$0xff]  ;;  %v1230_v60 = vld [vmem:[#allocation19 + $0x6d0] sm:$0xff]  ;;  %v1237_v62 = vld [vmem:[#allocation19 + $0x708] sm:$0xff] }
 0x318   :  { %v1245_v63 = vld [vmem:[#allocation19 + $0x748] sm:$0xff]  ;;  %v1239_v2 = vld [vmem:[#allocation19 + $0x718] sm:$0xff] }
 0x319   :  { %v1247_v5 = vld [vmem:[#allocation19 + $0x758] sm:$0xff] }
 0x31a   :  { %2724 = vmatpush1.bf16.msra.mxu0 %v2723_v11  ;;  %2852 = vmatpush1.bf16.msra.mxu1 %v2851_v14  ;;  %v2743_v11 = vpack.c.bf16 %v1164_v8, %v1156_v6  ;;  %v2871_v14 = vpack.c.bf16 %v1166_v13, %v1158_v12  ;;  %v1236_v6 = vld [vmem:[#allocation19 + $0x700] sm:$0xff]  ;;  %v1238_v12 = vld [vmem:[#allocation19 + $0x710] sm:$0xff] }
 0x31b   :  { %2726 = vmatprep.subr.bf16.mxu0 %v2725_v18  ;;  %2854 = vmatprep.subr.bf16.mxu1 %v2853_v20  ;;  %v2745_v18 = vpack.c.bf16 %v1181_v16, %v1173_v15  ;;  %v2873_v20 = vpack.c.bf16 %v1183_v7, %v1175_v17  ;;  %v1244_v8 = vld [vmem:[#allocation19 + $0x740] sm:$0xff]  ;;  %v1246_v13 = vld [vmem:[#allocation19 + $0x750] sm:$0xff]  ;;  %v1261_v16 = vld [vmem:[#allocation19 + $0x7c8] sm:$0xff] }
 0x31c   :  { %v2891_v15 = vpack.c.bf16 %v1246_v13, %v1238_v12  ;;  %v1255_v17 = vld [vmem:[#allocation19 + $0x798] sm:$0xff] }
 0x31e   :  { %2728 = vmatpush1.bf16.msra.mxu0 %v2727_v21  ;;  %2856 = vmatpush1.bf16.msra.mxu1 %v2855_v24  ;;  %v2747_v21 = vpack.c.bf16 %v1180_v19, %v1172_v9  ;;  %v2875_v24 = vpack.c.bf16 %v1182_v23, %v1174_v22  ;;  %v1252_v19 = vld [vmem:[#allocation19 + $0x780] sm:$0xff]  ;;  %v1262_v23 = vld [vmem:[#allocation19 + $0x7d0] sm:$0xff] }
 0x31f   :  { %2730 = vmatprep.subr.bf16.mxu0 %v2729_v28  ;;  %2858 = vmatprep.subr.bf16.mxu1 %v2857_v32  ;;  %v2749_v28 = vpack.c.bf16 %v1197_v26, %v1189_v25  ;;  %v2877_v32 = vpack.c.bf16 %v1199_v29, %v1191_v27  ;;  %v1269_v25 = vld [vmem:[#allocation19 + $0x808] sm:$0xff]  ;;  %v1271_v27 = vld [vmem:[#allocation19 + $0x818] sm:$0xff] }
 0x320   :  { %v1277_v26 = vld [vmem:[#allocation19 + $0x848] sm:$0xff]  ;;  %v1279_v29 = vld [vmem:[#allocation19 + $0x858] sm:$0xff] }
 0x322   :  { %2732 = vmatpush1.bf16.msra.mxu0 %v2731_v33  ;;  %2860 = vmatpush1.bf16.msra.mxu1 %v2859_v36  ;;  %v2751_v33 = vpack.c.bf16 %v1196_v31, %v1188_v30  ;;  %v2879_v36 = vpack.c.bf16 %v1198_v35, %v1190_v34  ;;  %v2897_v30 = vpack.c.bf16 %v1279_v29, %v1271_v27  ;;  %v3957_v31 = vsub.s32 2, %v3935_v0 }
 0x323   :  { %2734 = vmatprep.subr.bf16.mxu0 %v2733_v40  ;;  %2862 = vmatprep.subr.bf16.mxu1 %v2861_v44  ;;  %v2753_v40 = vpack.c.bf16 %v1213_v38, %v1205_v37  ;;  %v2881_v44 = vpack.c.bf16 %v1215_v41, %v1207_v39 }
 0x326   :  { %2736 = vmatpush1.bf16.msra.mxu0 %v2735_v45  ;;  %2864 = vmatpush1.bf16.msra.mxu1 %v2863_v48  ;;  %v2755_v45 = vpack.c.bf16 %v1212_v43, %v1204_v42  ;;  %v2883_v48 = vpack.c.bf16 %v1214_v47, %v1206_v46 }
 0x327   :  { %2738 = vmatprep.subr.bf16.mxu0 %v2737_v52  ;;  %2866 = vmatprep.subr.bf16.mxu1 %v2865_v57  ;;  %v2757_v52 = vpack.c.bf16 %v1229_v50, %v1221_v49  ;;  %v2885_v57 = vpack.c.bf16 %v1231_v53, %v1223_v51 }
 0x32a   :  { %2740 = vmatpush1.bf16.msra.mxu0 %v2739_v58  ;;  %2868 = vmatpush1.bf16.msra.mxu1 %v2867_v61  ;;  %v2759_v58 = vpack.c.bf16 %v1228_v55, %v1220_v54  ;;  %v2887_v61 = vpack.c.bf16 %v1230_v60, %v1222_v59 }
 0x32b   :  { %2742 = vmatprep.subr.bf16.mxu0 %v2741_v4  ;;  %2870 = vmatprep.subr.bf16.mxu1 %v2869_v10  ;;  %v2761_v4 = vpack.c.bf16 %v1245_v63, %v1237_v62  ;;  %v2889_v10 = vpack.c.bf16 %v1247_v5, %v1239_v2 }
 0x32e   :  { %2744 = vmatpush1.bf16.msra.mxu0 %v2743_v11  ;;  %2872 = vmatpush1.bf16.msra.mxu1 %v2871_v14  ;;  %v2763_v11 = vpack.c.bf16 %v1244_v8, %v1236_v6  ;;  %v1253_v14 = vld [vmem:[#allocation19 + $0x788] sm:$0xff] }
 0x32f   :  { %2746 = vmatprep.subr.bf16.mxu0 %v2745_v18  ;;  %2874 = vmatprep.subr.bf16.mxu1 %v2873_v20  ;;  %v1263_v18 = vld [vmem:[#allocation19 + $0x7d8] sm:$0xff]  ;;  %v2765_v7 = vpack.c.bf16 %v1261_v16, %v1253_v14  ;;  %v1260_v20 = vld [vmem:[#allocation19 + $0x7c0] sm:$0xff] }
 0x330   :  { %v2893_v9 = vpack.c.bf16 %v1263_v18, %v1255_v17  ;;  %v2767_v22 = vpack.c.bf16 %v1260_v20, %v1252_v19 }
 0x332   :  { %2748 = vmatpush1.bf16.msra.mxu0 %v2747_v21  ;;  %2876 = vmatpush1.bf16.msra.mxu1 %v2875_v24  ;;  %v1254_v21 = vld [vmem:[#allocation19 + $0x790] sm:$0xff] }
 0x333   :  { %2750 = vmatprep.subr.bf16.mxu0 %v2749_v28  ;;  %2878 = vmatprep.subr.bf16.mxu1 %v2877_v32  ;;  %v2895_v24 = vpack.c.bf16 %v1262_v23, %v1254_v21  ;;  %v2769_v28 = vpack.c.bf16 %v1277_v26, %v1269_v25  ;;  %v662_v32 = vld [vmem:[#allocation15] sm:$0xf] }
 0x334   :  { %v667_v34 = vrot.slane %v662_v32, %v3938_v1  ;;  %v675_v35 = vrot.slane %v662_v32, %v3957_v31 }
 0x336   :  { %2752 = vmatpush1.bf16.msra.mxu0 %v2751_v33  ;;  %2880 = vmatpush1.bf16.msra.mxu1 %v2879_v36  ;;  %v3960_v33 = vsub.s32 3, %v3935_v0  ;;  %v671_v36 = vrot.slane %v662_v32, %v3941_v3 }
 0x337   :  { %2754 = vmatprep.subr.bf16.mxu0 %v2753_v40  ;;  %2882 = vmatprep.subr.bf16.mxu1 %v2881_v44 }
 0x338   :  { %v679_v37 = vrot.slane %v662_v32, %v3960_v33 }
 0x33a   :  { %2756 = vmatpush1.bf16.msra.mxu0 %v2755_v45  ;;  %2884 = vmatpush1.bf16.msra.mxu1 %v2883_v48 }
 0x33b   :  { %2758 = vmatprep.subr.bf16.mxu0 %v2757_v52  ;;  %2886 = vmatprep.subr.bf16.mxu1 %v2885_v57 }
 0x33e   :  { %2760 = vmatpush1.bf16.msra.mxu0 %v2759_v58  ;;  %2888 = vmatpush1.bf16.msra.mxu1 %v2887_v61 }
 0x33f   :  { %2762 = vmatprep.subr.bf16.mxu0 %v2761_v4  ;;  %2890 = vmatprep.subr.bf16.mxu1 %v2889_v10 }
 0x342   :  { %2764 = vmatpush1.bf16.msra.mxu0 %v2763_v11  ;;  %2892 = vmatpush1.bf16.msra.mxu1 %v2891_v15 }
 0x343   :  { %2766 = vmatprep.subr.bf16.mxu0 %v2765_v7  ;;  %2894 = vmatprep.subr.bf16.mxu1 %v2893_v9 }
 0x346   :  { %2768 = vmatpush1.bf16.msra.mxu0 %v2767_v22  ;;  %2896 = vmatpush1.bf16.msra.mxu1 %v2895_v24 }
 0x347   :  { %2770 = vmatprep.subr.bf16.mxu0 %v2769_v28  ;;  %2898 = vmatprep.subr.bf16.mxu1 %v2897_v30 }
 0x3dc   :  { %v750_v38 = vpop.f32.mrb[2].mxu0  ;;  %v821_v39 = vpop.f32.mrb[2].mxu1 }
 0x3dd   :  { %v3966_v40 = vadd.f32 %v750_v38, %v667_v34  ;;  %v3968_v41 = vadd.f32 %v821_v39, %v675_v35  ;;  %v752_v42 = vpop.f32.mrb[3].mxu0  ;;  %v823_v43 = vpop.f32.mrb[3].mxu1 }
 0x3de   :  { %v3970_v44 = vadd.f32 %v752_v42, %v671_v36  ;;  %v3972_v45 = vadd.f32 %v823_v43, %v679_v37 }
 0x3df   :  { %v828_v46 = vrot.slane %v3966_v40, 4  ;;  %v840_v47 = vrot.slane %v3968_v41, 4 }
 0x3e0   :  { %v834_v48 = vrot.slane %v3970_v44, 4  ;;  %v846_v49 = vrot.slane %v3972_v45, 4 }
 0x3e1   :  { %v829_v50 = vadd.f32 %v828_v46, %v3966_v40  ;;  %v841_v51 = vadd.f32 %v840_v47, %v3968_v41 }
 0x3e2   :  { %v835_v52 = vadd.f32 %v834_v48, %v3970_v44  ;;  %v847_v53 = vadd.f32 %v846_v49, %v3972_v45 }
 0x3e3   :  { %v830_v54 = vrot.slane %v829_v50, 2  ;;  %v842_v55 = vrot.slane %v841_v51, 2 }
 0x3e4   :  { %v836_v57 = vrot.slane %v835_v52, 2  ;;  %v848_v58 = vrot.slane %v847_v53, 2 }
 0x3e5   :  { %v831_v59 = vadd.f32 %v830_v54, %v829_v50  ;;  %v843_v60 = vadd.f32 %v842_v55, %v841_v51 }
 0x3e6   :  { %v837_v61 = vadd.f32 %v836_v57, %v835_v52  ;;  %v849_v62 = vadd.f32 %v848_v58, %v847_v53 }
 0x3e7   :  { %v832_v63 = vrot.slane %v831_v59, 1  ;;  %v844_v2 = vrot.slane %v843_v60, 1 }
 0x3e8   :  { %v838_v4 = vrot.slane %v837_v61, 1  ;;  %v850_v5 = vrot.slane %v849_v62, 1 }
 0x3e9   :  { %v833_v6 = vadd.f32 %v832_v63, %v831_v59  ;;  %v845_v8 = vadd.f32 %v844_v2, %v843_v60 }
 0x3ea   :  { %v839_v10 = vadd.f32 %v838_v4, %v837_v61  ;;  %v851_v11 = vadd.f32 %v850_v5, %v849_v62  ;;  %v826_v61 = vld [vmem:[#allocation16] sm:$0xf] }
 0x3eb   :  { %v852_v12 = vmul.f32 0.125, %v833_v6  ;;  %v854_v13 = vmul.f32 0.125, %v845_v8  ;;  %v904_v62 = vrot.slane %v826_v61, %v3938_v1  ;;  %v912_v63 = vrot.slane %v826_v61, %v3957_v31 }
 0x3ec   :  { %v853_v14 = vmul.f32 0.125, %v839_v10  ;;  %v3982_v15 = vmul.f32 0.125, %v851_v11  ;;  %v908_v2 = vrot.slane %v826_v61, %v3941_v3  ;;  %v916_v5 = vrot.slane %v826_v61, %v3960_v33  ;;  %v1286_v61 = vld [vmem:[#allocation19 + $0x890] sm:$0xff] }
 0x3ed   :  { %v856_v16 = vsub.f32 %v3966_v40, %v852_v12  ;;  %v858_v17 = vsub.f32 %v3968_v41, %v854_v13 }
 0x3ee   :  { %v857_v18 = vsub.f32 %v3970_v44, %v853_v14  ;;  %v859_v7 = vsub.f32 %v3972_v45, %v3982_v15 }
 0x3ef   :  { %v860_v9 = vmul.f32 %v856_v16, %v856_v16  ;;  %v862_v19 = vmul.f32 %v858_v17, %v858_v17 }
 0x3f0   :  { %v861_v20 = vmul.f32 %v857_v18, %v857_v18  ;;  %v863_v21 = vmul.f32 %v859_v7, %v859_v7 }
 0x3f1   :  { %v864_v22 = vrot.slane %v860_v9, 4  ;;  %v876_v23 = vrot.slane %v862_v19, 4 }
 0x3f2   :  { %v870_v24 = vrot.slane %v861_v20, 4  ;;  %v882_v25 = vrot.slane %v863_v21, 4 }
 0x3f3   :  { %v865_v26 = vadd.f32 %v864_v22, %v860_v9  ;;  %v877_v27 = vadd.f32 %v876_v23, %v862_v19 }
 0x3f4   :  { %v871_v28 = vadd.f32 %v870_v24, %v861_v20  ;;  %v883_v29 = vadd.f32 %v882_v25, %v863_v21 }
 0x3f5   :  { %v866_v30 = vrot.slane %v865_v26, 2  ;;  %v878_v32 = vrot.slane %v877_v27, 2 }
 0x3f6   :  { %v872_v34 = vrot.slane %v871_v28, 2  ;;  %v884_v35 = vrot.slane %v883_v29, 2 }
 0x3f7   :  { %v867_v36 = vadd.f32 %v866_v30, %v865_v26  ;;  %v879_v37 = vadd.f32 %v878_v32, %v877_v27 }
 0x3f8   :  { %v873_v38 = vadd.f32 %v872_v34, %v871_v28  ;;  %v885_v39 = vadd.f32 %v884_v35, %v883_v29  ;;  %v827_v29 = vld [vmem:[#allocation18] sm:$0xf] }
 0x3f9   :  { %v868_v42 = vrot.slane %v867_v36, 1  ;;  %v880_v43 = vrot.slane %v879_v37, 1 }
 0x3fa   :  { %v874_v46 = vrot.slane %v873_v38, 1  ;;  %v886_v47 = vrot.slane %v885_v39, 1 }
 0x3fb   :  { %v869_v48 = vadd.f32 %v868_v42, %v867_v36  ;;  %v881_v49 = vadd.f32 %v880_v43, %v879_v37  ;;  %v1268_v42 = vld [vmem:[#allocation19 + $0x800] sm:$0xff] }
 0x3fc   :  { %v875_v50 = vadd.f32 %v874_v46, %v873_v38  ;;  %v887_v51 = vadd.f32 %v886_v47, %v885_v39  ;;  %v1276_v47 = vld [vmem:[#allocation19 + $0x840] sm:$0xff] }
 0x3fd   :  { %v888_v52 = vmul.f32 0.125, %v869_v48  ;;  %v890_v53 = vmul.f32 0.125, %v881_v49  ;;  %v1278_v48 = vld [vmem:[#allocation19 + $0x850] sm:$0xff] }
 0x3fe   :  { %v889_v54 = vmul.f32 0.125, %v875_v50  ;;  %v891_v55 = vmul.f32 0.125, %v887_v51  ;;  %v1293_v51 = vld [vmem:[#allocation19 + $0x8c8] sm:$0xff] }
 0x3ff   :  { %v892_v57 = vadd.f32 0.8, %v888_v52  ;;  %v894_v58 = vadd.f32 0.8, %v890_v53  ;;  %v1287_v52 = vld [vmem:[#allocation19 + $0x898] sm:$0xff] }
 0x400   :  { %v893_v59 = vadd.f32 0.8, %v889_v54  ;;  %v895_v60 = vadd.f32 0.8, %v891_v55  ;;  %v1295_v53 = vld [vmem:[#allocation19 + $0x8d8] sm:$0xff] }
 0x401   :  { %3264 = vrsqrt.f32 %v892_v57  ;;  %v2771_v57 = vpack.c.bf16 %v1276_v47, %v1268_v42  ;;  %v1334_v42 = vld [vmem:[#allocation19 + $0xa10] sm:$0xff]  ;;  %v1349_v47 = vld [vmem:[#allocation19 + $0xa88] sm:$0xff] }
 0x402   :  { %3266 = vrsqrt.f32 %v894_v58 }
 0x403   :  { %3268 = vrsqrt.f32 %v893_v59  ;;  %v1284_v59 = vld [vmem:[#allocation19 + $0x880] sm:$0xff] }
 0x404   :  { %3270 = vrsqrt.f32 %v895_v60  ;;  %v1292_v60 = vld [vmem:[#allocation19 + $0x8c0] sm:$0xff] }
 0x40b   :  { %v3265_v4 = vpop.eup %3264 }
 0x40c   :  { %v3267_v6 = vpop.eup %3266  ;;  %v921_v8 = vmul.f32 %v3265_v4, %v904_v62  ;;  %v1294_v62 = vld [vmem:[#allocation19 + $0x8d0] sm:$0xff]  ;;  %v2901_v4 = vpack.c.bf16 %v1295_v53, %v1287_v52 }
 0x40d   :  { %v3269_v10 = vpop.eup %3268  ;;  %v923_v11 = vmul.f32 %v3267_v6, %v912_v63  ;;  %v1301_v63 = vld [vmem:[#allocation19 + $0x908] sm:$0xff]  ;;  %v1303_v6 = vld [vmem:[#allocation19 + $0x918] sm:$0xff] }
 0x40e   :  { %v3271_v16 = vpop.eup %3270  ;;  %v925_v17 = vmul.f32 %v921_v8, %v852_v12  ;;  %v922_v18 = vmul.f32 %v3269_v10, %v908_v2  ;;  %v962_v28 = vrot.slane %v921_v8, %v3938_v1  ;;  %v1311_v8 = vld [vmem:[#allocation19 + $0x958] sm:$0xff] }
 0x40f   :  { %v927_v7 = vmul.f32 %v923_v11, %v854_v13  ;;  %v970_v9 = vrot.slane %v923_v11, %v3938_v1  ;;  %v924_v19 = vmul.f32 %v3271_v16, %v916_v5  ;;  %v1309_v5 = vld [vmem:[#allocation19 + $0x948] sm:$0xff]  ;;  %v2775_v11 = vpack.c.bf16 %v1292_v60, %v1284_v59 }
 0x410   :  { %v926_v20 = vmul.f32 %v922_v18, %v853_v14  ;;  %v966_v12 = vrot.slane %v922_v18, %v3938_v1  ;;  %v2903_v16 = vpack.c.bf16 %v1294_v62, %v1286_v61  ;;  %v1308_v18 = vld [vmem:[#allocation19 + $0x940] sm:$0xff]  ;;  %v1365_v59 = vld [vmem:[#allocation19 + $0xb08] sm:$0xff]  ;;  %v1367_v61 = vld [vmem:[#allocation19 + $0xb18] sm:$0xff] }
 0x411   :  { %v977_v21 = vmul.f32 %v970_v9, %v3968_v41  ;;  %v928_v22 = vmul.f32 %v924_v19, %v3982_v15  ;;  %v974_v13 = vrot.slane %v924_v19, %v3938_v1  ;;  %v975_v41 = vmul.f32 %v962_v28, %v3966_v40  ;;  %v1270_v40 = vld [vmem:[#allocation19 + $0x810] sm:$0xff]  ;;  %v1324_v28 = vld [vmem:[#allocation19 + $0x9c0] sm:$0xff]  ;;  %v1373_v60 = vld [vmem:[#allocation19 + $0xb48] sm:$0xff] }
 0x412   :  { %v933_v23 = vcombine.low %v925_v17, %v926_v20  ;;  %v976_v15 = vmul.f32 %v966_v12, %v3970_v44  ;;  %v2899_v58 = vpack.c.bf16 %v1278_v48, %v1270_v40  ;;  %v1300_v17 = vld [vmem:[#allocation19 + $0x900] sm:$0xff]  ;;  %v2905_v9 = vpack.c.bf16 %v1311_v8, %v1303_v6  ;;  %v1302_v19 = vld [vmem:[#allocation19 + $0x910] sm:$0xff]  ;;  %v1357_v40 = vld [vmem:[#allocation19 + $0xac8] sm:$0xff] }
 0x413   :  { %v934_v24 = vcombine.low %v927_v7, %v928_v22  ;;  %v978_v32 = vmul.f32 %v974_v13, %v3972_v45  ;;  %v1285_v45 = vld [vmem:[#allocation19 + $0x888] sm:$0xff]  ;;  %v2777_v7 = vpack.c.bf16 %v1309_v5, %v1301_v63  ;;  %v1310_v20 = vld [vmem:[#allocation19 + $0x950] sm:$0xff]  ;;  %v1351_v48 = vld [vmem:[#allocation19 + $0xa98] sm:$0xff]  ;;  %v2789_v52 = vpack.c.bf16 %v1357_v40, %v1349_v47 }
 0x414   :  { %v941_v25 = vrot.slane %v933_v23, %v3948_v56  ;;  %v2773_v2 = vpack.c.bf16 %v1293_v51, %v1285_v45  ;;  %v1325_v22 = vld [vmem:[#allocation19 + $0x9c8] sm:$0xff]  ;;  %v1319_v23 = vld [vmem:[#allocation19 + $0x998] sm:$0xff]  ;;  %v1356_v51 = vld [vmem:[#allocation19 + $0xac0] sm:$0xff]  ;;  %v2793_v6 = vpack.c.bf16 %v1373_v60, %v1365_v59 }
 0x415   :  { %v948_v26 = vrot.slane %v934_v24, %v3948_v56  ;;  %v1327_v24 = vld [vmem:[#allocation19 + $0x9d8] sm:$0xff]  ;;  %v1372_v5 = vld [vmem:[#allocation19 + $0xb40] sm:$0xff] }
 0x416   :  { %v2909_v13 = vpack.c.bf16 %v1327_v24, %v1319_v23  ;;  %v1375_v62 = vld [vmem:[#allocation19 + $0xb58] sm:$0xff]  ;;  %v1412_v47 = vld [vmem:[#allocation19 + $0xc80] sm:$0xff] }
 0x417   :  { %v949_v27 = vcombine.low %v941_v25, %v948_v26  ;;  %v2779_v25 = vpack.c.bf16 %v1308_v18, %v1300_v17  ;;  %v2907_v26 = vpack.c.bf16 %v1310_v20, %v1302_v19  ;;  %v2921_v8 = vpack.c.bf16 %v1375_v62, %v1367_v61  ;;  %v1381_v17 = vld [vmem:[#allocation19 + $0xb88] sm:$0xff]  ;;  %v1420_v40 = vld [vmem:[#allocation19 + $0xcc0] sm:$0xff] }
 0x418   :  { %v1389_v18 = vld [vmem:[#allocation19 + $0xbc8] sm:$0xff]  ;;  %v1428_v59 = vld [vmem:[#allocation19 + $0xd00] sm:$0xff] }
 0x419   :  { %v956_v14 = vrot.slane %v949_v27, %v3948_v56  ;;  %v1316_v27 = vld [vmem:[#allocation19 + $0x980] sm:$0xff]  ;;  %v2797_v23 = vpack.c.bf16 %v1389_v18, %v1381_v17 }
 0x41a   :  { %v1436_v60 = vld [vmem:[#allocation19 + $0xd40] sm:$0xff] }
 0x41b   :  { %v958_v30 = vsub.f32 %v827_v29, %v956_v14  ;;  %v1318_v29 = vld [vmem:[#allocation19 + $0x990] sm:$0xff]  ;;  %v1444_v17 = vld [vmem:[#allocation19 + $0xd80] sm:$0xff] }
 0x41c   :  { %v1326_v14 = vld [vmem:[#allocation19 + $0x9d0] sm:$0xff]  ;;  %v1452_v18 = vld [vmem:[#allocation19 + $0xdc0] sm:$0xff] }
 0x41d   :  { %v987_v34 = vrot.slane %v958_v30, %v3941_v3  ;;  %v983_v35 = vrot.slane %v958_v30, %v3938_v1  ;;  %v995_v36 = vrot.slane %v958_v30, %v3960_v33  ;;  %v991_v37 = vrot.slane %v958_v30, %v3957_v31  ;;  %v1333_v30 = vld [vmem:[#allocation19 + $0xa08] sm:$0xff] }
 0x41f   :  { %v1001_v38 = vadd.f32 %v987_v34, %v976_v15  ;;  %v1000_v39 = vadd.f32 %v983_v35, %v975_v41  ;;  %v1003_v43 = vadd.f32 %v995_v36, %v978_v32  ;;  %v4009_v46 = vadd.f32 %v991_v37, %v977_v21  ;;  %v1317_v21 = vld [vmem:[#allocation19 + $0x988] sm:$0xff]  ;;  %v1335_v15 = vld [vmem:[#allocation19 + $0xa18] sm:$0xff]  ;;  %v1332_v36 = vld [vmem:[#allocation19 + $0xa00] sm:$0xff] }
 0x420   :  { %v2781_v12 = vpack.c.bf16 %v1325_v22, %v1317_v21  ;;  %v1341_v41 = vld [vmem:[#allocation19 + $0xa48] sm:$0xff]  ;;  %v1343_v32 = vld [vmem:[#allocation19 + $0xa58] sm:$0xff]  ;;  %v2783_v34 = vpack.c.bf16 %v1324_v28, %v1316_v27  ;;  %v2911_v35 = vpack.c.bf16 %v1326_v14, %v1318_v29  ;;  %v1340_v37 = vld [vmem:[#allocation19 + $0xa40] sm:$0xff] }
 0x421   :  { %v1005_v44 = vmul.f32 0.2, %v1001_v38  ;;  %v1004_v49 = vmul.f32 0.2, %v1000_v39  ;;  %v1007_v50 = vmul.f32 0.2, %v1003_v43 }
 0x422   :  { %v1380_v21 = vld [vmem:[#allocation19 + $0xb80] sm:$0xff]  ;;  %v1397_v27 = vld [vmem:[#allocation19 + $0xc08] sm:$0xff] }
 0x423   :  { %v4011_v54 = vmax.f32 %v1001_v38, %v1005_v44  ;;  %v4013_v55 = vmax.f32 %v1000_v39, %v1004_v49  ;;  %v4019_v10 = vmax.f32 %v1003_v43, %v1007_v50  ;;  %v2785_v38 = vpack.c.bf16 %v1341_v41, %v1333_v30  ;;  %v1342_v43 = vld [vmem:[#allocation19 + $0xa50] sm:$0xff]  ;;  %v1359_v44 = vld [vmem:[#allocation19 + $0xad8] sm:$0xff]  ;;  %v1348_v50 = vld [vmem:[#allocation19 + $0xa80] sm:$0xff] }
 0x424   :  { %v2913_v39 = vpack.c.bf16 %v1343_v32, %v1335_v15  ;;  %v2787_v49 = vpack.c.bf16 %v1340_v37, %v1332_v36  ;;  %v2915_v45 = vpack.c.bf16 %v1342_v43, %v1334_v42  ;;  %v2917_v53 = vpack.c.bf16 %v1359_v44, %v1351_v48  ;;  %v1388_v22 = vld [vmem:[#allocation19 + $0xbc0] sm:$0xff]  ;;  %v1405_v28 = vld [vmem:[#allocation19 + $0xc48] sm:$0xff] }
 0x425   :  { %1630 = vmatprep.mubr.f32.mxu0 %v4011_v54  ;;  %1772 = vmatprep.mubr.f32.mxu1 %v4011_v54  ;;  %v2791_v63 = vpack.c.bf16 %v1356_v51, %v1348_v50  ;;  %v2799_v29 = vpack.c.bf16 %v1388_v22, %v1380_v21  ;;  %v1396_v30 = vld [vmem:[#allocation19 + $0xc00] sm:$0xff]  ;;  %v2801_v15 = vpack.c.bf16 %v1405_v28, %v1397_v27  ;;  %v1413_v36 = vld [vmem:[#allocation19 + $0xc88] sm:$0xff] }
 0x426   :  { %1631 = vmatmul.mubr.f32.vlgmr.msra.gmra.mrb[4].mxu0 %v4013_v55  ;;  %1773 = vmatmul.mubr.f32.vlgmr.msra.gmra.mrb[4].mxu1 %v4013_v55  ;;  %v1404_v41 = vld [vmem:[#allocation19 + $0xc40] sm:$0xff]  ;;  %v1421_v37 = vld [vmem:[#allocation19 + $0xcc8] sm:$0xff] }
 0x427   :  { %2772 = vmatpush1.bf16.msra.mxu0 %v2771_v57  ;;  %2900 = vmatpush1.bf16.msra.mxu1 %v2899_v58  ;;  %v1350_v57 = vld [vmem:[#allocation19 + $0xa90] sm:$0xff]  ;;  %v2803_v42 = vpack.c.bf16 %v1404_v41, %v1396_v30  ;;  %v2805_v48 = vpack.c.bf16 %v1421_v37, %v1413_v36  ;;  %v1429_v50 = vld [vmem:[#allocation19 + $0xd08] sm:$0xff]  ;;  %v1460_v27 = vld [vmem:[#allocation19 + $0xe00] sm:$0xff] }
 0x428   :  { %1701 = vmatprep.mubr.f32.mxu0 %v4019_v10  ;;  %1843 = vmatprep.mubr.f32.mxu1 %v4019_v10  ;;  %v1358_v58 = vld [vmem:[#allocation19 + $0xad0] sm:$0xff]  ;;  %v1437_v51 = vld [vmem:[#allocation19 + $0xd48] sm:$0xff]  ;;  %v1468_v28 = vld [vmem:[#allocation19 + $0xe40] sm:$0xff] }
 0x429   :  { %2774 = vmatprep.subr.bf16.mxu0 %v2773_v2  ;;  %2902 = vmatprep.subr.bf16.mxu1 %v2901_v4  ;;  %v2919_v2 = vpack.c.bf16 %v1358_v58, %v1350_v57  ;;  %v1364_v4 = vld [vmem:[#allocation19 + $0xb00] sm:$0xff]  ;;  %v2807_v57 = vpack.c.bf16 %v1420_v40, %v1412_v47  ;;  %v2809_v61 = vpack.c.bf16 %v1437_v51, %v1429_v50  ;;  %v1461_v21 = vld [vmem:[#allocation19 + $0xe08] sm:$0xff] }
 0x42a   :  { %v2795_v19 = vpack.c.bf16 %v1372_v5, %v1364_v4  ;;  %v1445_v4 = vld [vmem:[#allocation19 + $0xd88] sm:$0xff]  ;;  %v1476_v36 = vld [vmem:[#allocation19 + $0xe80] sm:$0xff] }
 0x42b   :  { %2776 = vmatpush1.bf16.msra.mxu0 %v2775_v11  ;;  %2904 = vmatpush1.bf16.msra.mxu1 %v2903_v16  ;;  %v1366_v11 = vld [vmem:[#allocation19 + $0xb10] sm:$0xff]  ;;  %v1453_v5 = vld [vmem:[#allocation19 + $0xdc8] sm:$0xff]  ;;  %v1484_v37 = vld [vmem:[#allocation19 + $0xec0] sm:$0xff] }
 0x42c   :  { %2778 = vmatprep.subr.bf16.mxu0 %v2777_v7  ;;  %2906 = vmatprep.subr.bf16.mxu1 %v2905_v9  ;;  %v1374_v16 = vld [vmem:[#allocation19 + $0xb50] sm:$0xff]  ;;  %v1383_v7 = vld [vmem:[#allocation19 + $0xb98] sm:$0xff]  ;;  %v1469_v22 = vld [vmem:[#allocation19 + $0xe48] sm:$0xff] }
 0x42d   :  { %v1391_v9 = vld [vmem:[#allocation19 + $0xbd8] sm:$0xff]  ;;  %v2923_v20 = vpack.c.bf16 %v1374_v16, %v1366_v11  ;;  %v2811_v11 = vpack.c.bf16 %v1436_v60, %v1428_v59  ;;  %v1477_v30 = vld [vmem:[#allocation19 + $0xe88] sm:$0xff]  ;;  %v1492_v50 = vld [vmem:[#allocation19 + $0xf00] sm:$0xff] }
 0x42e   :  { %v2925_v24 = vpack.c.bf16 %v1391_v9, %v1383_v7  ;;  %v2813_v7 = vpack.c.bf16 %v1453_v5, %v1445_v4  ;;  %v1485_v41 = vld [vmem:[#allocation19 + $0xec8] sm:$0xff]  ;;  %v1500_v51 = vld [vmem:[#allocation19 + $0xf40] sm:$0xff] }
 0x42f   :  { %2780 = vmatpush1.bf16.msra.mxu0 %v2779_v25  ;;  %2908 = vmatpush1.bf16.msra.mxu1 %v2907_v26  ;;  %v1382_v25 = vld [vmem:[#allocation19 + $0xb90] sm:$0xff]  ;;  %v1493_v47 = vld [vmem:[#allocation19 + $0xf08] sm:$0xff]  ;;  %v1508_v4 = vld [vmem:[#allocation19 + $0xf80] sm:$0xff] }
 0x430   :  { %2782 = vmatprep.subr.bf16.mxu0 %v2781_v12  ;;  %2910 = vmatprep.subr.bf16.mxu1 %v2909_v13  ;;  %v1390_v26 = vld [vmem:[#allocation19 + $0xbd0] sm:$0xff]  ;;  %v1399_v12 = vld [vmem:[#allocation19 + $0xc18] sm:$0xff]  ;;  %v1501_v40 = vld [vmem:[#allocation19 + $0xf48] sm:$0xff] }
 0x431   :  { %v1407_v13 = vld [vmem:[#allocation19 + $0xc58] sm:$0xff]  ;;  %v2927_v14 = vpack.c.bf16 %v1390_v26, %v1382_v25  ;;  %v2815_v25 = vpack.c.bf16 %v1452_v18, %v1444_v17  ;;  %v1509_v59 = vld [vmem:[#allocation19 + $0xf88] sm:$0xff]  ;;  %v1516_v5 = vld [vmem:[#allocation19 + $0xfc0] sm:$0xff] }
 0x432   :  { %v2929_v32 = vpack.c.bf16 %v1407_v13, %v1399_v12  ;;  %v2817_v12 = vpack.c.bf16 %v1469_v22, %v1461_v21  ;;  %v1517_v60 = vld [vmem:[#allocation19 + $0xfc8] sm:$0xff]  ;;  %v1006_v21 = vmul.f32 0.2, %v4009_v46 }
 0x433   :  { %2784 = vmatpush1.bf16.msra.mxu0 %v2783_v34  ;;  %2912 = vmatpush1.bf16.msra.mxu1 %v2911_v35  ;;  %v1398_v34 = vld [vmem:[#allocation19 + $0xc10] sm:$0xff]  ;;  %v1017_v17 = vld [vmem:[#allocation19 + $0x28] sm:$0xff] }
 0x434   :  { %2786 = vmatprep.subr.bf16.mxu0 %v2785_v38  ;;  %2914 = vmatprep.subr.bf16.mxu1 %v2913_v39  ;;  %v1406_v35 = vld [vmem:[#allocation19 + $0xc50] sm:$0xff]  ;;  %v1415_v38 = vld [vmem:[#allocation19 + $0xc98] sm:$0xff]  ;;  %v1025_v18 = vld [vmem:[#allocation19 + $0x68] sm:$0xff] }
 0x435   :  { %v1423_v39 = vld [vmem:[#allocation19 + $0xcd8] sm:$0xff]  ;;  %v2931_v43 = vpack.c.bf16 %v1406_v35, %v1398_v34  ;;  %v2819_v34 = vpack.c.bf16 %v1468_v28, %v1460_v27  ;;  %v2961_v22 = vpack.c.bf16 %v1025_v18, %v1017_v17  ;;  %v1026_v27 = vld [vmem:[#allocation19 + $0x70] sm:$0xff]  ;;  %v1033_v28 = vld [vmem:[#allocation19 + $0xa8] sm:$0xff] }
 0x436   :  { %v2933_v44 = vpack.c.bf16 %v1423_v39, %v1415_v38  ;;  %v2821_v38 = vpack.c.bf16 %v1485_v41, %v1477_v30  ;;  %v4025_v30 = vmax.f32 %v4009_v46, %v1006_v21  ;;  %v1080_v18 = vld [vmem:[#allocation19 + $0x220] sm:$0xff]  ;;  %v1097_v21 = vld [vmem:[#allocation19 + $0x2a8] sm:$0xff] }
 0x437   :  { %2788 = vmatpush1.bf16.msra.mxu0 %v2787_v49  ;;  %2916 = vmatpush1.bf16.msra.mxu1 %v2915_v45  ;;  %v1414_v49 = vld [vmem:[#allocation19 + $0xc90] sm:$0xff] }
 0x438   :  { %2790 = vmatprep.subr.bf16.mxu0 %v2789_v52  ;;  %2918 = vmatprep.subr.bf16.mxu1 %v2917_v53  ;;  %v1422_v45 = vld [vmem:[#allocation19 + $0xcd0] sm:$0xff]  ;;  %v1431_v52 = vld [vmem:[#allocation19 + $0xd18] sm:$0xff] }
 0x439   :  { %v1439_v53 = vld [vmem:[#allocation19 + $0xd58] sm:$0xff]  ;;  %v2935_v58 = vpack.c.bf16 %v1422_v45, %v1414_v49  ;;  %v2823_v49 = vpack.c.bf16 %v1484_v37, %v1476_v36  ;;  %v1042_v37 = vld [vmem:[#allocation19 + $0xf0] sm:$0xff] }
 0x43a   :  { %v2937_v62 = vpack.c.bf16 %v1439_v53, %v1431_v52  ;;  %v2825_v52 = vpack.c.bf16 %v1501_v40, %v1493_v47 }
 0x43b   :  { %2792 = vmatpush1.bf16.msra.mxu0 %v2791_v63  ;;  %2920 = vmatpush1.bf16.msra.mxu1 %v2919_v2  ;;  %v1430_v63 = vld [vmem:[#allocation19 + $0xd10] sm:$0xff] }
 0x43c   :  { %2794 = vmatprep.subr.bf16.mxu0 %v2793_v6  ;;  %2922 = vmatprep.subr.bf16.mxu1 %v2921_v8  ;;  %v1438_v2 = vld [vmem:[#allocation19 + $0xd50] sm:$0xff]  ;;  %v1447_v6 = vld [vmem:[#allocation19 + $0xd98] sm:$0xff] }
 0x43d   :  { %v1455_v8 = vld [vmem:[#allocation19 + $0xdd8] sm:$0xff]  ;;  %v2939_v16 = vpack.c.bf16 %v1438_v2, %v1430_v63  ;;  %v2827_v63 = vpack.c.bf16 %v1500_v51, %v1492_v50  ;;  %v1058_v50 = vld [vmem:[#allocation19 + $0x170] sm:$0xff]  ;;  %v1065_v51 = vld [vmem:[#allocation19 + $0x1a8] sm:$0xff] }
 0x43e   :  { %v2941_v9 = vpack.c.bf16 %v1455_v8, %v1447_v6  ;;  %v2829_v6 = vpack.c.bf16 %v1517_v60, %v1509_v59 }
 0x43f   :  { %2796 = vmatpush1.bf16.msra.mxu0 %v2795_v19  ;;  %2924 = vmatpush1.bf16.msra.mxu1 %v2923_v20  ;;  %v1446_v19 = vld [vmem:[#allocation19 + $0xd90] sm:$0xff] }
 0x440   :  { %2798 = vmatprep.subr.bf16.mxu0 %v2797_v23  ;;  %2926 = vmatprep.subr.bf16.mxu1 %v2925_v24  ;;  %v1454_v20 = vld [vmem:[#allocation19 + $0xdd0] sm:$0xff]  ;;  %v1463_v23 = vld [vmem:[#allocation19 + $0xe18] sm:$0xff] }
 0x441   :  { %v1471_v24 = vld [vmem:[#allocation19 + $0xe58] sm:$0xff]  ;;  %v2943_v26 = vpack.c.bf16 %v1454_v20, %v1446_v19  ;;  %v2831_v19 = vpack.c.bf16 %v1516_v5, %v1508_v4  ;;  %v1081_v4 = vld [vmem:[#allocation19 + $0x228] sm:$0xff] }
 0x442   :  { %v2945_v13 = vpack.c.bf16 %v1471_v24, %v1463_v23  ;;  %v1016_v24 = vld [vmem:[#allocation19 + $0x20] sm:$0xff]  ;;  %v1089_v5 = vld [vmem:[#allocation19 + $0x268] sm:$0xff] }
 0x443   :  { %2800 = vmatpush1.bf16.msra.mxu0 %v2799_v29  ;;  %2928 = vmatpush1.bf16.msra.mxu1 %v2927_v14  ;;  %v1462_v29 = vld [vmem:[#allocation19 + $0xe10] sm:$0xff]  ;;  %v2977_v17 = vpack.c.bf16 %v1089_v5, %v1081_v4  ;;  %v1144_v4 = vld [vmem:[#allocation19 + $0x420] sm:$0xff] }
 0x444   :  { %2802 = vmatprep.subr.bf16.mxu0 %v2801_v15  ;;  %2930 = vmatprep.subr.bf16.mxu1 %v2929_v32  ;;  %v1470_v14 = vld [vmem:[#allocation19 + $0xe50] sm:$0xff]  ;;  %v1479_v15 = vld [vmem:[#allocation19 + $0xe98] sm:$0xff]  ;;  %v1152_v5 = vld [vmem:[#allocation19 + $0x460] sm:$0xff] }
 0x445   :  { %v1487_v32 = vld [vmem:[#allocation19 + $0xed8] sm:$0xff]  ;;  %v2947_v35 = vpack.c.bf16 %v1470_v14, %v1462_v29 }
 0x446   :  { %v2949_v39 = vpack.c.bf16 %v1487_v32, %v1479_v15  ;;  %v1043_v29 = vld [vmem:[#allocation19 + $0xf8] sm:$0xff]  ;;  %v1032_v15 = vld [vmem:[#allocation19 + $0xa0] sm:$0xff] }
 0x447   :  { %2804 = vmatpush1.bf16.msra.mxu0 %v2803_v42  ;;  %2932 = vmatpush1.bf16.msra.mxu1 %v2931_v43  ;;  %v1478_v42 = vld [vmem:[#allocation19 + $0xe90] sm:$0xff]  ;;  %v1040_v32 = vld [vmem:[#allocation19 + $0xe0] sm:$0xff] }
 0x448   :  { %2806 = vmatprep.subr.bf16.mxu0 %v2805_v48  ;;  %2934 = vmatprep.subr.bf16.mxu1 %v2933_v44  ;;  %v1486_v43 = vld [vmem:[#allocation19 + $0xed0] sm:$0xff]  ;;  %v1495_v48 = vld [vmem:[#allocation19 + $0xf18] sm:$0xff]  ;;  %v2967_v46 = vpack.c.bf16 %v1040_v32, %v1032_v15  ;;  %v1121_v15 = vld [vmem:[#allocation19 + $0x368] sm:$0xff] }
 0x449   :  { %v1503_v44 = vld [vmem:[#allocation19 + $0xf58] sm:$0xff]  ;;  %v2951_v45 = vpack.c.bf16 %v1486_v43, %v1478_v42 }
 0x44a   :  { %v2953_v53 = vpack.c.bf16 %v1503_v44, %v1495_v48  ;;  %v1051_v42 = vld [vmem:[#allocation19 + $0x138] sm:$0xff]  ;;  %v1048_v48 = vld [vmem:[#allocation19 + $0x120] sm:$0xff] }
 0x44b   :  { %2808 = vmatpush1.bf16.msra.mxu0 %v2807_v57  ;;  %2936 = vmatpush1.bf16.msra.mxu1 %v2935_v58  ;;  %v1494_v57 = vld [vmem:[#allocation19 + $0xf10] sm:$0xff]  ;;  %v1059_v43 = vld [vmem:[#allocation19 + $0x178] sm:$0xff]  ;;  %v1056_v44 = vld [vmem:[#allocation19 + $0x160] sm:$0xff] }
 0x44c   :  { %2810 = vmatprep.subr.bf16.mxu0 %v2809_v61  ;;  %2938 = vmatprep.subr.bf16.mxu1 %v2937_v62  ;;  %v1502_v58 = vld [vmem:[#allocation19 + $0xf50] sm:$0xff]  ;;  %v1511_v61 = vld [vmem:[#allocation19 + $0xf98] sm:$0xff] }
 0x44d   :  { %v1519_v62 = vld [vmem:[#allocation19 + $0xfd8] sm:$0xff]  ;;  %v2955_v2 = vpack.c.bf16 %v1502_v58, %v1494_v57  ;;  %v2971_v58 = vpack.c.bf16 %v1056_v44, %v1048_v48 }
 0x44e   :  { %v2957_v8 = vpack.c.bf16 %v1519_v62, %v1511_v61  ;;  %v1075_v57 = vld [vmem:[#allocation19 + $0x1f8] sm:$0xff]  ;;  %v1072_v61 = vld [vmem:[#allocation19 + $0x1e0] sm:$0xff]  ;;  %v1066_v62 = vld [vmem:[#allocation19 + $0x1b0] sm:$0xff] }
 0x44f   :  { %2812 = vmatpush1.bf16.msra.mxu0 %v2811_v11  ;;  %2940 = vmatpush1.bf16.msra.mxu1 %v2939_v16  ;;  %v1510_v11 = vld [vmem:[#allocation19 + $0xf90] sm:$0xff]  ;;  %v1115_v32 = vld [vmem:[#allocation19 + $0x338] sm:$0xff] }
 0x450   :  { %2814 = vmatprep.subr.bf16.mxu0 %v2813_v7  ;;  %2942 = vmatprep.subr.bf16.mxu1 %v2941_v9  ;;  %v1518_v16 = vld [vmem:[#allocation19 + $0xfd0] sm:$0xff]  ;;  %v1019_v7 = vld [vmem:[#allocation19 + $0x38] sm:$0xff] }
 0x451   :  { %v1027_v9 = vld [vmem:[#allocation19 + $0x78] sm:$0xff]  ;;  %v2959_v20 = vpack.c.bf16 %v1518_v16, %v1510_v11 }
 0x452   :  { %v3089_v23 = vpack.c.bf16 %v1027_v9, %v1019_v7  ;;  %v1088_v7 = vld [vmem:[#allocation19 + $0x260] sm:$0xff]  ;;  %v1082_v9 = vld [vmem:[#allocation19 + $0x230] sm:$0xff]  ;;  %v1131_v48 = vld [vmem:[#allocation19 + $0x3b8] sm:$0xff] }
 0x453   :  { %2816 = vmatpush1.bf16.msra.mxu0 %v2815_v25  ;;  %2944 = vmatpush1.bf16.msra.mxu1 %v2943_v26  ;;  %v1024_v25 = vld [vmem:[#allocation19 + $0x60] sm:$0xff]  ;;  %v1018_v26 = vld [vmem:[#allocation19 + $0x30] sm:$0xff]  ;;  %v1139_v44 = vld [vmem:[#allocation19 + $0x3f8] sm:$0xff] }
 0x454   :  { %2818 = vmatprep.subr.bf16.mxu0 %v2817_v12  ;;  %2946 = vmatprep.subr.bf16.mxu1 %v2945_v13  ;;  %v1041_v12 = vld [vmem:[#allocation19 + $0xe8] sm:$0xff]  ;;  %v1035_v13 = vld [vmem:[#allocation19 + $0xb8] sm:$0xff]  ;;  %v2963_v14 = vpack.c.bf16 %v1024_v25, %v1016_v24  ;;  %v3091_v41 = vpack.c.bf16 %v1026_v27, %v1018_v26  ;;  %v2979_v25 = vpack.c.bf16 %v1088_v7, %v1080_v18 }
 0x455   :  { %v3093_v36 = vpack.c.bf16 %v1043_v29, %v1035_v13  ;;  %v1107_v24 = vld [vmem:[#allocation19 + $0x2f8] sm:$0xff]  ;;  %v1098_v13 = vld [vmem:[#allocation19 + $0x2b0] sm:$0xff] }
 0x456   :  { %v1163_v18 = vld [vmem:[#allocation19 + $0x4b8] sm:$0xff] }
 0x457   :  { %2820 = vmatpush1.bf16.msra.mxu0 %v2819_v34  ;;  %2948 = vmatpush1.bf16.msra.mxu1 %v2947_v35  ;;  %v1034_v34 = vld [vmem:[#allocation19 + $0xb0] sm:$0xff]  ;;  %v2965_v35 = vpack.c.bf16 %v1041_v12, %v1033_v28  ;;  %v1096_v28 = vld [vmem:[#allocation19 + $0x2a0] sm:$0xff]  ;;  %v1171_v7 = vld [vmem:[#allocation19 + $0x4f8] sm:$0xff] }
 0x458   :  { %2822 = vmatprep.subr.bf16.mxu0 %v2821_v38  ;;  %2950 = vmatprep.subr.bf16.mxu1 %v2949_v39  ;;  %v1049_v38 = vld [vmem:[#allocation19 + $0x128] sm:$0xff]  ;;  %v3095_v47 = vpack.c.bf16 %v1042_v37, %v1034_v34  ;;  %v1104_v12 = vld [vmem:[#allocation19 + $0x2e0] sm:$0xff]  ;;  %v1123_v34 = vld [vmem:[#allocation19 + $0x378] sm:$0xff] }
 0x459   :  { %v1057_v39 = vld [vmem:[#allocation19 + $0x168] sm:$0xff] }
 0x45a   :  { %v2969_v40 = vpack.c.bf16 %v1057_v39, %v1049_v38  ;;  %v1112_v38 = vld [vmem:[#allocation19 + $0x320] sm:$0xff] }
 0x45b   :  { %2824 = vmatpush1.bf16.msra.mxu0 %v2823_v49  ;;  %2952 = vmatpush1.bf16.msra.mxu1 %v2951_v45  ;;  %v1050_v49 = vld [vmem:[#allocation19 + $0x130] sm:$0xff]  ;;  %v3097_v45 = vpack.c.bf16 %v1059_v43, %v1051_v42  ;;  %v1120_v39 = vld [vmem:[#allocation19 + $0x360] sm:$0xff]  ;;  %v3113_v43 = vpack.c.bf16 %v1123_v34, %v1115_v32 }
 0x45c   :  { %2826 = vmatprep.subr.bf16.mxu0 %v2825_v52  ;;  %2954 = vmatprep.subr.bf16.mxu1 %v2953_v53  ;;  %v1073_v52 = vld [vmem:[#allocation19 + $0x1e8] sm:$0xff]  ;;  %v1067_v53 = vld [vmem:[#allocation19 + $0x1b8] sm:$0xff]  ;;  %v3099_v59 = vpack.c.bf16 %v1058_v50, %v1050_v49  ;;  %v1114_v42 = vld [vmem:[#allocation19 + $0x330] sm:$0xff]  ;;  %v2987_v49 = vpack.c.bf16 %v1120_v39, %v1112_v38 }
 0x45d   :  { %v2973_v60 = vpack.c.bf16 %v1073_v52, %v1065_v51  ;;  %v1128_v51 = vld [vmem:[#allocation19 + $0x3a0] sm:$0xff]  ;;  %v1178_v32 = vld [vmem:[#allocation19 + $0x530] sm:$0xff]  ;;  %v1195_v38 = vld [vmem:[#allocation19 + $0x5b8] sm:$0xff] }
 0x45e   :  { %v1136_v52 = vld [vmem:[#allocation19 + $0x3e0] sm:$0xff]  ;;  %v1203_v39 = vld [vmem:[#allocation19 + $0x5f8] sm:$0xff] }
 0x45f   :  { %2828 = vmatpush1.bf16.msra.mxu0 %v2827_v63  ;;  %2956 = vmatpush1.bf16.msra.mxu1 %v2955_v2  ;;  %v3101_v63 = vpack.c.bf16 %v1075_v57, %v1067_v53  ;;  %v1074_v2 = vld [vmem:[#allocation19 + $0x1f0] sm:$0xff]  ;;  %v3117_v57 = vpack.c.bf16 %v1139_v44, %v1131_v48  ;;  %v3133_v44 = vpack.c.bf16 %v1203_v39, %v1195_v38 }
 0x460   :  { %2830 = vmatprep.subr.bf16.mxu0 %v2829_v6  ;;  %2958 = vmatprep.subr.bf16.mxu1 %v2957_v8  ;;  %v1083_v6 = vld [vmem:[#allocation19 + $0x238] sm:$0xff]  ;;  %v3103_v16 = vpack.c.bf16 %v1074_v2, %v1066_v62  ;;  %v1130_v53 = vld [vmem:[#allocation19 + $0x3b0] sm:$0xff]  ;;  %v2991_v62 = vpack.c.bf16 %v1136_v52, %v1128_v51 }
 0x461   :  { %v1091_v8 = vld [vmem:[#allocation19 + $0x278] sm:$0xff]  ;;  %v1194_v48 = vld [vmem:[#allocation19 + $0x5b0] sm:$0xff] }
 0x462   :  { %v1211_v51 = vld [vmem:[#allocation19 + $0x638] sm:$0xff]  ;;  %v1258_v38 = vld [vmem:[#allocation19 + $0x7b0] sm:$0xff] }
 0x463   :  { %2832 = vmatpush1.bf16.msra.mxu0 %v2831_v19  ;;  %2960 = vmatpush1.bf16.msra.mxu1 %v2959_v20  ;;  %v3105_v19 = vpack.c.bf16 %v1091_v8, %v1083_v6  ;;  %v1090_v20 = vld [vmem:[#allocation19 + $0x270] sm:$0xff]  ;;  %v1219_v52 = vld [vmem:[#allocation19 + $0x678] sm:$0xff] }
 0x464   :  { %2962 = vmatprep.subr.bf16.mxu0 %v2961_v22  ;;  %3090 = vmatprep.subr.bf16.mxu1 %v3089_v23  ;;  %v1105_v22 = vld [vmem:[#allocation19 + $0x2e8] sm:$0xff]  ;;  %v1099_v23 = vld [vmem:[#allocation19 + $0x2b8] sm:$0xff]  ;;  %v3107_v26 = vpack.c.bf16 %v1090_v20, %v1082_v9  ;;  %v1146_v6 = vld [vmem:[#allocation19 + $0x430] sm:$0xff]  ;;  %v2995_v9 = vpack.c.bf16 %v1152_v5, %v1144_v4 }
 0x465   :  { %v2981_v27 = vpack.c.bf16 %v1105_v22, %v1097_v21  ;;  %v3109_v29 = vpack.c.bf16 %v1107_v24, %v1099_v23  ;;  %v1160_v21 = vld [vmem:[#allocation19 + $0x4a0] sm:$0xff]  ;;  %v1162_v23 = vld [vmem:[#allocation19 + $0x4b0] sm:$0xff]  ;;  %v3125_v24 = vpack.c.bf16 %v1171_v7, %v1163_v18  ;;  %v1227_v4 = vld [vmem:[#allocation19 + $0x6b8] sm:$0xff] }
 0x466   :  { %1702 = vmatmul.mubr.f32.vlgmr.msra.gmra.mrb[4].mxu0 %v4025_v30  ;;  %1844 = vmatmul.mubr.f32.vlgmr.msra.gmra.mrb[4].mxu1 %v4025_v30  ;;  %v1168_v22 = vld [vmem:[#allocation19 + $0x4e0] sm:$0xff]  ;;  %v1235_v5 = vld [vmem:[#allocation19 + $0x6f8] sm:$0xff]  ;;  %v1226_v18 = vld [vmem:[#allocation19 + $0x6b0] sm:$0xff] }
 0x467   :  { %2964 = vmatpush1.bf16.msra.mxu0 %v2963_v14  ;;  %1914 = vmatprep.mubr.f32.mxu0 %v4011_v54  ;;  %v1106_v14 = vld [vmem:[#allocation19 + $0x2f0] sm:$0xff]  ;;  %v3141_v7 = vpack.c.bf16 %v1235_v5, %v1227_v4 }
 0x468   :  { %3092 = vmatpush1.bf16.msra.mxu1 %v3091_v41  ;;  %2056 = vmatprep.mubr.f32.mxu1 %v4011_v54  ;;  %v1064_v54 = vld [vmem:[#allocation19 + $0x1a0] sm:$0xff]  ;;  %v1113_v41 = vld [vmem:[#allocation19 + $0x328] sm:$0xff]  ;;  %v1298_v5 = vld [vmem:[#allocation19 + $0x8f0] sm:$0xff] }
 0x469   :  { %2966 = vmatprep.subr.bf16.mxu0 %v2965_v35  ;;  %3094 = vmatprep.subr.bf16.mxu1 %v3093_v36  ;;  %v2975_v11 = vpack.c.bf16 %v1072_v61, %v1064_v54  ;;  %v2983_v35 = vpack.c.bf16 %v1104_v12, %v1096_v28  ;;  %v3111_v36 = vpack.c.bf16 %v1106_v14, %v1098_v13  ;;  %v1147_v54 = vld [vmem:[#allocation19 + $0x438] sm:$0xff] }
 0x46a   :  { %v2985_v37 = vpack.c.bf16 %v1121_v15, %v1113_v41  ;;  %v1155_v61 = vld [vmem:[#allocation19 + $0x478] sm:$0xff]  ;;  %v2999_v13 = vpack.c.bf16 %v1168_v22, %v1160_v21  ;;  %v1176_v41 = vld [vmem:[#allocation19 + $0x520] sm:$0xff] }
 0x46b   :  { %2968 = vmatpush1.bf16.msra.mxu0 %v2967_v46  ;;  %v1122_v46 = vld [vmem:[#allocation19 + $0x370] sm:$0xff]  ;;  %v3121_v8 = vpack.c.bf16 %v1155_v61, %v1147_v54  ;;  %v1179_v28 = vld [vmem:[#allocation19 + $0x538] sm:$0xff]  ;;  %v1184_v15 = vld [vmem:[#allocation19 + $0x560] sm:$0xff]  ;;  %v3137_v61 = vpack.c.bf16 %v1219_v52, %v1211_v51 }
 0x46c   :  { %3096 = vmatpush1.bf16.msra.mxu1 %v3095_v47  ;;  %2970 = vmatprep.subr.bf16.mxu0 %v2969_v40  ;;  %v1129_v47 = vld [vmem:[#allocation19 + $0x3a8] sm:$0xff]  ;;  %v1187_v12 = vld [vmem:[#allocation19 + $0x578] sm:$0xff]  ;;  %v1210_v54 = vld [vmem:[#allocation19 + $0x630] sm:$0xff] }
 0x46d   :  { %3098 = vmatprep.subr.bf16.mxu1 %v3097_v45  ;;  %v1137_v40 = vld [vmem:[#allocation19 + $0x3e8] sm:$0xff]  ;;  %v3115_v45 = vpack.c.bf16 %v1122_v46, %v1114_v42  ;;  %v3129_v34 = vpack.c.bf16 %v1187_v12, %v1179_v28  ;;  %v3003_v42 = vpack.c.bf16 %v1184_v15, %v1176_v41  ;;  %v1243_v21 = vld [vmem:[#allocation19 + $0x738] sm:$0xff]  ;;  %v1242_v28 = vld [vmem:[#allocation19 + $0x730] sm:$0xff] }
 0x46e   :  { %v2989_v50 = vpack.c.bf16 %v1137_v40, %v1129_v47  ;;  %v1192_v47 = vld [vmem:[#allocation19 + $0x5a0] sm:$0xff]  ;;  %v1251_v22 = vld [vmem:[#allocation19 + $0x778] sm:$0xff]  ;;  %v1274_v52 = vld [vmem:[#allocation19 + $0x830] sm:$0xff] }
 0x46f   :  { %2972 = vmatpush1.bf16.msra.mxu0 %v2971_v58  ;;  %v1138_v58 = vld [vmem:[#allocation19 + $0x3f0] sm:$0xff]  ;;  %v1200_v40 = vld [vmem:[#allocation19 + $0x5e0] sm:$0xff]  ;;  %v3145_v12 = vpack.c.bf16 %v1251_v22, %v1243_v21  ;;  %v1259_v41 = vld [vmem:[#allocation19 + $0x7b8] sm:$0xff] }
 0x470   :  { %3100 = vmatpush1.bf16.msra.mxu1 %v3099_v59  ;;  %2974 = vmatprep.subr.bf16.mxu0 %v2973_v60  ;;  %v1145_v59 = vld [vmem:[#allocation19 + $0x428] sm:$0xff]  ;;  %v1267_v15 = vld [vmem:[#allocation19 + $0x7f8] sm:$0xff]  ;;  %v1306_v21 = vld [vmem:[#allocation19 + $0x930] sm:$0xff] }
 0x471   :  { %3102 = vmatprep.subr.bf16.mxu1 %v3101_v63  ;;  %v1153_v60 = vld [vmem:[#allocation19 + $0x468] sm:$0xff]  ;;  %v3119_v63 = vpack.c.bf16 %v1138_v58, %v1130_v53  ;;  %v3007_v53 = vpack.c.bf16 %v1200_v40, %v1192_v47  ;;  %v3149_v39 = vpack.c.bf16 %v1267_v15, %v1259_v41  ;;  %v1275_v47 = vld [vmem:[#allocation19 + $0x838] sm:$0xff] }
 0x472   :  { %v2993_v2 = vpack.c.bf16 %v1153_v60, %v1145_v59  ;;  %v1208_v59 = vld [vmem:[#allocation19 + $0x620] sm:$0xff]  ;;  %v1283_v40 = vld [vmem:[#allocation19 + $0x878] sm:$0xff]  ;;  %v1337_v15 = vld [vmem:[#allocation19 + $0xa28] sm:$0xff] }
 0x473   :  { %2976 = vmatpush1.bf16.msra.mxu0 %v2975_v11  ;;  %v1154_v11 = vld [vmem:[#allocation19 + $0x470] sm:$0xff]  ;;  %v1216_v60 = vld [vmem:[#allocation19 + $0x660] sm:$0xff]  ;;  %v3153_v51 = vpack.c.bf16 %v1283_v40, %v1275_v47  ;;  %v1353_v40 = vld [vmem:[#allocation19 + $0xaa8] sm:$0xff] }
 0x474   :  { %3104 = vmatpush1.bf16.msra.mxu1 %v3103_v16  ;;  %2978 = vmatprep.subr.bf16.mxu0 %v2977_v17  ;;  %v1161_v16 = vld [vmem:[#allocation19 + $0x4a8] sm:$0xff]  ;;  %v1346_v47 = vld [vmem:[#allocation19 + $0xa70] sm:$0xff] }
 0x475   :  { %3106 = vmatprep.subr.bf16.mxu1 %v3105_v19  ;;  %v1169_v17 = vld [vmem:[#allocation19 + $0x4e8] sm:$0xff]  ;;  %v3123_v19 = vpack.c.bf16 %v1154_v11, %v1146_v6  ;;  %v3011_v6 = vpack.c.bf16 %v1216_v60, %v1208_v59  ;;  %v1291_v60 = vld [vmem:[#allocation19 + $0x8b8] sm:$0xff] }
 0x476   :  { %v2997_v20 = vpack.c.bf16 %v1169_v17, %v1161_v16  ;;  %v1224_v16 = vld [vmem:[#allocation19 + $0x6a0] sm:$0xff] }
 0x477   :  { %2980 = vmatpush1.bf16.msra.mxu0 %v2979_v25  ;;  %v1170_v25 = vld [vmem:[#allocation19 + $0x4f0] sm:$0xff]  ;;  %v1232_v17 = vld [vmem:[#allocation19 + $0x6e0] sm:$0xff] }
 0x478   :  { %3108 = vmatpush1.bf16.msra.mxu1 %v3107_v26  ;;  %2982 = vmatprep.subr.bf16.mxu0 %v2981_v27  ;;  %v1177_v26 = vld [vmem:[#allocation19 + $0x528] sm:$0xff] }
 0x479   :  { %3110 = vmatprep.subr.bf16.mxu1 %v3109_v29  ;;  %v1185_v27 = vld [vmem:[#allocation19 + $0x568] sm:$0xff]  ;;  %v3127_v29 = vpack.c.bf16 %v1170_v25, %v1162_v23  ;;  %v3015_v23 = vpack.c.bf16 %v1232_v17, %v1224_v16  ;;  %v1307_v16 = vld [vmem:[#allocation19 + $0x938] sm:$0xff] }
 0x47a   :  { %v3001_v14 = vpack.c.bf16 %v1185_v27, %v1177_v26  ;;  %v1240_v26 = vld [vmem:[#allocation19 + $0x720] sm:$0xff]  ;;  %v1315_v17 = vld [vmem:[#allocation19 + $0x978] sm:$0xff] }
 0x47b   :  { %2984 = vmatpush1.bf16.msra.mxu0 %v2983_v35  ;;  %v1186_v35 = vld [vmem:[#allocation19 + $0x570] sm:$0xff]  ;;  %v1248_v27 = vld [vmem:[#allocation19 + $0x760] sm:$0xff]  ;;  %v3161_v22 = vpack.c.bf16 %v1315_v17, %v1307_v16  ;;  %v1385_v17 = vld [vmem:[#allocation19 + $0xba8] sm:$0xff] }
 0x47c   :  { %3112 = vmatpush1.bf16.msra.mxu1 %v3111_v36  ;;  %2986 = vmatprep.subr.bf16.mxu0 %v2985_v37  ;;  %v1193_v36 = vld [vmem:[#allocation19 + $0x5a8] sm:$0xff]  ;;  %v1378_v16 = vld [vmem:[#allocation19 + $0xb70] sm:$0xff] }
 0x47d   :  { %3114 = vmatprep.subr.bf16.mxu1 %v3113_v43  ;;  %v1201_v37 = vld [vmem:[#allocation19 + $0x5e8] sm:$0xff]  ;;  %v3131_v43 = vpack.c.bf16 %v1186_v35, %v1178_v32  ;;  %v3019_v32 = vpack.c.bf16 %v1248_v27, %v1240_v26  ;;  %v1323_v26 = vld [vmem:[#allocation19 + $0x9b8] sm:$0xff] }
 0x47e   :  { %v3005_v46 = vpack.c.bf16 %v1201_v37, %v1193_v36  ;;  %v1256_v36 = vld [vmem:[#allocation19 + $0x7a0] sm:$0xff] }
 0x47f   :  { %2988 = vmatpush1.bf16.msra.mxu0 %v2987_v49  ;;  %v1202_v49 = vld [vmem:[#allocation19 + $0x5f0] sm:$0xff]  ;;  %v1264_v37 = vld [vmem:[#allocation19 + $0x7e0] sm:$0xff] }
 0x480   :  { %3116 = vmatpush1.bf16.msra.mxu1 %v3115_v45  ;;  %2990 = vmatprep.subr.bf16.mxu0 %v2989_v50  ;;  %v1209_v45 = vld [vmem:[#allocation19 + $0x628] sm:$0xff] }
 0x481   :  { %3118 = vmatprep.subr.bf16.mxu1 %v3117_v57  ;;  %v1217_v50 = vld [vmem:[#allocation19 + $0x668] sm:$0xff]  ;;  %v3135_v57 = vpack.c.bf16 %v1202_v49, %v1194_v48  ;;  %v3023_v48 = vpack.c.bf16 %v1264_v37, %v1256_v36 }
 0x482   :  { %v3009_v58 = vpack.c.bf16 %v1217_v50, %v1209_v45  ;;  %v1272_v45 = vld [vmem:[#allocation19 + $0x820] sm:$0xff] }
 0x483   :  { %2992 = vmatpush1.bf16.msra.mxu0 %v2991_v62  ;;  %v1218_v62 = vld [vmem:[#allocation19 + $0x670] sm:$0xff]  ;;  %v1280_v50 = vld [vmem:[#allocation19 + $0x860] sm:$0xff] }
 0x484   :  { %3120 = vmatpush1.bf16.msra.mxu1 %v3119_v63  ;;  %2994 = vmatprep.subr.bf16.mxu0 %v2993_v2  ;;  %v1225_v63 = vld [vmem:[#allocation19 + $0x6a8] sm:$0xff]  ;;  %v3027_v59 = vpack.c.bf16 %v1280_v50, %v1272_v45 }
 0x485   :  { %3122 = vmatprep.subr.bf16.mxu1 %v3121_v8  ;;  %v1233_v2 = vld [vmem:[#allocation19 + $0x6e8] sm:$0xff]  ;;  %v3139_v8 = vpack.c.bf16 %v1218_v62, %v1210_v54  ;;  %v1299_v54 = vld [vmem:[#allocation19 + $0x8f8] sm:$0xff]  ;;  %v1288_v62 = vld [vmem:[#allocation19 + $0x8a0] sm:$0xff] }
 0x486   :  { %v3013_v11 = vpack.c.bf16 %v1233_v2, %v1225_v63  ;;  %v1296_v63 = vld [vmem:[#allocation19 + $0x8e0] sm:$0xff]  ;;  %v1290_v2 = vld [vmem:[#allocation19 + $0x8b0] sm:$0xff] }
 0x487   :  { %2996 = vmatpush1.bf16.msra.mxu0 %v2995_v9  ;;  %v1234_v9 = vld [vmem:[#allocation19 + $0x6f0] sm:$0xff] }
 0x488   :  { %3124 = vmatpush1.bf16.msra.mxu1 %v3123_v19  ;;  %2998 = vmatprep.subr.bf16.mxu0 %v2997_v20  ;;  %v1241_v19 = vld [vmem:[#allocation19 + $0x728] sm:$0xff] }
 0x489   :  { %3126 = vmatprep.subr.bf16.mxu1 %v3125_v24  ;;  %v1249_v20 = vld [vmem:[#allocation19 + $0x768] sm:$0xff]  ;;  %v3143_v24 = vpack.c.bf16 %v1234_v9, %v1226_v18  ;;  %v3031_v18 = vpack.c.bf16 %v1296_v63, %v1288_v62  ;;  %v1379_v62 = vld [vmem:[#allocation19 + $0xb78] sm:$0xff] }
 0x48a   :  { %v3017_v25 = vpack.c.bf16 %v1249_v20, %v1241_v19  ;;  %v1304_v19 = vld [vmem:[#allocation19 + $0x920] sm:$0xff] }
 0x48b   :  { %3000 = vmatpush1.bf16.msra.mxu0 %v2999_v13  ;;  %v1250_v13 = vld [vmem:[#allocation19 + $0x770] sm:$0xff]  ;;  %v1312_v20 = vld [vmem:[#allocation19 + $0x960] sm:$0xff] }
 0x48c   :  { %3128 = vmatpush1.bf16.msra.mxu1 %v3127_v29  ;;  %3002 = vmatprep.subr.bf16.mxu0 %v3001_v14  ;;  %v1257_v29 = vld [vmem:[#allocation19 + $0x7a8] sm:$0xff]  ;;  %v3035_v27 = vpack.c.bf16 %v1312_v20, %v1304_v19 }
 0x48d   :  { %3130 = vmatprep.subr.bf16.mxu1 %v3129_v34  ;;  %v1265_v14 = vld [vmem:[#allocation19 + $0x7e8] sm:$0xff]  ;;  %v3147_v34 = vpack.c.bf16 %v1250_v13, %v1242_v28  ;;  %v1320_v13 = vld [vmem:[#allocation19 + $0x9a0] sm:$0xff] }
 0x48e   :  { %v3021_v35 = vpack.c.bf16 %v1265_v14, %v1257_v29  ;;  %v1328_v29 = vld [vmem:[#allocation19 + $0x9e0] sm:$0xff]  ;;  %v1322_v14 = vld [vmem:[#allocation19 + $0x9b0] sm:$0xff] }
 0x48f   :  { %3004 = vmatpush1.bf16.msra.mxu0 %v3003_v42  ;;  %v1266_v42 = vld [vmem:[#allocation19 + $0x7f0] sm:$0xff]  ;;  %v3039_v36 = vpack.c.bf16 %v1328_v29, %v1320_v13 }
 0x490   :  { %3132 = vmatpush1.bf16.msra.mxu1 %v3131_v43  ;;  %3006 = vmatprep.subr.bf16.mxu0 %v3005_v46  ;;  %v1273_v43 = vld [vmem:[#allocation19 + $0x828] sm:$0xff] }
 0x491   :  { %3134 = vmatprep.subr.bf16.mxu1 %v3133_v44  ;;  %v1281_v46 = vld [vmem:[#allocation19 + $0x868] sm:$0xff]  ;;  %v3151_v44 = vpack.c.bf16 %v1266_v42, %v1258_v38  ;;  %v1344_v42 = vld [vmem:[#allocation19 + $0xa60] sm:$0xff] }
 0x492   :  { %v3025_v49 = vpack.c.bf16 %v1281_v46, %v1273_v43  ;;  %v1338_v43 = vld [vmem:[#allocation19 + $0xa30] sm:$0xff] }
 0x493   :  { %3008 = vmatpush1.bf16.msra.mxu0 %v3007_v53  ;;  %v1282_v53 = vld [vmem:[#allocation19 + $0x870] sm:$0xff]  ;;  %v3171_v50 = vpack.c.bf16 %v1346_v47, %v1338_v43  ;;  %v1424_v47 = vld [vmem:[#allocation19 + $0xce0] sm:$0xff] }
 0x494   :  { %3136 = vmatpush1.bf16.msra.mxu1 %v3135_v57  ;;  %3010 = vmatprep.subr.bf16.mxu0 %v3009_v58  ;;  %v1289_v57 = vld [vmem:[#allocation19 + $0x8a8] sm:$0xff] }
 0x495   :  { %3138 = vmatprep.subr.bf16.mxu1 %v3137_v61  ;;  %v1297_v58 = vld [vmem:[#allocation19 + $0x8e8] sm:$0xff]  ;;  %v3155_v61 = vpack.c.bf16 %v1282_v53, %v1274_v52  ;;  %v1352_v52 = vld [vmem:[#allocation19 + $0xaa0] sm:$0xff] }
 0x496   :  { %v3029_v4 = vpack.c.bf16 %v1297_v58, %v1289_v57  ;;  %v1360_v53 = vld [vmem:[#allocation19 + $0xae0] sm:$0xff]  ;;  %v1354_v57 = vld [vmem:[#allocation19 + $0xab0] sm:$0xff] }
 0x497   :  { %3012 = vmatpush1.bf16.msra.mxu0 %v3011_v6  ;;  %v1305_v6 = vld [vmem:[#allocation19 + $0x928] sm:$0xff]  ;;  %v3047_v63 = vpack.c.bf16 %v1360_v53, %v1352_v52 }
 0x498   :  { %3140 = vmatpush1.bf16.msra.mxu1 %v3139_v8  ;;  %3014 = vmatprep.subr.bf16.mxu0 %v3013_v11  ;;  %v1313_v8 = vld [vmem:[#allocation19 + $0x968] sm:$0xff]  ;;  %v3157_v11 = vpack.c.bf16 %v1299_v54, %v1291_v60 }
 0x499   :  { %3142 = vmatprep.subr.bf16.mxu1 %v3141_v7  ;;  %v3159_v7 = vpack.c.bf16 %v1298_v5, %v1290_v2  ;;  %v3033_v9 = vpack.c.bf16 %v1313_v8, %v1305_v6  ;;  %v1369_v60 = vld [vmem:[#allocation19 + $0xb28] sm:$0xff]  ;;  %v1368_v5 = vld [vmem:[#allocation19 + $0xb20] sm:$0xff]  ;;  %v1370_v8 = vld [vmem:[#allocation19 + $0xb30] sm:$0xff] }
 0x49a   :  { %v1377_v54 = vld [vmem:[#allocation19 + $0xb68] sm:$0xff]  ;;  %v1376_v6 = vld [vmem:[#allocation19 + $0xb60] sm:$0xff]  ;;  %v3179_v20 = vpack.c.bf16 %v1378_v16, %v1370_v8 }
 0x49b   :  { %3016 = vmatpush1.bf16.msra.mxu0 %v3015_v23  ;;  %v1314_v23 = vld [vmem:[#allocation19 + $0x970] sm:$0xff]  ;;  %v3051_v19 = vpack.c.bf16 %v1376_v6, %v1368_v5  ;;  %v1456_v16 = vld [vmem:[#allocation19 + $0xde0] sm:$0xff] }
 0x49c   :  { %3144 = vmatpush1.bf16.msra.mxu1 %v3143_v24  ;;  %3018 = vmatprep.subr.bf16.mxu0 %v3017_v25  ;;  %v1321_v24 = vld [vmem:[#allocation19 + $0x9a8] sm:$0xff]  ;;  %v3163_v28 = vpack.c.bf16 %v1314_v23, %v1306_v21  ;;  %v1392_v23 = vld [vmem:[#allocation19 + $0xbe0] sm:$0xff] }
 0x49d   :  { %3146 = vmatprep.subr.bf16.mxu1 %v3145_v12  ;;  %v1329_v25 = vld [vmem:[#allocation19 + $0x9e8] sm:$0xff] }
 0x49e   :  { %v3037_v12 = vpack.c.bf16 %v1329_v25, %v1321_v24  ;;  %v1386_v24 = vld [vmem:[#allocation19 + $0xbb0] sm:$0xff] }
 0x49f   :  { %3020 = vmatpush1.bf16.msra.mxu0 %v3019_v32  ;;  %v1345_v32 = vld [vmem:[#allocation19 + $0xa68] sm:$0xff] }
 0x4a0   :  { %3148 = vmatpush1.bf16.msra.mxu1 %v3147_v34  ;;  %3022 = vmatprep.subr.bf16.mxu0 %v3021_v35  ;;  %v1339_v34 = vld [vmem:[#allocation19 + $0xa38] sm:$0xff]  ;;  %v3041_v38 = vpack.c.bf16 %v1345_v32, %v1337_v15  ;;  %v1402_v15 = vld [vmem:[#allocation19 + $0xc30] sm:$0xff] }
 0x4a1   :  { %3150 = vmatprep.subr.bf16.mxu1 %v3149_v39  ;;  %v1347_v35 = vld [vmem:[#allocation19 + $0xa78] sm:$0xff]  ;;  %v1336_v39 = vld [vmem:[#allocation19 + $0xa20] sm:$0xff] }
 0x4a2   :  { %v3169_v46 = vpack.c.bf16 %v1347_v35, %v1339_v34  ;;  %v3043_v45 = vpack.c.bf16 %v1344_v42, %v1336_v39  ;;  %v1410_v34 = vld [vmem:[#allocation19 + $0xc70] sm:$0xff]  ;;  %v1417_v35 = vld [vmem:[#allocation19 + $0xca8] sm:$0xff] }
 0x4a3   :  { %3024 = vmatpush1.bf16.msra.mxu0 %v3023_v48  ;;  %v1361_v48 = vld [vmem:[#allocation19 + $0xae8] sm:$0xff]  ;;  %v3187_v42 = vpack.c.bf16 %v1410_v34, %v1402_v15  ;;  %v1488_v34 = vld [vmem:[#allocation19 + $0xee0] sm:$0xff] }
 0x4a4   :  { %3152 = vmatpush1.bf16.msra.mxu1 %v3151_v44  ;;  %3026 = vmatprep.subr.bf16.mxu0 %v3025_v49  ;;  %v1355_v44 = vld [vmem:[#allocation19 + $0xab8] sm:$0xff] }
 0x4a5   :  { %3154 = vmatprep.subr.bf16.mxu1 %v3153_v51  ;;  %v1363_v49 = vld [vmem:[#allocation19 + $0xaf8] sm:$0xff]  ;;  %v3045_v51 = vpack.c.bf16 %v1361_v48, %v1353_v40  ;;  %v1418_v40 = vld [vmem:[#allocation19 + $0xcb0] sm:$0xff] }
 0x4a6   :  { %1915 = vmatmul.mubr.f32.vlgmr.msra.gmra.mrb[6].mxu0 %v4013_v55  ;;  %v3173_v58 = vpack.c.bf16 %v1363_v49, %v1355_v44  ;;  %v1426_v44 = vld [vmem:[#allocation19 + $0xcf0] sm:$0xff]  ;;  %v1433_v49 = vld [vmem:[#allocation19 + $0xd28] sm:$0xff] }
 0x4a7   :  { %2057 = vmatmul.mubr.f32.vlgmr.msra.gmra.mrb[6].mxu1 %v4013_v55  ;;  %3028 = vmatpush1.bf16.msra.mxu0 %v3027_v59  ;;  %v1331_v55 = vld [vmem:[#allocation19 + $0x9f8] sm:$0xff]  ;;  %v1362_v59 = vld [vmem:[#allocation19 + $0xaf0] sm:$0xff]  ;;  %v3191_v53 = vpack.c.bf16 %v1426_v44, %v1418_v40  ;;  %v1504_v44 = vld [vmem:[#allocation19 + $0xf60] sm:$0xff] }
 0x4a8   :  { %1985 = vmatprep.mubr.f32.mxu0 %v4019_v10  ;;  %3156 = vmatpush1.bf16.msra.mxu1 %v3155_v61  ;;  %v3165_v41 = vpack.c.bf16 %v1331_v55, %v1323_v26  ;;  %v1371_v61 = vld [vmem:[#allocation19 + $0xb38] sm:$0xff]  ;;  %v3175_v2 = vpack.c.bf16 %v1362_v59, %v1354_v57  ;;  %v1394_v26 = vld [vmem:[#allocation19 + $0xbf0] sm:$0xff]  ;;  %v1401_v55 = vld [vmem:[#allocation19 + $0xc28] sm:$0xff] }
 0x4a9   :  { %2127 = vmatprep.mubr.f32.mxu1 %v4019_v10  ;;  %3030 = vmatprep.subr.bf16.mxu0 %v3029_v4  ;;  %v1330_v10 = vld [vmem:[#allocation19 + $0x9f0] sm:$0xff]  ;;  %v3049_v4 = vpack.c.bf16 %v1377_v54, %v1369_v60  ;;  %v3183_v29 = vpack.c.bf16 %v1394_v26, %v1386_v24  ;;  %v1440_v59 = vld [vmem:[#allocation19 + $0xd60] sm:$0xff] }
 0x4aa   :  { %3158 = vmatprep.subr.bf16.mxu1 %v3157_v11  ;;  %v3167_v37 = vpack.c.bf16 %v1330_v10, %v1322_v14  ;;  %v3177_v11 = vpack.c.bf16 %v1379_v62, %v1371_v61  ;;  %v1408_v10 = vld [vmem:[#allocation19 + $0xc60] sm:$0xff]  ;;  %v1434_v60 = vld [vmem:[#allocation19 + $0xd30] sm:$0xff]  ;;  %v1449_v62 = vld [vmem:[#allocation19 + $0xda8] sm:$0xff] }
 0x4ab   :  { %3032 = vmatpush1.bf16.msra.mxu0 %v3031_v18  ;;  %v1393_v18 = vld [vmem:[#allocation19 + $0xbe8] sm:$0xff]  ;;  %v1442_v61 = vld [vmem:[#allocation19 + $0xd70] sm:$0xff]  ;;  %v1472_v26 = vld [vmem:[#allocation19 + $0xe60] sm:$0xff] }
 0x4ac   :  { %3160 = vmatpush1.bf16.msra.mxu1 %v3159_v7  ;;  %3034 = vmatprep.subr.bf16.mxu0 %v3033_v9  ;;  %v1387_v7 = vld [vmem:[#allocation19 + $0xbb8] sm:$0xff]  ;;  %v3053_v21 = vpack.c.bf16 %v1393_v18, %v1385_v17  ;;  %v3195_v6 = vpack.c.bf16 %v1442_v61, %v1434_v60  ;;  %v1450_v17 = vld [vmem:[#allocation19 + $0xdb0] sm:$0xff]  ;;  %v1520_v61 = vld [vmem:[#allocation19 + $0xfe0] sm:$0xff] }
 0x4ad   :  { %3162 = vmatprep.subr.bf16.mxu1 %v3161_v22  ;;  %v1395_v9 = vld [vmem:[#allocation19 + $0xbf8] sm:$0xff]  ;;  %v1384_v22 = vld [vmem:[#allocation19 + $0xba0] sm:$0xff] }
 0x4ae   :  { %v3181_v25 = vpack.c.bf16 %v1395_v9, %v1387_v7  ;;  %v3055_v13 = vpack.c.bf16 %v1392_v23, %v1384_v22  ;;  %v1458_v7 = vld [vmem:[#allocation19 + $0xdf0] sm:$0xff]  ;;  %v1465_v9 = vld [vmem:[#allocation19 + $0xe28] sm:$0xff] }
 0x4af   :  { %3036 = vmatpush1.bf16.msra.mxu0 %v3035_v27  ;;  %v1409_v27 = vld [vmem:[#allocation19 + $0xc68] sm:$0xff]  ;;  %v3199_v23 = vpack.c.bf16 %v1458_v7, %v1450_v17 }
 0x4b0   :  { %3164 = vmatpush1.bf16.msra.mxu1 %v3163_v28  ;;  %3038 = vmatprep.subr.bf16.mxu0 %v3037_v12  ;;  %v1403_v28 = vld [vmem:[#allocation19 + $0xc38] sm:$0xff]  ;;  %v3057_v14 = vpack.c.bf16 %v1409_v27, %v1401_v55  ;;  %v1466_v55 = vld [vmem:[#allocation19 + $0xe30] sm:$0xff] }
 0x4b1   :  { %3166 = vmatprep.subr.bf16.mxu1 %v3165_v41  ;;  %v1411_v12 = vld [vmem:[#allocation19 + $0xc78] sm:$0xff]  ;;  %v1400_v41 = vld [vmem:[#allocation19 + $0xc20] sm:$0xff] }
 0x4b2   :  { %v3185_v32 = vpack.c.bf16 %v1411_v12, %v1403_v28  ;;  %v3059_v39 = vpack.c.bf16 %v1408_v10, %v1400_v41  ;;  %v1474_v28 = vld [vmem:[#allocation19 + $0xe70] sm:$0xff]  ;;  %v1481_v12 = vld [vmem:[#allocation19 + $0xea8] sm:$0xff] }
 0x4b3   :  { %3040 = vmatpush1.bf16.msra.mxu0 %v3039_v36  ;;  %v1425_v36 = vld [vmem:[#allocation19 + $0xce8] sm:$0xff]  ;;  %v3203_v10 = vpack.c.bf16 %v1474_v28, %v1466_v55 }
 0x4b4   :  { %3168 = vmatpush1.bf16.msra.mxu1 %v3167_v37  ;;  %3042 = vmatprep.subr.bf16.mxu0 %v3041_v38  ;;  %v1419_v37 = vld [vmem:[#allocation19 + $0xcb8] sm:$0xff]  ;;  %v3061_v43 = vpack.c.bf16 %v1425_v36, %v1417_v35  ;;  %v1482_v35 = vld [vmem:[#allocation19 + $0xeb0] sm:$0xff] }
 0x4b5   :  { %3170 = vmatprep.subr.bf16.mxu1 %v3169_v46  ;;  %v1427_v38 = vld [vmem:[#allocation19 + $0xcf8] sm:$0xff]  ;;  %v1416_v46 = vld [vmem:[#allocation19 + $0xca0] sm:$0xff] }
 0x4b6   :  { %v3189_v48 = vpack.c.bf16 %v1427_v38, %v1419_v37  ;;  %v3063_v52 = vpack.c.bf16 %v1424_v47, %v1416_v46  ;;  %v1490_v37 = vld [vmem:[#allocation19 + $0xef0] sm:$0xff]  ;;  %v1497_v38 = vld [vmem:[#allocation19 + $0xf28] sm:$0xff] }
 0x4b7   :  { %3044 = vmatpush1.bf16.msra.mxu0 %v3043_v45  ;;  %v1441_v45 = vld [vmem:[#allocation19 + $0xd68] sm:$0xff]  ;;  %v3207_v47 = vpack.c.bf16 %v1490_v37, %v1482_v35 }
 0x4b8   :  { %3172 = vmatpush1.bf16.msra.mxu1 %v3171_v50  ;;  %3046 = vmatprep.subr.bf16.mxu0 %v3045_v51  ;;  %v1435_v50 = vld [vmem:[#allocation19 + $0xd38] sm:$0xff]  ;;  %v3065_v57 = vpack.c.bf16 %v1441_v45, %v1433_v49  ;;  %v1498_v49 = vld [vmem:[#allocation19 + $0xf30] sm:$0xff] }
 0x4b9   :  { %3174 = vmatprep.subr.bf16.mxu1 %v3173_v58  ;;  %v1443_v51 = vld [vmem:[#allocation19 + $0xd78] sm:$0xff]  ;;  %v1432_v58 = vld [vmem:[#allocation19 + $0xd20] sm:$0xff] }
 0x4ba   :  { %v3193_v54 = vpack.c.bf16 %v1443_v51, %v1435_v50  ;;  %v3067_v5 = vpack.c.bf16 %v1440_v59, %v1432_v58  ;;  %v1506_v50 = vld [vmem:[#allocation19 + $0xf70] sm:$0xff]  ;;  %v1513_v51 = vld [vmem:[#allocation19 + $0xfa8] sm:$0xff] }
 0x4bb   :  { %3048 = vmatpush1.bf16.msra.mxu0 %v3047_v63  ;;  %v1457_v63 = vld [vmem:[#allocation19 + $0xde8] sm:$0xff]  ;;  %v3211_v59 = vpack.c.bf16 %v1506_v50, %v1498_v49 }
 0x4bc   :  { %3176 = vmatpush1.bf16.msra.mxu1 %v3175_v2  ;;  %3050 = vmatprep.subr.bf16.mxu0 %v3049_v4  ;;  %v1451_v2 = vld [vmem:[#allocation19 + $0xdb8] sm:$0xff]  ;;  %v3069_v8 = vpack.c.bf16 %v1457_v63, %v1449_v62  ;;  %v1514_v63 = vld [vmem:[#allocation19 + $0xfb0] sm:$0xff] }
 0x4bd   :  { %3178 = vmatprep.subr.bf16.mxu1 %v3177_v11  ;;  %v1459_v4 = vld [vmem:[#allocation19 + $0xdf8] sm:$0xff]  ;;  %v1448_v11 = vld [vmem:[#allocation19 + $0xda0] sm:$0xff] }
 0x4be   :  { %v3197_v18 = vpack.c.bf16 %v1459_v4, %v1451_v2  ;;  %v3071_v22 = vpack.c.bf16 %v1456_v16, %v1448_v11  ;;  %v1522_v2 = vld [vmem:[#allocation19 + $0xff0] sm:$0xff] }
 0x4bf   :  { %3052 = vmatpush1.bf16.msra.mxu0 %v3051_v19  ;;  %v1473_v19 = vld [vmem:[#allocation19 + $0xe68] sm:$0xff] }
 0x4c0   :  { %3180 = vmatpush1.bf16.msra.mxu1 %v3179_v20  ;;  %3054 = vmatprep.subr.bf16.mxu0 %v3053_v21  ;;  %v1467_v20 = vld [vmem:[#allocation19 + $0xe38] sm:$0xff]  ;;  %v3073_v24 = vpack.c.bf16 %v1473_v19, %v1465_v9 }
 0x4c1   :  { %3182 = vmatprep.subr.bf16.mxu1 %v3181_v25  ;;  %v1475_v21 = vld [vmem:[#allocation19 + $0xe78] sm:$0xff]  ;;  %v1464_v25 = vld [vmem:[#allocation19 + $0xe20] sm:$0xff] }
 0x4c2   :  { %v3201_v27 = vpack.c.bf16 %v1475_v21, %v1467_v20  ;;  %v3075_v41 = vpack.c.bf16 %v1472_v26, %v1464_v25 }
 0x4c3   :  { %3056 = vmatpush1.bf16.msra.mxu0 %v3055_v13  ;;  %v1489_v13 = vld [vmem:[#allocation19 + $0xee8] sm:$0xff] }
 0x4c4   :  { %3184 = vmatpush1.bf16.msra.mxu1 %v3183_v29  ;;  %3058 = vmatprep.subr.bf16.mxu0 %v3057_v14  ;;  %v1483_v29 = vld [vmem:[#allocation19 + $0xeb8] sm:$0xff]  ;;  %v3077_v15 = vpack.c.bf16 %v1489_v13, %v1481_v12 }
 0x4c5   :  { %3186 = vmatprep.subr.bf16.mxu1 %v3185_v32  ;;  %v1491_v14 = vld [vmem:[#allocation19 + $0xef8] sm:$0xff]  ;;  %v1480_v32 = vld [vmem:[#allocation19 + $0xea0] sm:$0xff] }
 0x4c6   :  { %v3205_v36 = vpack.c.bf16 %v1491_v14, %v1483_v29  ;;  %v3079_v46 = vpack.c.bf16 %v1488_v34, %v1480_v32 }
 0x4c7   :  { %3060 = vmatpush1.bf16.msra.mxu0 %v3059_v39  ;;  %v1505_v39 = vld [vmem:[#allocation19 + $0xf68] sm:$0xff] }
 0x4c8   :  { %3188 = vmatpush1.bf16.msra.mxu1 %v3187_v42  ;;  %3062 = vmatprep.subr.bf16.mxu0 %v3061_v43  ;;  %v1499_v42 = vld [vmem:[#allocation19 + $0xf38] sm:$0xff]  ;;  %v3081_v40 = vpack.c.bf16 %v1505_v39, %v1497_v38 }
 0x4c9   :  { %3190 = vmatprep.subr.bf16.mxu1 %v3189_v48  ;;  %v1507_v43 = vld [vmem:[#allocation19 + $0xf78] sm:$0xff]  ;;  %v1496_v48 = vld [vmem:[#allocation19 + $0xf20] sm:$0xff] }
 0x4ca   :  { %v3209_v45 = vpack.c.bf16 %v1507_v43, %v1499_v42  ;;  %v3083_v58 = vpack.c.bf16 %v1504_v44, %v1496_v48 }
 0x4cb   :  { %3064 = vmatpush1.bf16.msra.mxu0 %v3063_v52  ;;  %v1521_v52 = vld [vmem:[#allocation19 + $0xfe8] sm:$0xff] }
 0x4cc   :  { %3192 = vmatpush1.bf16.msra.mxu1 %v3191_v53  ;;  %3066 = vmatprep.subr.bf16.mxu0 %v3065_v57  ;;  %v1515_v53 = vld [vmem:[#allocation19 + $0xfb8] sm:$0xff]  ;;  %v3085_v60 = vpack.c.bf16 %v1521_v52, %v1513_v51 }
 0x4cd   :  { %3194 = vmatprep.subr.bf16.mxu1 %v3193_v54  ;;  %v1523_v57 = vld [vmem:[#allocation19 + $0xff8] sm:$0xff]  ;;  %v1512_v54 = vld [vmem:[#allocation19 + $0xfa0] sm:$0xff] }
 0x4ce   :  { %v3213_v62 = vpack.c.bf16 %v1523_v57, %v1515_v53  ;;  %v3087_v4 = vpack.c.bf16 %v1520_v61, %v1512_v54 }
 0x4cf   :  { %3068 = vmatpush1.bf16.msra.mxu0 %v3067_v5  ;;  %v3215_v5 = vpack.c.bf16 %v1522_v2, %v1514_v63 }
 0x4d0   :  { %3196 = vmatpush1.bf16.msra.mxu1 %v3195_v6  ;;  %3070 = vmatprep.subr.bf16.mxu0 %v3069_v8  ;;  %v4037_v6 = vld [vmem:[#allocation21] sm:$0xff] }
 0x4d1   :  { %3198 = vmatprep.subr.bf16.mxu1 %v3197_v18  ;;  %v1529_v8 = vrot.slane %v4037_v6, %v3938_v1  ;;  %v1537_v11 = vrot.slane %v4037_v6, %v3957_v31  ;;  %v1533_v16 = vrot.slane %v4037_v6, %v3941_v3  ;;  %v1541_v17 = vrot.slane %v4037_v6, %v3960_v33 }
 0x4d3   :  { %3072 = vmatpush1.bf16.msra.mxu0 %v3071_v22 }
 0x4d4   :  { %3200 = vmatpush1.bf16.msra.mxu1 %v3199_v23  ;;  %3074 = vmatprep.subr.bf16.mxu0 %v3073_v24 }
 0x4d5   :  { %3202 = vmatprep.subr.bf16.mxu1 %v3201_v27 }
 0x4d7   :  { %3076 = vmatpush1.bf16.msra.mxu0 %v3075_v41 }
 0x4d8   :  { %3204 = vmatpush1.bf16.msra.mxu1 %v3203_v10  ;;  %3078 = vmatprep.subr.bf16.mxu0 %v3077_v15 }
 0x4d9   :  { %3206 = vmatprep.subr.bf16.mxu1 %v3205_v36 }
 0x4db   :  { %3080 = vmatpush1.bf16.msra.mxu0 %v3079_v46 }
 0x4dc   :  { %3208 = vmatpush1.bf16.msra.mxu1 %v3207_v47  ;;  %3082 = vmatprep.subr.bf16.mxu0 %v3081_v40 }
 0x4dd   :  { %3210 = vmatprep.subr.bf16.mxu1 %v3209_v45 }
 0x4df   :  { %3084 = vmatpush1.bf16.msra.mxu0 %v3083_v58 }
 0x4e0   :  { %3212 = vmatpush1.bf16.msra.mxu1 %v3211_v59  ;;  %3086 = vmatprep.subr.bf16.mxu0 %v3085_v60 }
 0x4e1   :  { %3214 = vmatprep.subr.bf16.mxu1 %v3213_v62 }
 0x4e3   :  { %3088 = vmatpush1.bf16.msra.mxu0 %v3087_v4 }
 0x4e4   :  { %3216 = vmatpush1.bf16.msra.mxu1 %v3215_v5 }
 0x4e6   :  { %1986 = vmatmul.mubr.f32.vlgmr.msra.gmra.mrb[6].mxu0 %v4025_v30 }
 0x4e7   :  { %2128 = vmatmul.mubr.f32.vlgmr.msra.gmra.mrb[6].mxu1 %v4025_v30 }
 0x539   :  { %v1703_v18 = vpop.f32.mrb[4].mxu0  ;;  %v1845_v7 = vpop.f32.mrb[4].mxu1 }
 0x53a   :  { %v4047_v9 = vadd.f32 %v1703_v18, %v1529_v8  ;;  %v4049_v19 = vadd.f32 %v1845_v7, %v1537_v11  ;;  %v1705_v30 = vpop.f32.mrb[5].mxu0  ;;  %v1847_v20 = vpop.f32.mrb[5].mxu1 }
 0x53b   :  { %v4051_v21 = vadd.f32 %v1705_v30, %v1533_v16  ;;  %v4053_v22 = vadd.f32 %v1847_v20, %v1541_v17 }
 0x53c   :  { %v2136_v23 = vrot.slane %v4047_v9, 4  ;;  %v2148_v24 = vrot.slane %v4049_v19, 4 }
 0x53d   :  { %v2142_v25 = vrot.slane %v4051_v21, 4  ;;  %v2154_v26 = vrot.slane %v4053_v22, 4 }
 0x53e   :  { %v2137_v55 = vadd.f32 %v4047_v9, %v2136_v23  ;;  %v2149_v27 = vadd.f32 %v4049_v19, %v2148_v24 }
 0x53f   :  { %v2143_v28 = vadd.f32 %v4051_v21, %v2142_v25  ;;  %v2155_v12 = vadd.f32 %v4053_v22, %v2154_v26 }
 0x540   :  { %v2138_v13 = vrot.slane %v2137_v55, 2  ;;  %v2150_v29 = vrot.slane %v2149_v27, 2 }
 0x541   :  { %v2144_v14 = vrot.slane %v2143_v28, 2  ;;  %v2156_v41 = vrot.slane %v2155_v12, 2 }
 0x542   :  { %v2139_v10 = vadd.f32 %v2138_v13, %v2137_v55  ;;  %v2151_v15 = vadd.f32 %v2150_v29, %v2149_v27 }
 0x543   :  { %v2145_v32 = vadd.f32 %v2144_v14, %v2143_v28  ;;  %v2157_v34 = vadd.f32 %v2156_v41, %v2155_v12 }
 0x544   :  { %v2140_v35 = vrot.slane %v2139_v10, 1  ;;  %v2152_v36 = vrot.slane %v2151_v15, 1 }
 0x545   :  { %v2146_v37 = vrot.slane %v2145_v32, 1  ;;  %v2158_v38 = vrot.slane %v2157_v34, 1 }
 0x546   :  { %v2141_v39 = vadd.f32 %v2140_v35, %v2139_v10  ;;  %v2153_v42 = vadd.f32 %v2152_v36, %v2151_v15 }
 0x547   :  { %v2147_v43 = vadd.f32 %v2146_v37, %v2145_v32  ;;  %v2159_v46 = vadd.f32 %v2158_v38, %v2157_v34  ;;  %v4067_v34 = vld [vmem:[#allocation22] sm:$0xff] }
 0x548   :  { %v2184_v47 = vmul.f32 0.125, %v2141_v39  ;;  %v2186_v40 = vmul.f32 0.125, %v2153_v42  ;;  %v2284_v35 = vrot.slane %v4067_v34, %v3938_v1  ;;  %v2292_v36 = vrot.slane %v4067_v34, %v3957_v31 }
 0x549   :  { %v2185_v48 = vmul.f32 0.125, %v2147_v43  ;;  %v2187_v44 = vmul.f32 0.125, %v2159_v46  ;;  %v2288_v37 = vrot.slane %v4067_v34, %v3941_v3  ;;  %v2296_v39 = vrot.slane %v4067_v34, %v3960_v33 }
 0x54a   :  { %v2192_v49 = vsub.f32 %v4047_v9, %v2184_v47  ;;  %v2194_v45 = vsub.f32 %v4049_v19, %v2186_v40 }
 0x54b   :  { %v2193_v50 = vsub.f32 %v4051_v21, %v2185_v48  ;;  %v2195_v51 = vsub.f32 %v4053_v22, %v2187_v44 }
 0x54c   :  { %v2200_v52 = vmul.f32 %v2192_v49, %v2192_v49  ;;  %v2202_v53 = vmul.f32 %v2194_v45, %v2194_v45 }
 0x54d   :  { %v2201_v57 = vmul.f32 %v2193_v50, %v2193_v50  ;;  %v2203_v58 = vmul.f32 %v2195_v51, %v2195_v51 }
 0x54e   :  { %v2208_v59 = vrot.slane %v2200_v52, 4  ;;  %v2220_v60 = vrot.slane %v2202_v53, 4 }
 0x54f   :  { %v2214_v54 = vrot.slane %v2201_v57, 4  ;;  %v2226_v61 = vrot.slane %v2203_v58, 4 }
 0x550   :  { %v2209_v62 = vadd.f32 %v2208_v59, %v2200_v52  ;;  %v2221_v63 = vadd.f32 %v2220_v60, %v2202_v53 }
 0x551   :  { %v2215_v2 = vadd.f32 %v2214_v54, %v2201_v57  ;;  %v2227_v4 = vadd.f32 %v2226_v61, %v2203_v58 }
 0x552   :  { %v2210_v5 = vrot.slane %v2209_v62, 2  ;;  %v2222_v8 = vrot.slane %v2221_v63, 2 }
 0x553   :  { %v2216_v11 = vrot.slane %v2215_v2, 2  ;;  %v2228_v16 = vrot.slane %v2227_v4, 2 }
 0x554   :  { %v2211_v17 = vadd.f32 %v2210_v5, %v2209_v62  ;;  %v2223_v18 = vadd.f32 %v2222_v8, %v2221_v63  ;;  %v4098_v62 = vsub.s32 4, %v3935_v0 }
 0x555   :  { %v2217_v7 = vadd.f32 %v2216_v11, %v2215_v2  ;;  %v2229_v30 = vadd.f32 %v2228_v16, %v2227_v4 }
 0x556   :  { %v2212_v20 = vrot.slane %v2211_v17, 1  ;;  %v2224_v23 = vrot.slane %v2223_v18, 1  ;;  %v1545_v63 = vrot.slane %v4037_v6, %v4098_v62 }
 0x557   :  { %v2218_v24 = vrot.slane %v2217_v7, 1  ;;  %v2230_v25 = vrot.slane %v2229_v30, 1 }
 0x558   :  { %v2213_v26 = vadd.f32 %v2212_v20, %v2211_v17  ;;  %v2225_v55 = vadd.f32 %v2224_v23, %v2223_v18 }
 0x559   :  { %v2219_v27 = vadd.f32 %v2218_v24, %v2217_v7  ;;  %v2231_v28 = vadd.f32 %v2230_v25, %v2229_v30 }
 0x55a   :  { %v2256_v12 = vmul.f32 0.125, %v2213_v26  ;;  %v2258_v13 = vmul.f32 0.125, %v2225_v55 }
 0x55b   :  { %v2257_v29 = vmul.f32 0.125, %v2219_v27  ;;  %v2259_v14 = vmul.f32 0.125, %v2231_v28 }
 0x55c   :  { %v2264_v41 = vadd.f32 0.8, %v2256_v12  ;;  %v2266_v10 = vadd.f32 0.8, %v2258_v13 }
 0x55d   :  { %v2265_v15 = vadd.f32 0.8, %v2257_v29  ;;  %v2267_v32 = vadd.f32 0.8, %v2259_v14 }
 0x55e   :  { %3272 = vrsqrt.f32 %v2264_v41 }
 0x55f   :  { %3274 = vrsqrt.f32 %v2266_v10 }
 0x560   :  { %3276 = vrsqrt.f32 %v2265_v15 }
 0x561   :  { %3278 = vrsqrt.f32 %v2267_v32 }
 0x568   :  { %v3273_v38 = vpop.eup %3272 }
 0x569   :  { %v3275_v42 = vpop.eup %3274  ;;  %v4077_v43 = vmul.f32 %v3273_v38, %v2284_v35 }
 0x56a   :  { %v3277_v46 = vpop.eup %3276  ;;  %v4079_v49 = vmul.f32 %v3275_v42, %v2292_v36 }
 0x56b   :  { %v3279_v45 = vpop.eup %3278  ;;  %v2329_v50 = vmul.f32 %v4077_v43, %v2184_v47  ;;  %v4082_v51 = vmul.f32 %v3277_v46, %v2288_v37 }
 0x56c   :  { %v2331_v52 = vmul.f32 %v4079_v49, %v2186_v40  ;;  %v4085_v53 = vmul.f32 %v3279_v45, %v2296_v39  ;;  %v4101_v40 = vsub.s32 6, %v3935_v0 }
 0x56d   :  { %v2330_v57 = vmul.f32 %v4082_v51, %v2185_v48  ;;  %v4104_v48 = vsub.s32 5, %v3935_v0 }
 0x56e   :  { %v2332_v58 = vmul.f32 %v4085_v53, %v2187_v44  ;;  %v4107_v44 = vsub.s32 7, %v3935_v0  ;;  %v1553_v2 = vrot.slane %v4037_v6, %v4101_v40 }
 0x56f   :  { %v2345_v59 = vcombine.low %v2329_v50, %v2330_v57  ;;  %v1549_v4 = vrot.slane %v4037_v6, %v4104_v48 }
 0x570   :  { %v2346_v60 = vcombine.low %v2331_v52, %v2332_v58  ;;  %v1557_v5 = vrot.slane %v4037_v6, %v4107_v44 }
 0x571   :  { %v4090_v54 = vrot.slane %v2345_v59, %v3948_v56 }
 0x572   :  { %v4093_v61 = vrot.slane %v2346_v60, %v3948_v56 }
 0x574   :  { %v2377_v47 = vcombine.low %v4090_v54, %v4093_v61 }
 0x5b9   :  { %v1987_v8 = vpop.f32.mrb[6].mxu0 }
 0x5ba   :  { %v4117_v11 = vadd.f32 %v1987_v8, %v1545_v63  ;;  %v2129_v16 = vpop.f32.mrb[6].mxu1  ;;  %v1989_v17 = vpop.f32.mrb[7].mxu0 }
 0x5bb   :  { %v4119_v18 = vadd.f32 %v2129_v16, %v1553_v2  ;;  %v4121_v0 = vadd.f32 %v1989_v17, %v1549_v4  ;;  %v2131_v7 = vpop.f32.mrb[7].mxu1 }
 0x5bc   :  { %v2160_v30 = vrot.slane %v4117_v11, 4  ;;  %v4124_v20 = vadd.f32 %v2131_v7, %v1557_v5 }
 0x5bd   :  { %v2172_v23 = vrot.slane %v4119_v18, 4  ;;  %v2166_v24 = vrot.slane %v4121_v0, 4 }
 0x5be   :  { %v2161_v6 = vadd.f32 %v4117_v11, %v2160_v30  ;;  %v2178_v25 = vrot.slane %v4124_v20, 4 }
 0x5bf   :  { %v2173_v26 = vadd.f32 %v4119_v18, %v2172_v23  ;;  %v2167_v55 = vadd.f32 %v4121_v0, %v2166_v24 }
 0x5c0   :  { %v2162_v27 = vrot.slane %v2161_v6, 2  ;;  %v2179_v28 = vadd.f32 %v4124_v20, %v2178_v25 }
 0x5c1   :  { %v2174_v12 = vrot.slane %v2173_v26, 2  ;;  %v2168_v13 = vrot.slane %v2167_v55, 2 }
 0x5c2   :  { %v2163_v29 = vadd.f32 %v2162_v27, %v2161_v6  ;;  %v2180_v14 = vrot.slane %v2179_v28, 2 }
 0x5c3   :  { %v2175_v41 = vadd.f32 %v2174_v12, %v2173_v26  ;;  %v2169_v10 = vadd.f32 %v2168_v13, %v2167_v55 }
 0x5c4   :  { %v2164_v15 = vrot.slane %v2163_v29, 1  ;;  %v2181_v32 = vadd.f32 %v2180_v14, %v2179_v28 }
 0x5c5   :  { %v2176_v35 = vrot.slane %v2175_v41, 1  ;;  %v2170_v36 = vrot.slane %v2169_v10, 1 }
 0x5c6   :  { %v2165_v37 = vadd.f32 %v2164_v15, %v2163_v29  ;;  %v2182_v38 = vrot.slane %v2181_v32, 1 }
 0x5c7   :  { %v2177_v39 = vadd.f32 %v2176_v35, %v2175_v41  ;;  %v2171_v42 = vadd.f32 %v2170_v36, %v2169_v10 }
 0x5c8   :  { %v2188_v46 = vmul.f32 0.125, %v2165_v37  ;;  %v2183_v45 = vadd.f32 %v2182_v38, %v2181_v32 }
 0x5c9   :  { %v2190_v50 = vmul.f32 0.125, %v2177_v39  ;;  %v2189_v52 = vmul.f32 0.125, %v2171_v42 }
 0x5ca   :  { %v2196_v57 = vsub.f32 %v4117_v11, %v2188_v46  ;;  %v2191_v58 = vmul.f32 0.125, %v2183_v45 }
 0x5cb   :  { %v2198_v59 = vsub.f32 %v4119_v18, %v2190_v50  ;;  %v2197_v60 = vsub.f32 %v4121_v0, %v2189_v52 }
 0x5cc   :  { %v2204_v63 = vmul.f32 %v2196_v57, %v2196_v57  ;;  %v2199_v2 = vsub.f32 %v4124_v20, %v2191_v58 }
 0x5cd   :  { %v2206_v4 = vmul.f32 %v2198_v59, %v2198_v59  ;;  %v2205_v5 = vmul.f32 %v2197_v60, %v2197_v60 }
 0x5ce   :  { %v2232_v8 = vrot.slane %v2204_v63, 4  ;;  %v2207_v16 = vmul.f32 %v2199_v2, %v2199_v2 }
 0x5cf   :  { %v2244_v17 = vrot.slane %v2206_v4, 4  ;;  %v2238_v7 = vrot.slane %v2205_v5, 4 }
 0x5d0   :  { %v2233_v30 = vadd.f32 %v2232_v8, %v2204_v63  ;;  %v2250_v23 = vrot.slane %v2207_v16, 4  ;;  %v2304_v8 = vrot.slane %v4067_v34, %v4104_v48 }
 0x5d1   :  { %v2245_v24 = vadd.f32 %v2244_v17, %v2206_v4  ;;  %v2239_v6 = vadd.f32 %v2238_v7, %v2205_v5  ;;  %v2300_v4 = vrot.slane %v4067_v34, %v4098_v62  ;;  %v2308_v5 = vrot.slane %v4067_v34, %v4101_v40 }
 0x5d2   :  { %v2234_v25 = vrot.slane %v2233_v30, 2  ;;  %v2251_v26 = vadd.f32 %v2250_v23, %v2207_v16  ;;  %v2312_v17 = vrot.slane %v4067_v34, %v4107_v44 }
 0x5d3   :  { %v2246_v55 = vrot.slane %v2245_v24, 2  ;;  %v2240_v27 = vrot.slane %v2239_v6, 2 }
 0x5d4   :  { %v2235_v28 = vadd.f32 %v2234_v25, %v2233_v30  ;;  %v2252_v12 = vrot.slane %v2251_v26, 2 }
 0x5d5   :  { %v2247_v13 = vadd.f32 %v2246_v55, %v2245_v24  ;;  %v2241_v29 = vadd.f32 %v2240_v27, %v2239_v6 }
 0x5d6   :  { %v2236_v14 = vrot.slane %v2235_v28, 1  ;;  %v2253_v41 = vadd.f32 %v2252_v12, %v2251_v26 }
 0x5d7   :  { %v2248_v10 = vrot.slane %v2247_v13, 1  ;;  %v2242_v15 = vrot.slane %v2241_v29, 1 }
 0x5d8   :  { %v2237_v32 = vadd.f32 %v2236_v14, %v2235_v28  ;;  %v2254_v35 = vrot.slane %v2253_v41, 1 }
 0x5d9   :  { %v2249_v36 = vadd.f32 %v2248_v10, %v2247_v13  ;;  %v2243_v37 = vadd.f32 %v2242_v15, %v2241_v29 }
 0x5da   :  { %v2260_v38 = vmul.f32 0.125, %v2237_v32  ;;  %v2255_v39 = vadd.f32 %v2254_v35, %v2253_v41  ;;  %v2411_v35 = vrot.slane %v4085_v53, %v3938_v1 }
 0x5db   :  { %v2262_v42 = vmul.f32 0.125, %v2249_v36  ;;  %v2261_v45 = vmul.f32 0.125, %v2243_v37  ;;  %v2135_v37 = vld [vmem:[#allocation24] sm:$0xff] }
 0x5dc   :  { %v2268_v57 = vadd.f32 0.8, %v2260_v38  ;;  %v2263_v59 = vmul.f32 0.125, %v2255_v39 }
 0x5dd   :  { %v2270_v60 = vadd.f32 0.8, %v2262_v42  ;;  %v2269_v63 = vadd.f32 0.8, %v2261_v45 }
 0x5de   :  { %3280 = vrsqrt.f32 %v2268_v57  ;;  %v2271_v2 = vadd.f32 0.8, %v2263_v59 }
 0x5df   :  { %3282 = vrsqrt.f32 %v2270_v60 }
 0x5e0   :  { %3284 = vrsqrt.f32 %v2269_v63 }
 0x5e1   :  { %3286 = vrsqrt.f32 %v2271_v2 }
 0x5e8   :  { %v3281_v16 = vpop.eup %3280 }
 0x5e9   :  { %v3283_v7 = vpop.eup %3282  ;;  %v2325_v30 = vmul.f32 %v3281_v16, %v2300_v4 }
 0x5ea   :  { %v3285_v23 = vpop.eup %3284  ;;  %v2327_v24 = vmul.f32 %v3283_v7, %v2308_v5 }
 0x5eb   :  { %v3287_v6 = vpop.eup %3286  ;;  %v2333_v25 = vmul.f32 %v2325_v30, %v2188_v46  ;;  %v2326_v26 = vmul.f32 %v3285_v23, %v2304_v8  ;;  %v2415_v36 = vrot.slane %v2325_v30, %v3938_v1 }
 0x5ec   :  { %v2335_v55 = vmul.f32 %v2327_v24, %v2190_v50  ;;  %v2423_v27 = vrot.slane %v2327_v24, %v3938_v1  ;;  %v2328_v28 = vmul.f32 %v3287_v6, %v2312_v17  ;;  %v2399_v50 = vrot.slane %v4077_v43, %v3938_v1 }
 0x5ed   :  { %v2334_v12 = vmul.f32 %v2326_v26, %v2189_v52  ;;  %v2407_v52 = vrot.slane %v4079_v49, %v3938_v1  ;;  %v2419_v43 = vrot.slane %v2326_v26, %v3938_v1 }
 0x5ee   :  { %v2434_v13 = vmul.f32 %v4119_v18, %v2423_v27  ;;  %v2336_v29 = vmul.f32 %v2328_v28, %v2191_v58  ;;  %v2427_v14 = vrot.slane %v2328_v28, %v3938_v1  ;;  %v2385_v18 = vrot.slane %v2377_v47, %v3948_v56 }
 0x5ef   :  { %v2347_v41 = vcombine.low %v2333_v25, %v2334_v12  ;;  %v2428_v49 = vmul.f32 %v4047_v9, %v2399_v50  ;;  %v2430_v39 = vmul.f32 %v4049_v19, %v2407_v52  ;;  %v2433_v47 = vmul.f32 %v4121_v0, %v2419_v43 }
 0x5f0   :  { %v2348_v10 = vcombine.low %v2335_v55, %v2336_v29  ;;  %v2435_v34 = vmul.f32 %v4124_v20, %v2427_v14  ;;  %v2403_v20 = vrot.slane %v4082_v51, %v3938_v1  ;;  %v2432_v51 = vmul.f32 %v4117_v11, %v2415_v36 }
 0x5f1   :  { %v2369_v15 = vrot.slane %v2347_v41, %v3948_v56 }
 0x5f2   :  { %v2376_v32 = vrot.slane %v2348_v10, %v3948_v56  ;;  %v2429_v61 = vmul.f32 %v4051_v21, %v2403_v20 }
 0x5f4   :  { %v2378_v46 = vcombine.low %v2369_v15, %v2376_v32 }
 0x5f6   :  { %v2392_v58 = vrot.slane %v2378_v46, %v3948_v56  ;;  %v2431_v56 = vmul.f32 %v4053_v22, %v2411_v35 }
 0x5f8   :  { %v2393_v38 = vcombine.low %v2385_v18, %v2392_v58 }
 0x5fa   :  { %v2395_v54 = vsub.f32 %v2135_v37, %v2393_v38 }
 0x5fc   :  { %v2440_v53 = vrot.slane %v2395_v54, %v3938_v1  ;;  %v2444_v42 = vrot.slane %v2395_v54, %v3941_v3  ;;  %v2448_v45 = vrot.slane %v2395_v54, %v3957_v31  ;;  %v2452_v57 = vrot.slane %v2395_v54, %v3960_v33 }
 0x5fd   :  { %v2456_v9 = vrot.slane %v2395_v54, %v4098_v62  ;;  %v2460_v19 = vrot.slane %v2395_v54, %v4104_v48  ;;  %v2464_v21 = vrot.slane %v2395_v54, %v4101_v40  ;;  %v2468_v22 = vrot.slane %v2395_v54, %v4107_v44 }
 0x5fe   :  { %v2477_v59 = vadd.f32 %v2440_v53, %v2428_v49  ;;  %v2478_v11 = vadd.f32 %v2444_v42, %v2429_v61  ;;  %v2479_v60 = vadd.f32 %v2448_v45, %v2430_v39  ;;  %v2480_v0 = vadd.f32 %v2452_v57, %v2431_v56 }
 0x5ff   :  { %v2481_v63 = vadd.f32 %v2456_v9, %v2432_v51  ;;  %v2482_v1 = vadd.f32 %v2460_v19, %v2433_v47  ;;  %v2483_v2 = vadd.f32 %v2464_v21, %v2434_v13  ;;  %v2484_v3 = vadd.f32 %v2468_v22, %v2435_v34 }
 0x600   :  { %v2485_v4 = vmul.f32 0.2, %v2477_v59  ;;  %v2486_v31 = vmul.f32 0.2, %v2478_v11  ;;  %v2487_v5 = vmul.f32 0.2, %v2479_v60 }
 0x601   :  { %v2488_v33 = vmul.f32 0.2, %v2480_v0  ;;  %v2489_v8 = vmul.f32 0.2, %v2481_v63  ;;  %v2490_v62 = vmul.f32 0.2, %v2482_v1 }
 0x602   :  { %v2491_v16 = vmul.f32 0.2, %v2483_v2  ;;  %v2492_v48 = vmul.f32 0.2, %v2484_v3  ;;  %v2493_v17 = vmax.f32 %v2477_v59, %v2485_v4  ;;  %v2494_v40 = vmax.f32 %v2478_v11, %v2486_v31 }
 0x603   :  { %v2495_v7 = vmax.f32 %v2479_v60, %v2487_v5  ;;  %v2496_v44 = vmax.f32 %v2480_v0, %v2488_v33  ;;  %v2497_v30 = vmax.f32 %v2481_v63, %v2489_v8  ;;  %v2498_v23 = vmax.f32 %v2482_v1, %v2490_v62 }
 0x604   :  { %v2499_v24 = vmax.f32 %v2483_v2, %v2491_v16  ;;  %v2500_v6 = vmax.f32 %v2484_v3, %v2492_v48  ;;  %2501 = vst [vmem:[%s4219_s15] sm:$0xff] %v2493_v17  ;;  %2502 = vst [vmem:[%s4219_s15 + $0x8] sm:$0xff] %v2494_v40 }
 0x605   :  { %2503 = vst [vmem:[%s4219_s15 + $0x10] sm:$0xff] %v2495_v7  ;;  %2504 = vst [vmem:[%s4219_s15 + $0x18] sm:$0xff] %v2496_v44 }
 0x606   :  { %2505 = vst [vmem:[%s4219_s15 + $0x20] sm:$0xff] %v2497_v30  ;;  %2506 = vst [vmem:[%s4219_s15 + $0x28] sm:$0xff] %v2498_v23 }
 0x607   :  { %2507 = vst [vmem:[%s4219_s15 + $0x30] sm:$0xff] %v2499_v24  ;;  %2508 = vst [vmem:[%s4219_s15 + $0x38] sm:$0xff] %v2500_v6 }
 0x608   :  { %2513 = vsyncpa [#allocation3], 1 }
 0x609   :  { %2514 = vsyncpa [#allocation5], 1 }
 0x60a   :  { %2515 = vsyncpa [#allocation8], 1 }
 0x60b   :  { %2516 = vsyncpa [#allocation11], 1 }
 0x60c   :  { %2517 = vsyncpa [#allocation14], 1 }
 0x60d   :  { %2518 = vsyncpa [#allocation17], 1 }
 0x60e   :  { %2519 = vsyncpa [#allocation20], 1 }
 0x60f   :  { %2520 = vsyncpa [#allocation23], 1 }

</bundles_post_ra>
